<compile_context>
chip_gen: v7x
topology: tpu7x:2x2x1
jax: 0.10.0
libtpu: 0.0.40
codegen_flags: <defaults>
</compile_context>

<pallas_src>
import functools

import jax
import jax.numpy as jnp
from jax import lax
from jax.experimental import pallas as pl
from jax.experimental.pallas import tpu as pltpu

C = 4        # self.c
LATENT = 2   # latent_dims

# Padded per-sample activation layouts: rows = height (padded to multiple of
# 8 sublanes), lanes = channel * padded_width (multiple of 128).
R1P, W1P = 16, 32      # trans_conv5 out: 13x13, 4 ch -> (16, 128)
R2P, W2P = 32, 32      # trans_conv6 out: 25x25, 4 ch -> (32, 128)
R3P, W3P = 56, 64      # trans_conv7 out: 49x49, 4 ch -> (56, 256)
R4P, W4P = 32, 128     # trans_conv8 out: 28x28, 1 ch -> (32, 128)


# ---------------------------------------------------------------------------
# Fused decoder kernel
# ---------------------------------------------------------------------------
def _decoder_kernel(enc_ref, g_ref, b1_ref,
                    m6_ref, l6_ref, b6_ref,
                    m7_ref, l7_ref, b7_ref,
                    m8_ref, l8_ref, b8_ref,
                    out_ref, *, batch, latent):
    b1 = b1_ref[...]                                  # (16, 128)
    gs = [g_ref[k] for k in range(latent)]            # latent x (16, 128)
    for b in range(batch):                            # static loop; batch is tiny
        # Layer 1: fused fc_dec + trans_conv5 (affine in the latent vector).
        x = b1
        for k in range(latent):
            x = x + enc_ref[b, k] * gs[k]             # SMEM scalar * VPU tile
        x = jnp.maximum(x, 0.0)                       # (16, 128)

        # Layers 2..4:  relu( sum_ki L[ki] @ (X @ M_cat)[:, ki block] + bias )
        for m_ref, l_ref, bias_ref in ((m6_ref, l6_ref, b6_ref),
                                       (m7_ref, l7_ref, b7_ref),
                                       (m8_ref, l8_ref, b8_ref)):
            t = jnp.dot(x, m_ref[...], preferred_element_type=jnp.float32)
            cp = t.shape[1] // 3                      # 128-lane aligned blocks
            acc = bias_ref[...]
            for k in range(3):
                acc = acc + jnp.dot(l_ref[k], t[:, k * cp:(k + 1) * cp],
                                    preferred_element_type=jnp.float32)
            x = jnp.maximum(acc, 0.0)

        out_ref[b] = x                                # (32, 128) lane-dense slab


# ---------------------------------------------------------------------------
# One-time operator preparation (pure weight preprocessing, outside hot path).
# All operators are per-sample -> independent of the batch size.
# ---------------------------------------------------------------------------
def _latent_ops(wfc, bfc, wt5, b5):
    """Fold fc_dec + trans_conv5 (pre-ReLU) into latent-space operators.

    Returns G: (latent, R1P, C*W1P) and B1: (R1P, C*W1P) such that the
    pre-ReLU trans_conv5 output of sample b (in the padded wide layout) is
    sum_k enc[b,k] * G[k] + B1.
    """
    latent = wfc.shape[0]
    imgs = jnp.concatenate([wfc, bfc[None, :]], axis=0).reshape(latent + 1, C, 7, 7)
    # ConvTranspose2d(k3,s2,p1) as a dilated convolution with the flipped kernel.
    wc = jnp.flip(wt5, axis=(2, 3)).transpose(1, 0, 2, 3)
    y = lax.conv_general_dilated(imgs, wc, (1, 1), [(1, 1), (1, 1)],
                                 lhs_dilation=(2, 2),
                                 dimension_numbers=("NCHW", "OIHW", "NCHW"),
                                 precision=lax.Precision.HIGHEST)
    # y: (latent+1, C, 13, 13) -> padded wide layout (latent+1, R1P, C*W1P)
    y = jnp.pad(y, ((0, 0), (0, 0), (0, R1P - 13), (0, W1P - 13)))
    wide = y.transpose(0, 2, 1, 3).reshape(latent + 1, R1P, C * W1P)
    g = wide[:latent]
    col = jnp.arange(C * W1P)
    valid = (jnp.arange(R1P)[:, None] < 13) & ((col % W1P) < 13)[None, :]
    b1 = wide[latent] + jnp.where(valid, b5[col // W1P][None, :], 0.0)
    return g, b1


def _tconv_ops(wt, bias, *, h_in, wp_in, rp_in, h_out, wp_out, rp_out):
    """ConvTranspose2d(k3,s2,p1) as  sum_ki L[ki] @ X @ M_cat[:, ki block].

    wt: (Cin, Cout, 3, 3) PyTorch ConvTranspose2d weight.
    Output pixel (2i+ki-1, 2j+kj-1) receives in[ci,i,j] * wt[ci,co,ki,kj].
    """
    cin, cout = wt.shape[0], wt.shape[1]
    # Right operator M_cat: (cin*wp_in, 3*cout*wp_out), ki blocks lane-aligned.
    j = jnp.arange(wp_in)
    xo = jnp.arange(wp_out)
    kj = xo[None, :] - 2 * j[:, None] + 1
    valid = (kj >= 0) & (kj <= 2) & (j[:, None] < h_in) & (xo[None, :] < h_out)
    m = wt[:, :, :, jnp.clip(kj, 0, 2)]               # (cin, cout, 3, wp_in, wp_out)
    m = jnp.where(valid[None, None, None], m, 0.0)
    m = m.transpose(2, 0, 3, 1, 4).reshape(3, cin * wp_in, cout * wp_out)
    m_cat = jnp.concatenate(list(m), axis=1)
    # Per-sample left operators L[ki]: (rp_out, rp_in) row scatter (exact 0/1).
    yo = jnp.arange(rp_out)[:, None]
    i = jnp.arange(rp_in)[None, :]
    ki = jnp.arange(3)[:, None, None]
    l = ((yo[None] == 2 * i[None] + ki - 1)
         & (yo[None] < h_out) & (i[None] < h_in)).astype(jnp.float32)
    # Bias block (zeros in the padded region so ReLU keeps pads at exactly 0).
    col = jnp.arange(cout * wp_out)
    bvalid = (jnp.arange(rp_out)[:, None] < h_out) & ((col % wp_out) < h_out)[None, :]
    bias_blk = jnp.where(bvalid, bias[col // wp_out][None, :], 0.0)
    return m_cat, l, bias_blk


def _final_conv_ops(w8, b8, *, h_in, wp_in, rp_in, h_out, wp_out, rp_out):
    """Conv2d(Cin->1, k3, s2, p4) as  sum_ki L[ki] @ X @ M_cat[:, ki block].

    w8: (1, Cin, 3, 3). Output pixel (z, x) reads in[ci, 2z+ki-4, 2x+kj-4]
    (zero outside [0, h_in)).  Only the 28x28 strided outputs are computed.
    """
    cin = w8.shape[1]
    j = jnp.arange(wp_in)
    xo = jnp.arange(wp_out)
    kj = j[:, None] - 2 * xo[None, :] + 4
    valid = (kj >= 0) & (kj <= 2) & (j[:, None] < h_in) & (xo[None, :] < h_out)
    m = w8[0][:, :, jnp.clip(kj, 0, 2)]               # (cin, 3, wp_in, wp_out)
    m = jnp.where(valid[None, None], m, 0.0)
    m = m.transpose(1, 0, 2, 3).reshape(3, cin * wp_in, wp_out)
    m_cat = jnp.concatenate(list(m), axis=1)
    z = jnp.arange(rp_out)[:, None]
    i = jnp.arange(rp_in)[None, :]
    ki = jnp.arange(3)[:, None, None]
    l = ((i[None] == 2 * z[None] + ki - 4)
         & (z[None] < h_out) & (i[None] < h_in)).astype(jnp.float32)
    bvalid = (jnp.arange(rp_out)[:, None] < h_out) & (jnp.arange(wp_out)[None, :] < h_out)
    bias_blk = jnp.where(bvalid, b8[0], 0.0)
    return m_cat, l, bias_blk


def prepare_operators(params):
    g, b1 = _latent_ops(params["fc_dec_w"], params["fc_dec_b"],
                        params["tc5_w"], params["tc5_b"])
    m6, l6, b6 = _tconv_ops(params["tc6_w"], params["tc6_b"],
                            h_in=13, wp_in=W1P, rp_in=R1P,
                            h_out=25, wp_out=W2P, rp_out=R2P)
    m7, l7, b7 = _tconv_ops(params["tc7_w"], params["tc7_b"],
                            h_in=25, wp_in=W2P, rp_in=R2P,
                            h_out=49, wp_out=W3P, rp_out=R3P)
    m8, l8, b8 = _final_conv_ops(params["c8_w"], params["c8_b"],
                                 h_in=49, wp_in=W3P, rp_in=R3P,
                                 h_out=28, wp_out=W4P, rp_out=R4P)
    return dict(g=g, b1=b1, m6=m6, l6=l6, b6=b6, m7=m7, l7=l7, b7=b7,
                m8=m8, l8=l8, b8=b8)


# ---------------------------------------------------------------------------
# Decoder forward: a single fused pallas_call
# ---------------------------------------------------------------------------
def decoder_forward(enc, ops):
    batch, latent = enc.shape
    kernel = functools.partial(_decoder_kernel, batch=batch, latent=latent)
    vm = pl.BlockSpec(memory_space=pltpu.MemorySpace.VMEM)
    sm = pl.BlockSpec(memory_space=pltpu.MemorySpace.SMEM)
    # Gridless fused form: at batch=2 the kernel is a few us; for batch >= 8
    # add a leading "parallel" batch grid axis (operators are batch-agnostic).
    y = pl.pallas_call(
        kernel,
        out_shape=jax.ShapeDtypeStruct((batch, R4P, W4P), jnp.float32),
        in_specs=[sm] + [vm] * 11,
        out_specs=vm,
    )(enc, ops["g"], ops["b1"],
      ops["m6"], ops["l6"], ops["b6"],
      ops["m7"], ops["l7"], ops["b7"],
      ops["m8"], ops["l8"], ops["b8"])
    return y[:, :28, :28].reshape(batch, 1, 28, 28)


# ---------------------------------------------------------------------------
# Parameters (deterministic synthetic init; only params used by forward)
# ---------------------------------------------------------------------------
def init_params(key):
    ks = jax.random.split(key, 10)

    def u(k, shape, fan_in):
        bound = 1.0 / jnp.sqrt(jnp.float32(fan_in))
        return jax.random.uniform(k, shape, jnp.float32, -bound, bound)

    p = {}
    p["fc_dec_w"] = u(ks[0], (LATENT, C * 7 * 7), LATENT)   # stored (in, out)
    p["fc_dec_b"] = u(ks[1], (C * 7 * 7,), LATENT)
    p["tc5_w"] = u(ks[2], (C, C, 3, 3), C * 9)   # ConvTranspose2d: (in,out,kh,kw)
    p["tc5_b"] = u(ks[3], (C,), C * 9)
    p["tc6_w"] = u(ks[4], (C, C, 3, 3), C * 9)
    p["tc6_b"] = u(ks[5], (C,), C * 9)
    p["tc7_w"] = u(ks[6], (C, C, 3, 3), C * 9)
    p["tc7_b"] = u(ks[7], (C,), C * 9)
    p["c8_w"] = u(ks[8], (1, C, 3, 3), C * 9)    # Conv2d: (out,in,kh,kw)
    p["c8_b"] = u(ks[9], (1,), C * 9)
    return p


# ---------------------------------------------------------------------------
# Pure-JAX reference (independent of the Pallas path)
# ---------------------------------------------------------------------------
def ref_forward(enc, p):
    dn = ("NCHW", "OIHW", "NCHW")
    x = enc @ p["fc_dec_w"] + p["fc_dec_b"]
    x = x.reshape(enc.shape[0], C, 7, 7)
    for name in ("tc5", "tc6", "tc7"):
        wt, b = p[f"{name}_w"], p[f"{name}_b"]
        wc = jnp.flip(wt, axis=(2, 3)).transpose(1, 0, 2, 3)
        x = lax.conv_general_dilated(x, wc, (1, 1), [(1, 1), (1, 1)],
                                     lhs_dilation=(2, 2), dimension_numbers=dn,
                                     precision=lax.Precision.HIGHEST)
        x = jax.nn.relu(x + b.reshape(1, -1, 1, 1))
    x = lax.conv_general_dilated(x, p["c8_w"], (2, 2), [(4, 4), (4, 4)],
                                 dimension_numbers=dn,
                                 precision=lax.Precision.HIGHEST)
    x = jax.nn.relu(x + p["c8_b"].reshape(1, -1, 1, 1))
    return x


if __name__ == "__main__":
    key = jax.random.PRNGKey(0)
    kp, kx = jax.random.split(key)
    params = init_params(kp)
    encoding = jax.random.normal(kx, (2, LATENT), jnp.float32)   # batch = 2

    ops = prepare_operators(params)            # one-time, batch-independent prep
    fwd = jax.jit(decoder_forward)
    out = jax.block_until_ready(fwd(encoding, ops))
    assert out.shape == (2, 1, 28, 28), out.shape

    ref = ref_forward(encoding, params)
    err = float(jnp.max(jnp.abs(out - ref)))
    assert jnp.allclose(out, ref, atol=2e-3, rtol=2e-3), err
    print("KERNEL_OK")
</pallas_src>

<mosaic_0001>
module attributes {stable_mosaic.version = 11 : i64} {
  func.func @_decoder_kernel(%arg0: memref<2x2xf32, #tpu.memory_space<smem>>, %arg1: memref<2x16x128xf32, #tpu.memory_space<vmem>>, %arg2: memref<16x128xf32, #tpu.memory_space<vmem>>, %arg3: memref<128x384xf32, #tpu.memory_space<vmem>>, %arg4: memref<3x32x16xf32, #tpu.memory_space<vmem>>, %arg5: memref<32x128xf32, #tpu.memory_space<vmem>>, %arg6: memref<128x768xf32, #tpu.memory_space<vmem>>, %arg7: memref<3x56x32xf32, #tpu.memory_space<vmem>>, %arg8: memref<56x256xf32, #tpu.memory_space<vmem>>, %arg9: memref<256x384xf32, #tpu.memory_space<vmem>>, %arg10: memref<3x32x56xf32, #tpu.memory_space<vmem>>, %arg11: memref<32x128xf32, #tpu.memory_space<vmem>>, %arg12: memref<2x32x128xf32, #tpu.memory_space<vmem>>) attributes {dimension_semantics = [], scalar_prefetch = 0 : i64, scratch_operands = 0 : i64, tpu.core_type = #tpu.core_type<tc>} {
    %c0 = arith.constant 0 : index
    %c0_0 = arith.constant 0 : index
    %0 = vector.load %arg2[%c0, %c0_0] : memref<16x128xf32, #tpu.memory_space<vmem>>, vector<16x128xf32>
    %c0_1 = arith.constant 0 : index
    %c0_2 = arith.constant 0 : index
    %c0_3 = arith.constant 0 : index
    %1 = vector.load %arg1[%c0_1, %c0_2, %c0_3] : memref<2x16x128xf32, #tpu.memory_space<vmem>>, vector<1x16x128xf32>
    %2 = vector.shape_cast %1 : vector<1x16x128xf32> to vector<16x128xf32>
    %c1 = arith.constant 1 : index
    %c0_4 = arith.constant 0 : index
    %c0_5 = arith.constant 0 : index
    %3 = vector.load %arg1[%c1, %c0_4, %c0_5] : memref<2x16x128xf32, #tpu.memory_space<vmem>>, vector<1x16x128xf32>
    %4 = vector.shape_cast %3 : vector<1x16x128xf32> to vector<16x128xf32>
    %c0_6 = arith.constant 0 : index
    %c0_7 = arith.constant 0 : index
    %5 = memref.load %arg0[%c0_6, %c0_7] : memref<2x2xf32, #tpu.memory_space<smem>>
    %6 = vector.broadcast %5 : f32 to vector<16x128xf32>
    %7 = arith.mulf %6, %2 : vector<16x128xf32>
    %8 = arith.addf %0, %7 : vector<16x128xf32>
    %c0_8 = arith.constant 0 : index
    %c1_9 = arith.constant 1 : index
    %9 = memref.load %arg0[%c0_8, %c1_9] : memref<2x2xf32, #tpu.memory_space<smem>>
    %10 = vector.broadcast %9 : f32 to vector<16x128xf32>
    %11 = arith.mulf %10, %4 : vector<16x128xf32>
    %12 = arith.addf %8, %11 : vector<16x128xf32>
    %cst = arith.constant 0.000000e+00 : f32
    %13 = vector.broadcast %cst : f32 to vector<16x128xf32>
    %14 = arith.maximumf %12, %13 : vector<16x128xf32>
    %c0_10 = arith.constant 0 : index
    %c0_11 = arith.constant 0 : index
    %15 = vector.load %arg3[%c0_10, %c0_11] : memref<128x384xf32, #tpu.memory_space<vmem>>, vector<128x384xf32>
    %cst_12 = arith.constant dense<0.000000e+00> : vector<16x384xf32>
    %16 = tpu.matmul %14, %15, %cst_12 {dimension_numbers = #tpu.dot_dimension_numbers<[1], [0], [0], [1], [0, 0, 1, 1], [], []>} : vector<16x128xf32>, vector<128x384xf32>, vector<16x384xf32> -> vector<16x384xf32>
    %c0_13 = arith.constant 0 : index
    %c0_14 = arith.constant 0 : index
    %17 = vector.load %arg5[%c0_13, %c0_14] : memref<32x128xf32, #tpu.memory_space<vmem>>, vector<32x128xf32>
    %c0_15 = arith.constant 0 : index
    %c0_16 = arith.constant 0 : index
    %c0_17 = arith.constant 0 : index
    %18 = vector.load %arg4[%c0_15, %c0_16, %c0_17] : memref<3x32x16xf32, #tpu.memory_space<vmem>>, vector<1x32x16xf32>
    %19 = vector.shape_cast %18 : vector<1x32x16xf32> to vector<32x16xf32>
    %20 = vector.extract_strided_slice %16 {offsets = [0, 0], sizes = [16, 128], strides = [1, 1]} : vector<16x384xf32> to vector<16x128xf32>
    %cst_18 = arith.constant dense<0.000000e+00> : vector<32x128xf32>
    %21 = tpu.matmul %19, %20, %cst_18 {dimension_numbers = #tpu.dot_dimension_numbers<[1], [0], [0], [1], [0, 0, 1, 1], [], []>} : vector<32x16xf32>, vector<16x128xf32>, vector<32x128xf32> -> vector<32x128xf32>
    %22 = arith.addf %17, %21 : vector<32x128xf32>
    %c1_19 = arith.constant 1 : index
    %c0_20 = arith.constant 0 : index
    %c0_21 = arith.constant 0 : index
    %23 = vector.load %arg4[%c1_19, %c0_20, %c0_21] : memref<3x32x16xf32, #tpu.memory_space<vmem>>, vector<1x32x16xf32>
    %24 = vector.shape_cast %23 : vector<1x32x16xf32> to vector<32x16xf32>
    %25 = vector.extract_strided_slice %16 {offsets = [0, 128], sizes = [16, 128], strides = [1, 1]} : vector<16x384xf32> to vector<16x128xf32>
    %cst_22 = arith.constant dense<0.000000e+00> : vector<32x128xf32>
    %26 = tpu.matmul %24, %25, %cst_22 {dimension_numbers = #tpu.dot_dimension_numbers<[1], [0], [0], [1], [0, 0, 1, 1], [], []>} : vector<32x16xf32>, vector<16x128xf32>, vector<32x128xf32> -> vector<32x128xf32>
    %27 = arith.addf %22, %26 : vector<32x128xf32>
    %c2 = arith.constant 2 : index
    %c0_23 = arith.constant 0 : index
    %c0_24 = arith.constant 0 : index
    %28 = vector.load %arg4[%c2, %c0_23, %c0_24] : memref<3x32x16xf32, #tpu.memory_space<vmem>>, vector<1x32x16xf32>
    %29 = vector.shape_cast %28 : vector<1x32x16xf32> to vector<32x16xf32>
    %30 = vector.extract_strided_slice %16 {offsets = [0, 256], sizes = [16, 128], strides = [1, 1]} : vector<16x384xf32> to vector<16x128xf32>
    %cst_25 = arith.constant dense<0.000000e+00> : vector<32x128xf32>
    %31 = tpu.matmul %29, %30, %cst_25 {dimension_numbers = #tpu.dot_dimension_numbers<[1], [0], [0], [1], [0, 0, 1, 1], [], []>} : vector<32x16xf32>, vector<16x128xf32>, vector<32x128xf32> -> vector<32x128xf32>
    %32 = arith.addf %27, %31 : vector<32x128xf32>
    %cst_26 = arith.constant 0.000000e+00 : f32
    %33 = vector.broadcast %cst_26 : f32 to vector<32x128xf32>
    %34 = arith.maximumf %32, %33 : vector<32x128xf32>
    %c0_27 = arith.constant 0 : index
    %c0_28 = arith.constant 0 : index
    %35 = vector.load %arg6[%c0_27, %c0_28] : memref<128x768xf32, #tpu.memory_space<vmem>>, vector<128x768xf32>
    %cst_29 = arith.constant dense<0.000000e+00> : vector<32x768xf32>
    %36 = tpu.matmul %34, %35, %cst_29 {dimension_numbers = #tpu.dot_dimension_numbers<[1], [0], [0], [1], [0, 0, 1, 1], [], []>} : vector<32x128xf32>, vector<128x768xf32>, vector<32x768xf32> -> vector<32x768xf32>
    %c0_30 = arith.constant 0 : index
    %c0_31 = arith.constant 0 : index
    %37 = vector.load %arg8[%c0_30, %c0_31] : memref<56x256xf32, #tpu.memory_space<vmem>>, vector<56x256xf32>
    %c0_32 = arith.constant 0 : index
    %c0_33 = arith.constant 0 : index
    %c0_34 = arith.constant 0 : index
    %38 = vector.load %arg7[%c0_32, %c0_33, %c0_34] : memref<3x56x32xf32, #tpu.memory_space<vmem>>, vector<1x56x32xf32>
    %39 = vector.shape_cast %38 : vector<1x56x32xf32> to vector<56x32xf32>
    %40 = vector.extract_strided_slice %36 {offsets = [0, 0], sizes = [32, 256], strides = [1, 1]} : vector<32x768xf32> to vector<32x256xf32>
    %cst_35 = arith.constant dense<0.000000e+00> : vector<56x256xf32>
    %41 = tpu.matmul %39, %40, %cst_35 {dimension_numbers = #tpu.dot_dimension_numbers<[1], [0], [0], [1], [0, 0, 1, 1], [], []>} : vector<56x32xf32>, vector<32x256xf32>, vector<56x256xf32> -> vector<56x256xf32>
    %42 = arith.addf %37, %41 : vector<56x256xf32>
    %c1_36 = arith.constant 1 : index
    %c0_37 = arith.constant 0 : index
    %c0_38 = arith.constant 0 : index
    %43 = vector.load %arg7[%c1_36, %c0_37, %c0_38] : memref<3x56x32xf32, #tpu.memory_space<vmem>>, vector<1x56x32xf32>
    %44 = vector.shape_cast %43 : vector<1x56x32xf32> to vector<56x32xf32>
    %45 = vector.extract_strided_slice %36 {offsets = [0, 256], sizes = [32, 256], strides = [1, 1]} : vector<32x768xf32> to vector<32x256xf32>
    %cst_39 = arith.constant dense<0.000000e+00> : vector<56x256xf32>
    %46 = tpu.matmul %44, %45, %cst_39 {dimension_numbers = #tpu.dot_dimension_numbers<[1], [0], [0], [1], [0, 0, 1, 1], [], []>} : vector<56x32xf32>, vector<32x256xf32>, vector<56x256xf32> -> vector<56x256xf32>
    %47 = arith.addf %42, %46 : vector<56x256xf32>
    %c2_40 = arith.constant 2 : index
    %c0_41 = arith.constant 0 : index
    %c0_42 = arith.constant 0 : index
    %48 = vector.load %arg7[%c2_40, %c0_41, %c0_42] : memref<3x56x32xf32, #tpu.memory_space<vmem>>, vector<1x56x32xf32>
    %49 = vector.shape_cast %48 : vector<1x56x32xf32> to vector<56x32xf32>
    %50 = vector.extract_strided_slice %36 {offsets = [0, 512], sizes = [32, 256], strides = [1, 1]} : vector<32x768xf32> to vector<32x256xf32>
    %cst_43 = arith.constant dense<0.000000e+00> : vector<56x256xf32>
    %51 = tpu.matmul %49, %50, %cst_43 {dimension_numbers = #tpu.dot_dimension_numbers<[1], [0], [0], [1], [0, 0, 1, 1], [], []>} : vector<56x32xf32>, vector<32x256xf32>, vector<56x256xf32> -> vector<56x256xf32>
    %52 = arith.addf %47, %51 : vector<56x256xf32>
    %cst_44 = arith.constant 0.000000e+00 : f32
    %53 = vector.broadcast %cst_44 : f32 to vector<56x256xf32>
    %54 = arith.maximumf %52, %53 : vector<56x256xf32>
    %c0_45 = arith.constant 0 : index
    %c0_46 = arith.constant 0 : index
    %55 = vector.load %arg9[%c0_45, %c0_46] : memref<256x384xf32, #tpu.memory_space<vmem>>, vector<256x384xf32>
    %cst_47 = arith.constant dense<0.000000e+00> : vector<56x384xf32>
    %56 = tpu.matmul %54, %55, %cst_47 {dimension_numbers = #tpu.dot_dimension_numbers<[1], [0], [0], [1], [0, 0, 1, 1], [], []>} : vector<56x256xf32>, vector<256x384xf32>, vector<56x384xf32> -> vector<56x384xf32>
    %c0_48 = arith.constant 0 : index
    %c0_49 = arith.constant 0 : index
    %57 = vector.load %arg11[%c0_48, %c0_49] : memref<32x128xf32, #tpu.memory_space<vmem>>, vector<32x128xf32>
    %c0_50 = arith.constant 0 : index
    %c0_51 = arith.constant 0 : index
    %c0_52 = arith.constant 0 : index
    %58 = vector.load %arg10[%c0_50, %c0_51, %c0_52] : memref<3x32x56xf32, #tpu.memory_space<vmem>>, vector<1x32x56xf32>
    %59 = vector.shape_cast %58 : vector<1x32x56xf32> to vector<32x56xf32>
    %60 = vector.extract_strided_slice %56 {offsets = [0, 0], sizes = [56, 128], strides = [1, 1]} : vector<56x384xf32> to vector<56x128xf32>
    %cst_53 = arith.constant dense<0.000000e+00> : vector<32x128xf32>
    %61 = tpu.matmul %59, %60, %cst_53 {dimension_numbers = #tpu.dot_dimension_numbers<[1], [0], [0], [1], [0, 0, 1, 1], [], []>} : vector<32x56xf32>, vector<56x128xf32>, vector<32x128xf32> -> vector<32x128xf32>
    %62 = arith.addf %57, %61 : vector<32x128xf32>
    %c1_54 = arith.constant 1 : index
    %c0_55 = arith.constant 0 : index
    %c0_56 = arith.constant 0 : index
    %63 = vector.load %arg10[%c1_54, %c0_55, %c0_56] : memref<3x32x56xf32, #tpu.memory_space<vmem>>, vector<1x32x56xf32>
    %64 = vector.shape_cast %63 : vector<1x32x56xf32> to vector<32x56xf32>
    %65 = vector.extract_strided_slice %56 {offsets = [0, 128], sizes = [56, 128], strides = [1, 1]} : vector<56x384xf32> to vector<56x128xf32>
    %cst_57 = arith.constant dense<0.000000e+00> : vector<32x128xf32>
    %66 = tpu.matmul %64, %65, %cst_57 {dimension_numbers = #tpu.dot_dimension_numbers<[1], [0], [0], [1], [0, 0, 1, 1], [], []>} : vector<32x56xf32>, vector<56x128xf32>, vector<32x128xf32> -> vector<32x128xf32>
    %67 = arith.addf %62, %66 : vector<32x128xf32>
    %c2_58 = arith.constant 2 : index
    %c0_59 = arith.constant 0 : index
    %c0_60 = arith.constant 0 : index
    %68 = vector.load %arg10[%c2_58, %c0_59, %c0_60] : memref<3x32x56xf32, #tpu.memory_space<vmem>>, vector<1x32x56xf32>
    %69 = vector.shape_cast %68 : vector<1x32x56xf32> to vector<32x56xf32>
    %70 = vector.extract_strided_slice %56 {offsets = [0, 256], sizes = [56, 128], strides = [1, 1]} : vector<56x384xf32> to vector<56x128xf32>
    %cst_61 = arith.constant dense<0.000000e+00> : vector<32x128xf32>
    %71 = tpu.matmul %69, %70, %cst_61 {dimension_numbers = #tpu.dot_dimension_numbers<[1], [0], [0], [1], [0, 0, 1, 1], [], []>} : vector<32x56xf32>, vector<56x128xf32>, vector<32x128xf32> -> vector<32x128xf32>
    %72 = arith.addf %67, %71 : vector<32x128xf32>
    %cst_62 = arith.constant 0.000000e+00 : f32
    %73 = vector.broadcast %cst_62 : f32 to vector<32x128xf32>
    %74 = arith.maximumf %72, %73 : vector<32x128xf32>
    %c0_63 = arith.constant 0 : index
    %c0_64 = arith.constant 0 : index
    %c0_65 = arith.constant 0 : index
    %75 = vector.load %arg12[%c0_63, %c0_64, %c0_65] : memref<2x32x128xf32, #tpu.memory_space<vmem>>, vector<1x32x128xf32>
    %76 = vector.shape_cast %75 : vector<1x32x128xf32> to vector<32x128xf32>
    %77 = vector.shape_cast %74 : vector<32x128xf32> to vector<1x32x128xf32>
    tpu.vector_store %arg12[%c0_63, %c0_64, %c0_65], %77 {strides = array<i32>} : memref<2x32x128xf32, #tpu.memory_space<vmem>>, vector<1x32x128xf32>,
    %c1_66 = arith.constant 1 : index
    %c0_67 = arith.constant 0 : index
    %78 = memref.load %arg0[%c1_66, %c0_67] : memref<2x2xf32, #tpu.memory_space<smem>>
    %79 = vector.broadcast %78 : f32 to vector<16x128xf32>
    %80 = arith.mulf %79, %2 : vector<16x128xf32>
    %81 = arith.addf %0, %80 : vector<16x128xf32>
    %c1_68 = arith.constant 1 : index
    %c1_69 = arith.constant 1 : index
    %82 = memref.load %arg0[%c1_68, %c1_69] : memref<2x2xf32, #tpu.memory_space<smem>>
    %83 = vector.broadcast %82 : f32 to vector<16x128xf32>
    %84 = arith.mulf %83, %4 : vector<16x128xf32>
    %85 = arith.addf %81, %84 : vector<16x128xf32>
    %cst_70 = arith.constant 0.000000e+00 : f32
    %86 = vector.broadcast %cst_70 : f32 to vector<16x128xf32>
    %87 = arith.maximumf %85, %86 : vector<16x128xf32>
    %c0_71 = arith.constant 0 : index
    %c0_72 = arith.constant 0 : index
    %88 = vector.load %arg3[%c0_71, %c0_72] : memref<128x384xf32, #tpu.memory_space<vmem>>, vector<128x384xf32>
    %cst_73 = arith.constant dense<0.000000e+00> : vector<16x384xf32>
    %89 = tpu.matmul %87, %88, %cst_73 {dimension_numbers = #tpu.dot_dimension_numbers<[1], [0], [0], [1], [0, 0, 1, 1], [], []>} : vector<16x128xf32>, vector<128x384xf32>, vector<16x384xf32> -> vector<16x384xf32>
    %c0_74 = arith.constant 0 : index
    %c0_75 = arith.constant 0 : index
    %90 = vector.load %arg5[%c0_74, %c0_75] : memref<32x128xf32, #tpu.memory_space<vmem>>, vector<32x128xf32>
    %c0_76 = arith.constant 0 : index
    %c0_77 = arith.constant 0 : index
    %c0_78 = arith.constant 0 : index
    %91 = vector.load %arg4[%c0_76, %c0_77, %c0_78] : memref<3x32x16xf32, #tpu.memory_space<vmem>>, vector<1x32x16xf32>
    %92 = vector.shape_cast %91 : vector<1x32x16xf32> to vector<32x16xf32>
    %93 = vector.extract_strided_slice %89 {offsets = [0, 0], sizes = [16, 128], strides = [1, 1]} : vector<16x384xf32> to vector<16x128xf32>
    %cst_79 = arith.constant dense<0.000000e+00> : vector<32x128xf32>
    %94 = tpu.matmul %92, %93, %cst_79 {dimension_numbers = #tpu.dot_dimension_numbers<[1], [0], [0], [1], [0, 0, 1, 1], [], []>} : vector<32x16xf32>, vector<16x128xf32>, vector<32x128xf32> -> vector<32x128xf32>
    %95 = arith.addf %90, %94 : vector<32x128xf32>
    %c1_80 = arith.constant 1 : index
    %c0_81 = arith.constant 0 : index
    %c0_82 = arith.constant 0 : index
    %96 = vector.load %arg4[%c1_80, %c0_81, %c0_82] : memref<3x32x16xf32, #tpu.memory_space<vmem>>, vector<1x32x16xf32>
    %97 = vector.shape_cast %96 : vector<1x32x16xf32> to vector<32x16xf32>
    %98 = vector.extract_strided_slice %89 {offsets = [0, 128], sizes = [16, 128], strides = [1, 1]} : vector<16x384xf32> to vector<16x128xf32>
    %cst_83 = arith.constant dense<0.000000e+00> : vector<32x128xf32>
    %99 = tpu.matmul %97, %98, %cst_83 {dimension_numbers = #tpu.dot_dimension_numbers<[1], [0], [0], [1], [0, 0, 1, 1], [], []>} : vector<32x16xf32>, vector<16x128xf32>, vector<32x128xf32> -> vector<32x128xf32>
    %100 = arith.addf %95, %99 : vector<32x128xf32>
    %c2_84 = arith.constant 2 : index
    %c0_85 = arith.constant 0 : index
    %c0_86 = arith.constant 0 : index
    %101 = vector.load %arg4[%c2_84, %c0_85, %c0_86] : memref<3x32x16xf32, #tpu.memory_space<vmem>>, vector<1x32x16xf32>
    %102 = vector.shape_cast %101 : vector<1x32x16xf32> to vector<32x16xf32>
    %103 = vector.extract_strided_slice %89 {offsets = [0, 256], sizes = [16, 128], strides = [1, 1]} : vector<16x384xf32> to vector<16x128xf32>
    %cst_87 = arith.constant dense<0.000000e+00> : vector<32x128xf32>
    %104 = tpu.matmul %102, %103, %cst_87 {dimension_numbers = #tpu.dot_dimension_numbers<[1], [0], [0], [1], [0, 0, 1, 1], [], []>} : vector<32x16xf32>, vector<16x128xf32>, vector<32x128xf32> -> vector<32x128xf32>
    %105 = arith.addf %100, %104 : vector<32x128xf32>
    %cst_88 = arith.constant 0.000000e+00 : f32
    %106 = vector.broadcast %cst_88 : f32 to vector<32x128xf32>
    %107 = arith.maximumf %105, %106 : vector<32x128xf32>
    %c0_89 = arith.constant 0 : index
    %c0_90 = arith.constant 0 : index
    %108 = vector.load %arg6[%c0_89, %c0_90] : memref<128x768xf32, #tpu.memory_space<vmem>>, vector<128x768xf32>
    %cst_91 = arith.constant dense<0.000000e+00> : vector<32x768xf32>
    %109 = tpu.matmul %107, %108, %cst_91 {dimension_numbers = #tpu.dot_dimension_numbers<[1], [0], [0], [1], [0, 0, 1, 1], [], []>} : vector<32x128xf32>, vector<128x768xf32>, vector<32x768xf32> -> vector<32x768xf32>
    %c0_92 = arith.constant 0 : index
    %c0_93 = arith.constant 0 : index
    %110 = vector.load %arg8[%c0_92, %c0_93] : memref<56x256xf32, #tpu.memory_space<vmem>>, vector<56x256xf32>
    %c0_94 = arith.constant 0 : index
    %c0_95 = arith.constant 0 : index
    %c0_96 = arith.constant 0 : index
    %111 = vector.load %arg7[%c0_94, %c0_95, %c0_96] : memref<3x56x32xf32, #tpu.memory_space<vmem>>, vector<1x56x32xf32>
    %112 = vector.shape_cast %111 : vector<1x56x32xf32> to vector<56x32xf32>
    %113 = vector.extract_strided_slice %109 {offsets = [0, 0], sizes = [32, 256], strides = [1, 1]} : vector<32x768xf32> to vector<32x256xf32>
    %cst_97 = arith.constant dense<0.000000e+00> : vector<56x256xf32>
    %114 = tpu.matmul %112, %113, %cst_97 {dimension_numbers = #tpu.dot_dimension_numbers<[1], [0], [0], [1], [0, 0, 1, 1], [], []>} : vector<56x32xf32>, vector<32x256xf32>, vector<56x256xf32> -> vector<56x256xf32>
    %115 = arith.addf %110, %114 : vector<56x256xf32>
    %c1_98 = arith.constant 1 : index
    %c0_99 = arith.constant 0 : index
    %c0_100 = arith.constant 0 : index
    %116 = vector.load %arg7[%c1_98, %c0_99, %c0_100] : memref<3x56x32xf32, #tpu.memory_space<vmem>>, vector<1x56x32xf32>
    %117 = vector.shape_cast %116 : vector<1x56x32xf32> to vector<56x32xf32>
    %118 = vector.extract_strided_slice %109 {offsets = [0, 256], sizes = [32, 256], strides = [1, 1]} : vector<32x768xf32> to vector<32x256xf32>
    %cst_101 = arith.constant dense<0.000000e+00> : vector<56x256xf32>
    %119 = tpu.matmul %117, %118, %cst_101 {dimension_numbers = #tpu.dot_dimension_numbers<[1], [0], [0], [1], [0, 0, 1, 1], [], []>} : vector<56x32xf32>, vector<32x256xf32>, vector<56x256xf32> -> vector<56x256xf32>
    %120 = arith.addf %115, %119 : vector<56x256xf32>
    %c2_102 = arith.constant 2 : index
    %c0_103 = arith.constant 0 : index
    %c0_104 = arith.constant 0 : index
    %121 = vector.load %arg7[%c2_102, %c0_103, %c0_104] : memref<3x56x32xf32, #tpu.memory_space<vmem>>, vector<1x56x32xf32>
    %122 = vector.shape_cast %121 : vector<1x56x32xf32> to vector<56x32xf32>
    %123 = vector.extract_strided_slice %109 {offsets = [0, 512], sizes = [32, 256], strides = [1, 1]} : vector<32x768xf32> to vector<32x256xf32>
    %cst_105 = arith.constant dense<0.000000e+00> : vector<56x256xf32>
    %124 = tpu.matmul %122, %123, %cst_105 {dimension_numbers = #tpu.dot_dimension_numbers<[1], [0], [0], [1], [0, 0, 1, 1], [], []>} : vector<56x32xf32>, vector<32x256xf32>, vector<56x256xf32> -> vector<56x256xf32>
    %125 = arith.addf %120, %124 : vector<56x256xf32>
    %cst_106 = arith.constant 0.000000e+00 : f32
    %126 = vector.broadcast %cst_106 : f32 to vector<56x256xf32>
    %127 = arith.maximumf %125, %126 : vector<56x256xf32>
    %c0_107 = arith.constant 0 : index
    %c0_108 = arith.constant 0 : index
    %128 = vector.load %arg9[%c0_107, %c0_108] : memref<256x384xf32, #tpu.memory_space<vmem>>, vector<256x384xf32>
    %cst_109 = arith.constant dense<0.000000e+00> : vector<56x384xf32>
    %129 = tpu.matmul %127, %128, %cst_109 {dimension_numbers = #tpu.dot_dimension_numbers<[1], [0], [0], [1], [0, 0, 1, 1], [], []>} : vector<56x256xf32>, vector<256x384xf32>, vector<56x384xf32> -> vector<56x384xf32>
    %c0_110 = arith.constant 0 : index
    %c0_111 = arith.constant 0 : index
    %130 = vector.load %arg11[%c0_110, %c0_111] : memref<32x128xf32, #tpu.memory_space<vmem>>, vector<32x128xf32>
    %c0_112 = arith.constant 0 : index
    %c0_113 = arith.constant 0 : index
    %c0_114 = arith.constant 0 : index
    %131 = vector.load %arg10[%c0_112, %c0_113, %c0_114] : memref<3x32x56xf32, #tpu.memory_space<vmem>>, vector<1x32x56xf32>
    %132 = vector.shape_cast %131 : vector<1x32x56xf32> to vector<32x56xf32>
    %133 = vector.extract_strided_slice %129 {offsets = [0, 0], sizes = [56, 128], strides = [1, 1]} : vector<56x384xf32> to vector<56x128xf32>
    %cst_115 = arith.constant dense<0.000000e+00> : vector<32x128xf32>
    %134 = tpu.matmul %132, %133, %cst_115 {dimension_numbers = #tpu.dot_dimension_numbers<[1], [0], [0], [1], [0, 0, 1, 1], [], []>} : vector<32x56xf32>, vector<56x128xf32>, vector<32x128xf32> -> vector<32x128xf32>
    %135 = arith.addf %130, %134 : vector<32x128xf32>
    %c1_116 = arith.constant 1 : index
    %c0_117 = arith.constant 0 : index
    %c0_118 = arith.constant 0 : index
    %136 = vector.load %arg10[%c1_116, %c0_117, %c0_118] : memref<3x32x56xf32, #tpu.memory_space<vmem>>, vector<1x32x56xf32>
    %137 = vector.shape_cast %136 : vector<1x32x56xf32> to vector<32x56xf32>
    %138 = vector.extract_strided_slice %129 {offsets = [0, 128], sizes = [56, 128], strides = [1, 1]} : vector<56x384xf32> to vector<56x128xf32>
    %cst_119 = arith.constant dense<0.000000e+00> : vector<32x128xf32>
    %139 = tpu.matmul %137, %138, %cst_119 {dimension_numbers = #tpu.dot_dimension_numbers<[1], [0], [0], [1], [0, 0, 1, 1], [], []>} : vector<32x56xf32>, vector<56x128xf32>, vector<32x128xf32> -> vector<32x128xf32>
    %140 = arith.addf %135, %139 : vector<32x128xf32>
    %c2_120 = arith.constant 2 : index
    %c0_121 = arith.constant 0 : index
    %c0_122 = arith.constant 0 : index
    %141 = vector.load %arg10[%c2_120, %c0_121, %c0_122] : memref<3x32x56xf32, #tpu.memory_space<vmem>>, vector<1x32x56xf32>
    %142 = vector.shape_cast %141 : vector<1x32x56xf32> to vector<32x56xf32>
    %143 = vector.extract_strided_slice %129 {offsets = [0, 256], sizes = [56, 128], strides = [1, 1]} : vector<56x384xf32> to vector<56x128xf32>
    %cst_123 = arith.constant dense<0.000000e+00> : vector<32x128xf32>
    %144 = tpu.matmul %142, %143, %cst_123 {dimension_numbers = #tpu.dot_dimension_numbers<[1], [0], [0], [1], [0, 0, 1, 1], [], []>} : vector<32x56xf32>, vector<56x128xf32>, vector<32x128xf32> -> vector<32x128xf32>
    %145 = arith.addf %140, %144 : vector<32x128xf32>
    %cst_124 = arith.constant 0.000000e+00 : f32
    %146 = vector.broadcast %cst_124 : f32 to vector<32x128xf32>
    %147 = arith.maximumf %145, %146 : vector<32x128xf32>
    %c1_125 = arith.constant 1 : index
    %c0_126 = arith.constant 0 : index
    %c0_127 = arith.constant 0 : index
    %148 = vector.load %arg12[%c1_125, %c0_126, %c0_127] : memref<2x32x128xf32, #tpu.memory_space<vmem>>, vector<1x32x128xf32>
    %149 = vector.shape_cast %148 : vector<1x32x128xf32> to vector<32x128xf32>
    %150 = vector.shape_cast %147 : vector<32x128xf32> to vector<1x32x128xf32>
    tpu.vector_store %arg12[%c1_125, %c0_126, %c0_127], %150 {strides = array<i32>} : memref<2x32x128xf32, #tpu.memory_space<vmem>>, vector<1x32x128xf32>,
    return
  }
}

</mosaic_0001>

<bundles_post_ra>
// kernel: decoder_forward.1
= control target key start
LH: loop header
LB: loop body
LE: loop exit
PB: predicated region body
PF: predicated region fallthrough
CT: control target
= control target key end

     0   :  { %17 = vsyncpa [#allocation4], 0  ;;  %s6696_s0 = inlined_call_operand.vmem [shape: f32[2,2], index: 0, kind: input, shape index: {}]   ;;  %s6697_s1 = inlined_call_operand.vmem [shape: f32[2,16,128], index: 1, kind: input, shape index: {}]   ;;  %s6698_s2 = inlined_call_operand.vmem [shape: f32[16,128], index: 2, kind: input, shape index: {}]   ;;  %s6699_s3 = inlined_call_operand.vmem [shape: f32[128,384], index: 3, kind: input, shape index: {}]   ;;  %s6700_s4 = inlined_call_operand.vmem [shape: f32[3,32,16], index: 4, kind: input, shape index: {}]   ;;  %s6701_s5 = inlined_call_operand.hbm [shape: f32[32,128], index: 5, kind: input, shape index: {}]   ;;  %s6702_s6 = inlined_call_operand.hbm [shape: f32[128,768], index: 6, kind: input, shape index: {}]   ;;  %s6703_s7 = inlined_call_operand.vmem [shape: f32[3,56,32], index: 7, kind: input, shape index: {}]   ;;  %s6704_s8 = inlined_call_operand.hbm [shape: f32[56,256], index: 8, kind: input, shape index: {}]   ;;  %s6705_s9 = inlined_call_operand.hbm [shape: f32[256,384], index: 9, kind: input, shape index: {}]   ;;  %s6706_s10 = inlined_call_operand.hbm [shape: f32[3,32,56], index: 10, kind: input, shape index: {}]   ;;  %s6707_s11 = inlined_call_operand.hbm [shape: f32[32,128], index: 11, kind: input, shape index: {}]   ;;  %s6708_s12 = inlined_call_operand.vmem [shape: f32[2,32,128], index: 12, kind: output, shape index: {}]  }
   0x1   :  { %18 = vsyncpa [#allocation3], 0 }
   0x2   :  { %19 = vsyncpa [#allocation7], 0 }
   0x3   :  { %20 = vsyncpa [#allocation10], 0 }
   0x4   :  { %21 = vsyncpa [#allocation13], 0  ;;  %s5770_s21 = smov [#allocation6]   ;;  %s5616_s25 = scalar_lea.hbm %s6702_s6, 12288 }
   0x5   :  { %s57_s22 = sshll.u32 %s5770_s21, 4  ;;  %p5617_p0 = scmp.ne.s32.totalorder %s6702_s6, %s5616_s25  ;;  %s58_s22 = int_to_ptr.vmem [resolvable:$true] %s57_s22 }
   0x6   :  { %p5620_p1 = scmp.lt.u32.totalorder %s5616_s25, %s6702_s6 }
   0x8   :  { %p5622_p2 = pnand %p5620_p1, %p5617_p0 }
   0xa   :  { %5625 = shalt.err (!%p5622_p2)
}
   0xb   :  { %s5626_s30 = scalar_lea.vmem %s58_s22, 12288  ;;  %p5631_p4 = scmp.lt.s32.totalorder %s58_s22, %s58_s22 }
   0xc   :  { %p5627_p3 = scmp.ne.s32.totalorder %s58_s22, %s5626_s30  ;;  %p5632_p5 = scmp.lt.s32.totalorder %s5626_s30, %s5626_s30 }
   0xe   :  { %p5633_p6 = por %p5632_p5, %p5631_p4 }
  0x10   :  { %p5634_p7 = pnand %p5633_p6, %p5627_p3 }
  0x12   :  { %5637 = shalt.err (!%p5634_p7)
}
  0x13   :  { %s5771_s13 = smov 768   ;;  %s5772_s14 = smov 48  }
  0x14   :  { %63 = dma.hbm_to_vmem [thread:$0]  %s6702_s6, 12288, %s58_s22, [#allocation7], %s5771_s13, %s5771_s13, %s5772_s14  }
  0x15   :  { %s5773_s17 = smov [#allocation9]   ;;  %s5638_s21 = scalar_lea.hbm %s6705_s9, 12288 }
  0x16   :  { %s83_s18 = sshll.u32 %s5773_s17, 4  ;;  %p5639_p8 = scmp.ne.s32.totalorder %s6705_s9, %s5638_s21  ;;  %s84_s18 = int_to_ptr.vmem [resolvable:$true] %s83_s18 }
  0x17   :  { %p5642_p9 = scmp.lt.u32.totalorder %s5638_s21, %s6705_s9 }
  0x19   :  { %p5644_p10 = pnand %p5642_p9, %p5639_p8 }
  0x1b   :  { %5647 = shalt.err (!%p5644_p10)
}
  0x1c   :  { %s5648_s27 = scalar_lea.vmem %s84_s18, 12288  ;;  %p5653_p12 = scmp.lt.s32.totalorder %s84_s18, %s84_s18 }
  0x1d   :  { %p5649_p11 = scmp.ne.s32.totalorder %s84_s18, %s5648_s27  ;;  %p5654_p13 = scmp.lt.s32.totalorder %s5648_s27, %s5648_s27 }
  0x1f   :  { %p5655_p0 = por %p5654_p13, %p5653_p12 }
  0x21   :  { %p5656_p1 = pnand %p5655_p0, %p5649_p11 }
  0x23   :  { %5659 = shalt.err (!%p5656_p1)
}
  0x24   :  { %s5774_s6 = smov 384   ;;  %s5775_s22 = smov 24  }
  0x25   :  { %89 = dma.hbm_to_vmem [thread:$0]  %s6705_s9, 12288, %s84_s18, [#allocation10], %s5774_s6, %s5774_s6, %s5775_s22  }
  0x26   :  { %s28_s14 = sshll.u32 %s6696_s0, 4  ;;  %s29_s14 = int_to_ptr.vmem [resolvable:$true] %s28_s14 }
  0x27   :  { %s5660_s15 = scalar_lea.vmem %s29_s14, 32  ;;  %p5665_p3 = scmp.lt.s32.totalorder %s29_s14, %s29_s14 }
  0x28   :  { %p5661_p2 = scmp.ne.s32.totalorder %s29_s14, %s5660_s15  ;;  %p5666_p4 = scmp.lt.s32.totalorder %s5660_s15, %s5660_s15 }
  0x2a   :  { %p5667_p5 = por %p5666_p4, %p5665_p3 }
  0x2c   :  { %p5668_p6 = pnand %p5667_p5, %p5661_p2 }
  0x2e   :  { %5671 = shalt.err (!%p5668_p6)
}
  0x2f   :  { %s5776_s16 = smov [#allocation2]   ;;  %s5777_s17 = smov [#allocation5]  }
  0x30   :  { %31 = dma.vmem_to_smem %s29_s14, 32, %s5776_s16, [#allocation4]  }
  0x31   :  { %s45_s19 = sshll.u32 %s5777_s17, 4  ;;  %s5672_s9 = scalar_lea.hbm %s6701_s5, 512  ;;  %s46_s19 = int_to_ptr.vmem [resolvable:$true] %s45_s19 }
  0x32   :  { %p5673_p7 = scmp.ne.s32.totalorder %s6701_s5, %s5672_s9  ;;  %p5676_p8 = scmp.lt.u32.totalorder %s5672_s9, %s6701_s5 }
  0x34   :  { %p5678_p9 = pnand %p5676_p8, %p5673_p7 }
  0x36   :  { %5681 = shalt.err (!%p5678_p9)
}
  0x37   :  { %s5682_s25 = scalar_lea.vmem %s46_s19, 512  ;;  %p5687_p11 = scmp.lt.s32.totalorder %s46_s19, %s46_s19 }
  0x38   :  { %p5683_p10 = scmp.ne.s32.totalorder %s46_s19, %s5682_s25  ;;  %p5688_p12 = scmp.lt.s32.totalorder %s5682_s25, %s5682_s25 }
  0x3a   :  { %p5689_p13 = por %p5688_p12, %p5687_p11 }
  0x3c   :  { %p5690_p0 = pnand %p5689_p13, %p5683_p10 }
  0x3e   :  { %5693 = shalt.err (!%p5690_p0)
}
  0x3f   :  { %s5778_s26 = smov 128   ;;  %s5779_s27 = smov 8  }
  0x40   :  { %51 = dma.hbm_to_vmem [thread:$0]  %s6701_s5, 512, %s46_s19, [#allocation3], %s5778_s26, %s5778_s26, %s5779_s27  }
  0x41   :  { %s5780_s28 = smov [#allocation8]   ;;  %s5694_s14 = scalar_lea.hbm %s6704_s8, 1792 }
  0x42   :  { %s71_s29 = sshll.u32 %s5780_s28, 4  ;;  %p5695_p1 = scmp.ne.s32.totalorder %s6704_s8, %s5694_s14  ;;  %s72_s29 = int_to_ptr.vmem [resolvable:$true] %s71_s29 }
  0x43   :  { %p5698_p2 = scmp.lt.u32.totalorder %s5694_s14, %s6704_s8 }
  0x45   :  { %p5700_p3 = pnand %p5698_p2, %p5695_p1 }
  0x47   :  { %5703 = shalt.err (!%p5700_p3)
}
  0x48   :  { %s5704_s21 = scalar_lea.vmem %s72_s29, 1792  ;;  %p5709_p5 = scmp.lt.s32.totalorder %s72_s29, %s72_s29 }
  0x49   :  { %p5705_p4 = scmp.ne.s32.totalorder %s72_s29, %s5704_s21  ;;  %p5710_p6 = scmp.lt.s32.totalorder %s5704_s21, %s5704_s21 }
  0x4b   :  { %p5711_p7 = por %p5710_p6, %p5709_p5 }
  0x4d   :  { %p5712_p8 = pnand %p5711_p7, %p5705_p4 }
  0x4f   :  { %5715 = shalt.err (!%p5712_p8)
}
  0x50   :  { %s5781_s5 = smov 256   ;;  %s5782_s19 = smov 16  }
  0x51   :  { %77 = dma.hbm_to_vmem [thread:$0]  %s6704_s8, 1792, %s72_s29, [#allocation7], %s5781_s5, %s5781_s5, %s5782_s19  }
  0x52   :  { %s5783_s23 = smov [#allocation11]   ;;  %s5784_s24 = smov [#allocation12]  }
  0x53   :  { %s95_s0 = sshll.u32 %s5783_s23, 4  ;;  %s107_s25 = sshll.u32 %s5784_s24, 4  ;;  %s96_s0 = int_to_ptr.vmem [resolvable:$true] %s95_s0  ;;  %s108_s25 = int_to_ptr.vmem [resolvable:$true] %s107_s25 }
  0x54   :  { %s5716_s28 = scalar_lea.hbm %s6706_s10, 1536 }
  0x55   :  { %p5717_p9 = scmp.ne.s32.totalorder %s6706_s10, %s5716_s28  ;;  %p5720_p10 = scmp.lt.u32.totalorder %s5716_s28, %s6706_s10 }
  0x57   :  { %p5722_p11 = pnand %p5720_p10, %p5717_p9 }
  0x59   :  { %5725 = shalt.err (!%p5722_p11)
}
  0x5a   :  { %s5726_s8 = scalar_lea.vmem %s96_s0, 1536  ;;  %p5731_p13 = scmp.lt.s32.totalorder %s96_s0, %s96_s0 }
  0x5b   :  { %p5727_p12 = scmp.ne.s32.totalorder %s96_s0, %s5726_s8  ;;  %p5732_p0 = scmp.lt.s32.totalorder %s5726_s8, %s5726_s8 }
  0x5d   :  { %p5733_p1 = por %p5732_p0, %p5731_p13 }
  0x5f   :  { %p5734_p2 = pnand %p5733_p1, %p5727_p12 }
  0x61   :  { %5737 = shalt.err (!%p5734_p2)
}
  0x62   :  { %101 = dma.hbm_to_vmem [thread:$0]  %s6706_s10, 1536, %s96_s0, [#allocation10], %s5778_s26, %s5778_s26, %s5779_s27  }
  0x63   :  { %s5738_s21 = scalar_lea.hbm %s6707_s11, 512 }
  0x64   :  { %p5739_p3 = scmp.ne.s32.totalorder %s6707_s11, %s5738_s21  ;;  %p5742_p4 = scmp.lt.u32.totalorder %s5738_s21, %s6707_s11 }
  0x66   :  { %p5744_p5 = pnand %p5742_p4, %p5739_p3 }
  0x68   :  { %5747 = shalt.err (!%p5744_p5)
}
  0x69   :  { %s5748_s23 = scalar_lea.vmem %s108_s25, 512  ;;  %p5753_p7 = scmp.lt.s32.totalorder %s108_s25, %s108_s25 }
  0x6a   :  { %p5749_p6 = scmp.ne.s32.totalorder %s108_s25, %s5748_s23  ;;  %p5754_p8 = scmp.lt.s32.totalorder %s5748_s23, %s5748_s23 }
  0x6c   :  { %p5755_p9 = por %p5754_p8, %p5753_p7 }
  0x6e   :  { %p5756_p10 = pnand %p5755_p9, %p5749_p6 }
  0x70   :  { %5759 = shalt.err (!%p5756_p10)
}
  0x71   :  { %113 = dma.hbm_to_vmem [thread:$0]  %s6707_s11, 512, %s108_s25, [#allocation13], %s5778_s26, %s5778_s26, %s5779_s27  }
  0x72   :  { %5760 = dma.done.wait [#allocation4], 32  }
  0x73   :  { %5761 = vsyncadd [#allocation4], 4294967264 }
  0x74   :  { %5762 = dma.done.wait [#allocation3], 512  }
  0x75   :  { %5763 = vsyncadd [#allocation3], 4294966784 }
  0x76   :  { %5764 = dma.done.wait [#allocation7], 14080  }
  0x77   :  { %5765 = vsyncadd [#allocation7], 4294953216 }
  0x78   :  { %5766 = dma.done.wait [#allocation10], 13824  }
  0x79   :  { %5767 = vsyncadd [#allocation10], 4294953472 }
  0x7a   :  { %5768 = dma.done.wait [#allocation13], 512  }
  0x7b   :  { %5769 = vsyncadd [#allocation13], 4294966784 }
  0x7c   :  { %135 = sfence }
  0x7d   :  { %v158_v0 = vld [vmem:[%s6699_s3 + $0x8] sm:$0xff]  ;;  %v161_v1 = vld [vmem:[%s6699_s3 + $0x20] sm:$0xff]  ;;  %v160_v4 = vld [vmem:[%s6699_s3 + $0x18] sm:$0xff]  ;;  %v5785_v7 = vmov 0.0   ;;  %s5966_s9 = sld [smem:[#allocation2]]  ;;  %s5970_s23 = sld [smem:[#allocation2 + $0x1]] }
  0x7e   :  { %v157_v2 = vld [vmem:[%s6699_s3] sm:$0xff]  ;;  %v4809_v3 = vpack.c.bf16 %v161_v1, %v158_v0  ;;  %v164_v5 = vld [vmem:[%s6699_s3 + $0x38] sm:$0xff]  ;;  %v167_v6 = vld [vmem:[%s6699_s3 + $0x50] sm:$0xff]  ;;  %269 = vmatprep.mubr.f32.mxu0 %v5785_v7  ;;  %s5968_s18 = sld [smem:[#allocation2 + $0x80]]  ;;  %s5972_s10 = sld [smem:[#allocation2 + $0x81]]  ;;  %vm365_vm0 = vcmask 130048  }
  0x7f   :  { %v4811_v8 = vpack.c.bf16 %v160_v4, %v157_v2  ;;  %v4813_v9 = vpack.c.bf16 %v167_v6, %v164_v5  ;;  %v163_v10 = vld [vmem:[%s6699_s3 + $0x30] sm:$0xff]  ;;  %v166_v11 = vld [vmem:[%s6699_s3 + $0x48] sm:$0xff]  ;;  %v173_v13 = vld [vmem:[%s6699_s3 + $0x80] sm:$0xff]  ;;  %vm1067_vm1 = vcmask 261120   ;;  %vm1835_vm2 = vcmask 457728  }
  0x80   :  { %v170_v12 = vld [vmem:[%s6699_s3 + $0x68] sm:$0xff]  ;;  %4810 = vmatprep.subr.bf16.mxu0 %v4809_v3  ;;  %v4815_v14 = vpack.c.bf16 %v166_v11, %v163_v10  ;;  %v169_v16 = vld [vmem:[%s6699_s3 + $0x60] sm:$0xff]  ;;  %v172_v17 = vld [vmem:[%s6699_s3 + $0x78] sm:$0xff] }
  0x81   :  { %4812 = vmatpush1.bf16.msra.mxu0 %v4811_v8  ;;  %v4817_v15 = vpack.c.bf16 %v173_v13, %v170_v12  ;;  %v176_v18 = vld [vmem:[%s6699_s3 + $0x98] sm:$0xff]  ;;  %v179_v19 = vld [vmem:[%s6699_s3 + $0xb0] sm:$0xff]  ;;  %v162_v21 = vld [vmem:[%s6699_s3 + $0x28] sm:$0xff]  ;;  %v4819_v22 = vpack.c.bf16 %v172_v17, %v169_v16 }
  0x82   :  { %4814 = vmatprep.subr.bf16.mxu0 %v4813_v9  ;;  %v159_v20 = vld [vmem:[%s6699_s3 + $0x10] sm:$0xff]  ;;  %v165_v24 = vld [vmem:[%s6699_s3 + $0x40] sm:$0xff]  ;;  %v4821_v25 = vpack.c.bf16 %v179_v19, %v176_v18  ;;  %v178_v27 = vld [vmem:[%s6699_s3 + $0xa8] sm:$0xff] }
  0x83   :  { %v4841_v23 = vpack.c.bf16 %v162_v21, %v159_v20  ;;  %v175_v26 = vld [vmem:[%s6699_s3 + $0x90] sm:$0xff]  ;;  %v168_v28 = vld [vmem:[%s6699_s3 + $0x58] sm:$0xff]  ;;  %v182_v29 = vld [vmem:[%s6699_s3 + $0xc8] sm:$0xff]  ;;  %v144_v35 = vstv %s5966_s9 }
  0x84   :  { %v185_v30 = vld [vmem:[%s6699_s3 + $0xe0] sm:$0xff]  ;;  %v4845_v31 = vpack.c.bf16 %v168_v28, %v165_v24  ;;  %v171_v32 = vld [vmem:[%s6699_s3 + $0x70] sm:$0xff]  ;;  %v174_v34 = vld [vmem:[%s6699_s3 + $0x88] sm:$0xff]  ;;  %v2158_v36 = vstv %s5968_s18  ;;  %v4823_v37 = vpack.c.bf16 %v178_v27, %v175_v26 }
  0x85   :  { %4816 = vmatpush1.bf16.msra.mxu0 %v4815_v14  ;;  %4842 = vmatprep.subr.bf16.mxu1 %v4841_v23  ;;  %v181_v33 = vld [vmem:[%s6699_s3 + $0xc0] sm:$0xff]  ;;  %v184_v38 = vld [vmem:[%s6699_s3 + $0xd8] sm:$0xff]  ;;  %v4849_v39 = vpack.c.bf16 %v174_v34, %v171_v32  ;;  %v150_v41 = vstv %s5970_s23  ;;  %v2164_v42 = vstv %s5972_s10  ;;  %v4825_v43 = vpack.c.bf16 %v185_v30, %v182_v29 }
  0x86   :  { %4818 = vmatprep.subr.bf16.mxu0 %v4817_v15  ;;  %4844 = vmatpush3.bf16.msra.mxu1 %v4841_v23  ;;  %v177_v40 = vld [vmem:[%s6699_s3 + $0xa0] sm:$0xff]  ;;  %v180_v44 = vld [vmem:[%s6699_s3 + $0xb8] sm:$0xff]  ;;  %v191_v48 = vld [vmem:[%s6699_s3 + $0x110] sm:$0xff]  ;;  %v4827_v52 = vpack.c.bf16 %v184_v38, %v181_v33 }
  0x87   :  { %4846 = vmatprep.subr.bf16.mxu1 %v4845_v31  ;;  %v136_v45 = vld [vmem:[%s6698_s2] sm:$0xff]  ;;  %v188_v47 = vld [vmem:[%s6699_s3 + $0xf8] sm:$0xff]  ;;  %v4172_v49 = vld [vmem:[%s6697_s1 + $0x10] sm:$0xff]  ;;  %v4853_v56 = vpack.c.bf16 %v180_v44, %v177_v40 }
  0x88   :  { %v138_v46 = vld [vmem:[%s6697_s1] sm:$0xff]  ;;  %v151_v53 = vmul.f32 %v4172_v49, %v150_v41  ;;  %v2165_v54 = vmul.f32 %v4172_v49, %v2164_v42  ;;  %v187_v55 = vld [vmem:[%s6699_s3 + $0xf0] sm:$0xff]  ;;  %v4829_v59 = vpack.c.bf16 %v191_v48, %v188_v47  ;;  %v190_v60 = vld [vmem:[%s6699_s3 + $0x108] sm:$0xff] }
  0x89   :  { %4820 = vmatpush1.bf16.msra.mxu0 %v4819_v22  ;;  %v145_v50 = vmul.f32 %v144_v35, %v138_v46  ;;  %v2159_v51 = vmul.f32 %v2158_v36, %v138_v46  ;;  %v183_v61 = vld [vmem:[%s6699_s3 + $0xd0] sm:$0xff]  ;;  %v186_v62 = vld [vmem:[%s6699_s3 + $0xe8] sm:$0xff]  ;;  %v197_v0 = vld [vmem:[%s6699_s3 + $0x140] sm:$0xff]  ;;  %v4831_v3 = vpack.c.bf16 %v190_v60, %v187_v55 }
  0x8a   :  { %4822 = vmatprep.subr.bf16.mxu0 %v4821_v25  ;;  %4848 = vmatpush3.bf16.msra.mxu1 %v4845_v31  ;;  %v194_v63 = vld [vmem:[%s6699_s3 + $0x128] sm:$0xff]  ;;  %v193_v4 = vld [vmem:[%s6699_s3 + $0x120] sm:$0xff]  ;;  %v4857_v6 = vpack.c.bf16 %v186_v62, %v183_v61  ;;  %v196_v10 = vld [vmem:[%s6699_s3 + $0x138] sm:$0xff] }
  0x8b   :  { %4850 = vmatprep.subr.bf16.mxu1 %v4849_v39  ;;  %v147_v57 = vadd.f32 %v145_v50, %v136_v45  ;;  %v2161_v58 = vadd.f32 %v2159_v51, %v136_v45  ;;  %v139_v8 = vld [vmem:[%s6697_s1 + $0x8] sm:$0xff]  ;;  %v4833_v9 = vpack.c.bf16 %v197_v0, %v194_v63  ;;  %v189_v11 = vld [vmem:[%s6699_s3 + $0x100] sm:$0xff]  ;;  %v192_v12 = vld [vmem:[%s6699_s3 + $0x118] sm:$0xff]  ;;  %v4835_v16 = vpack.c.bf16 %v196_v10, %v193_v4 }
  0x8c   :  { %v200_v13 = vld [vmem:[%s6699_s3 + $0x158] sm:$0xff]  ;;  %v203_v14 = vld [vmem:[%s6699_s3 + $0x170] sm:$0xff]  ;;  %v146_v15 = vmul.f32 %v144_v35, %v139_v8  ;;  %v137_v18 = vld [vmem:[%s6698_s2 + $0x8] sm:$0xff]  ;;  %v4861_v20 = vpack.c.bf16 %v192_v12, %v189_v11 }
  0x8d   :  { %4824 = vmatpush1.bf16.msra.mxu0 %v4823_v37  ;;  %v153_v1 = vadd.f32 %v151_v53, %v147_v57  ;;  %v6071_v2 = vadd.f32 %v2165_v54, %v2161_v58  ;;  %v199_v17 = vld [vmem:[%s6699_s3 + $0x150] sm:$0xff]  ;;  %v4173_v19 = vld [vmem:[%s6697_s1 + $0x18] sm:$0xff]  ;;  %v4837_v21 = vpack.c.bf16 %v203_v14, %v200_v13  ;;  %v202_v22 = vld [vmem:[%s6699_s3 + $0x168] sm:$0xff] }
  0x8e   :  { %4826 = vmatprep.subr.bf16.mxu0 %v4825_v43  ;;  %4852 = vmatpush3.bf16.msra.mxu1 %v4849_v39  ;;  %v195_v23 = vld [vmem:[%s6699_s3 + $0x130] sm:$0xff]  ;;  %v198_v24 = vld [vmem:[%s6699_s3 + $0x148] sm:$0xff]  ;;  %v148_v25 = vadd.f32 %v146_v15, %v137_v18  ;;  %v152_v26 = vmul.f32 %v4173_v19, %v150_v41  ;;  %v4839_v27 = vpack.c.bf16 %v202_v22, %v199_v17  ;;  %v201_v29 = vld [vmem:[%s6699_s3 + $0x160] sm:$0xff] }
  0x8f   :  { %4854 = vmatprep.subr.bf16.mxu1 %v4853_v56  ;;  %v155_v5 = vmax.f32 %v153_v1, 0.0  ;;  %v4865_v28 = vpack.c.bf16 %v198_v24, %v195_v23  ;;  %v204_v30 = vld [vmem:[%s6699_s3 + $0x178] sm:$0xff]  ;;  %v361_v34 = vld [vmem:[%s6700_s4] sm:$0xff]  ;;  %v684_v35 = vld [vmem:[#allocation6 + $0x8] sm:$0xff] }
  0x90   :  { %v154_v31 = vadd.f32 %v152_v26, %v148_v25  ;;  %v4869_v32 = vpack.c.bf16 %v204_v30, %v201_v29  ;;  %v690_v37 = vld [vmem:[#allocation6 + $0x38] sm:$0xff]  ;;  %v683_v38 = vld [vmem:[#allocation6] sm:$0xff]  ;;  %v689_v40 = vld [vmem:[#allocation6 + $0x30] sm:$0xff] }
  0x91   :  { %4828 = vmatpush1.bf16.msra.mxu0 %v4827_v52  ;;  %4591 = vmatprep.mubr.f32.mxu1 %v155_v5  ;;  %v4885_v39 = vpack.c.bf16 %v690_v37, %v684_v35  ;;  %v4887_v41 = vpack.c.bf16 %v689_v40, %v683_v38  ;;  %v696_v43 = vld [vmem:[#allocation6 + $0x68] sm:$0xff]  ;;  %v702_v44 = vld [vmem:[#allocation6 + $0x98] sm:$0xff]  ;;  %v695_v45 = vld [vmem:[#allocation6 + $0x60] sm:$0xff] }
  0x92   :  { %4830 = vmatprep.subr.bf16.mxu0 %v4829_v59  ;;  %4856 = vmatpush3.bf16.msra.mxu1 %v4853_v56  ;;  %v156_v33 = vmax.f32 %v154_v31, 0.0  ;;  %v701_v46 = vld [vmem:[#allocation6 + $0x90] sm:$0xff]  ;;  %v4889_v47 = vpack.c.bf16 %v702_v44, %v696_v43  ;;  %v708_v49 = vld [vmem:[#allocation6 + $0xc8] sm:$0xff]  ;;  %v714_v50 = vld [vmem:[#allocation6 + $0xf8] sm:$0xff] }
  0x93   :  { %4858 = vmatprep.subr.bf16.mxu1 %v4857_v6  ;;  %v4891_v48 = vpack.c.bf16 %v701_v46, %v695_v45  ;;  %v4893_v51 = vpack.c.bf16 %v714_v50, %v708_v49  ;;  %v707_v52 = vld [vmem:[#allocation6 + $0xc0] sm:$0xff]  ;;  %v713_v53 = vld [vmem:[#allocation6 + $0xf0] sm:$0xff]  ;;  %v720_v55 = vld [vmem:[#allocation6 + $0x128] sm:$0xff] }
  0x94   :  { %v4895_v54 = vpack.c.bf16 %v713_v53, %v707_v52  ;;  %v726_v56 = vld [vmem:[#allocation6 + $0x158] sm:$0xff]  ;;  %v719_v58 = vld [vmem:[#allocation6 + $0x120] sm:$0xff]  ;;  %v725_v59 = vld [vmem:[#allocation6 + $0x150] sm:$0xff] }
  0x95   :  { %4832 = vmatpush1.bf16.msra.mxu0 %v4831_v3  ;;  %v4897_v57 = vpack.c.bf16 %v726_v56, %v720_v55  ;;  %v732_v60 = vld [vmem:[#allocation6 + $0x188] sm:$0xff]  ;;  %v738_v61 = vld [vmem:[#allocation6 + $0x1b8] sm:$0xff]  ;;  %v4899_v62 = vpack.c.bf16 %v725_v59, %v719_v58  ;;  %v731_v0 = vld [vmem:[#allocation6 + $0x180] sm:$0xff] }
  0x96   :  { %4834 = vmatprep.subr.bf16.mxu0 %v4833_v9  ;;  %4860 = vmatpush3.bf16.msra.mxu1 %v4857_v6  ;;  %v4901_v63 = vpack.c.bf16 %v738_v61, %v732_v60  ;;  %v737_v1 = vld [vmem:[#allocation6 + $0x1b0] sm:$0xff]  ;;  %v744_v3 = vld [vmem:[#allocation6 + $0x1e8] sm:$0xff]  ;;  %v750_v4 = vld [vmem:[#allocation6 + $0x218] sm:$0xff] }
  0x97   :  { %4862 = vmatprep.subr.bf16.mxu1 %v4861_v20  ;;  %v4905_v6 = vpack.c.bf16 %v750_v4, %v744_v3  ;;  %v743_v8 = vld [vmem:[#allocation6 + $0x1e0] sm:$0xff]  ;;  %v749_v9 = vld [vmem:[#allocation6 + $0x210] sm:$0xff]  ;;  %v756_v10 = vld [vmem:[#allocation6 + $0x248] sm:$0xff] }
  0x98   :  { %v762_v11 = vld [vmem:[#allocation6 + $0x278] sm:$0xff]  ;;  %v4907_v12 = vpack.c.bf16 %v749_v9, %v743_v8  ;;  %v755_v14 = vld [vmem:[#allocation6 + $0x240] sm:$0xff]  ;;  %v761_v15 = vld [vmem:[#allocation6 + $0x270] sm:$0xff] }
  0x99   :  { %4836 = vmatpush1.bf16.msra.mxu0 %v4835_v16  ;;  %v4909_v13 = vpack.c.bf16 %v762_v11, %v756_v10  ;;  %v4911_v16 = vpack.c.bf16 %v761_v15, %v755_v14  ;;  %v362_v24 = vld [vmem:[%s6700_s4 + $0x8] sm:$0xff]  ;;  %v363_v26 = vld [vmem:[%s6700_s4 + $0x10] sm:$0xff]  ;;  %v4179_v29 = vld [vmem:[%s6700_s4 + $0x20] sm:$0xff] }
  0x9a   :  { %4838 = vmatprep.subr.bf16.mxu0 %v4837_v21  ;;  %4864 = vmatpush3.bf16.msra.mxu1 %v4861_v20  ;;  %v686_v30 = vld [vmem:[#allocation6 + $0x18] sm:$0xff]  ;;  %v692_v31 = vld [vmem:[#allocation6 + $0x48] sm:$0xff]  ;;  %v4187_v37 = vld [vmem:[%s6700_s4 + $0x40] sm:$0xff] }
  0x9b   :  { %4866 = vmatprep.subr.bf16.mxu1 %v4865_v28  ;;  %v4182_v35 = vld [vmem:[%s6700_s4 + $0x38] sm:$0xff]  ;;  %v685_v38 = vld [vmem:[#allocation6 + $0x10] sm:$0xff]  ;;  %v4188_v43 = vld [vmem:[%s6700_s4 + $0x48] sm:$0xff] }
  0x9c   :  { %v698_v40 = vld [vmem:[#allocation6 + $0x78] sm:$0xff]  ;;  %v4189_v45 = vld [vmem:[%s6700_s4 + $0x50] sm:$0xff]  ;;  %v716_v50 = vld [vmem:[#allocation6 + $0x108] sm:$0xff] }
  0x9d   :  { %4840 = vmatpush1.bf16.msra.mxu0 %v4839_v27  ;;  %v710_v49 = vld [vmem:[#allocation6 + $0xd8] sm:$0xff]  ;;  %v715_v55 = vld [vmem:[#allocation6 + $0x100] sm:$0xff]  ;;  %v721_v60 = vld [vmem:[#allocation6 + $0x130] sm:$0xff] }
  0x9e   :  { %4868 = vmatpush3.bf16.msra.mxu1 %v4865_v28  ;;  %4886 = vmatprep.subr.bf16.mxu0 %v4885_v39  ;;  %v364_v28 = vld [vmem:[%s6700_s4 + $0x18] sm:$0xff]  ;;  %v691_v39 = vld [vmem:[#allocation6 + $0x40] sm:$0xff]  ;;  %v4925_v53 = vpack.c.bf16 %v716_v50, %v710_v49  ;;  %v733_v3 = vld [vmem:[#allocation6 + $0x190] sm:$0xff] }
  0x9f   :  { %4870 = vmatprep.subr.bf16.mxu1 %v4869_v32  ;;  %v4919_v44 = vpack.c.bf16 %v691_v39, %v685_v38  ;;  %v722_v56 = vld [vmem:[#allocation6 + $0x138] sm:$0xff]  ;;  %v727_v61 = vld [vmem:[#allocation6 + $0x160] sm:$0xff]  ;;  %v745_v10 = vld [vmem:[#allocation6 + $0x1f0] sm:$0xff] }
  0xa0   :  { %270 = vmatmul.mubr.f32.vlgmr.msra.gmra.mrb[0].mxu0 %v155_v5  ;;  %v4903_v5 = vpack.c.bf16 %v737_v1, %v731_v0  ;;  %v4931_v0 = vpack.c.bf16 %v727_v61, %v721_v60  ;;  %v739_v4 = vld [vmem:[#allocation6 + $0x1c0] sm:$0xff]  ;;  %v693_v38 = vld [vmem:[#allocation6 + $0x50] sm:$0xff]  ;;  %v358_v39 = vld [vmem:[#allocation5 + $0x8] sm:$0xff] }
  0xa1   :  { %275 = vmatprep.mubr.f32.mxu0 %v5785_v7  ;;  %4888 = vmatpush1.bf16.msra.mxu0 %v4887_v41  ;;  %v704_v41 = vld [vmem:[#allocation6 + $0xa8] sm:$0xff]  ;;  %v4935_v8 = vpack.c.bf16 %v739_v4, %v733_v3  ;;  %v751_v11 = vld [vmem:[#allocation6 + $0x220] sm:$0xff]  ;;  %v717_v61 = vld [vmem:[#allocation6 + $0x110] sm:$0xff] }
  0xa2   :  { %4872 = vmatpush3.bf16.msra.mxu1 %v4869_v32  ;;  %4890 = vmatprep.subr.bf16.mxu0 %v4889_v47  ;;  %v4180_v32 = vld [vmem:[%s6700_s4 + $0x28] sm:$0xff]  ;;  %v4921_v46 = vpack.c.bf16 %v704_v41, %v698_v40  ;;  %v697_v47 = vld [vmem:[#allocation6 + $0x70] sm:$0xff]  ;;  %v4939_v14 = vpack.c.bf16 %v751_v11, %v745_v10  ;;  %v699_v50 = vld [vmem:[#allocation6 + $0x80] sm:$0xff] }
  0xa3   :  { %v700_v41 = vld [vmem:[#allocation6 + $0x88] sm:$0xff]  ;;  %v711_v60 = vld [vmem:[#allocation6 + $0xe0] sm:$0xff]  ;;  %v742_v10 = vld [vmem:[#allocation6 + $0x1d8] sm:$0xff] }
  0xa4   :  { %276 = vmatmul.mubr.f32.gmra.mrb[2].mxu0 %v156_v33 }
  0xa5   :  { %843 = vmatprep.mubr.f32.mxu0 %v5785_v7  ;;  %4592 = vmatmul.mubr.f32.vlgmr.msra.gmra.mrb[0].mxu1 %v156_v33  ;;  %v4181_v33 = vld [vmem:[%s6700_s4 + $0x30] sm:$0xff] }
  0xa6   :  { %4598 = vmatprep.mubr.msk.f32.mxu1 %vm365_vm0, %v361_v34  ;;  %4892 = vmatpush1.bf16.msra.mxu0 %v4891_v48  ;;  %v4917_v34 = vpack.c.bf16 %v692_v31, %v686_v30  ;;  %v703_v48 = vld [vmem:[#allocation6 + $0xa0] sm:$0xff]  ;;  %v688_v31 = vld [vmem:[#allocation6 + $0x28] sm:$0xff] }
  0xa7   :  { %4894 = vmatprep.subr.bf16.mxu0 %v4893_v51  ;;  %v4190_v51 = vld [vmem:[%s6700_s4 + $0x58] sm:$0xff]  ;;  %v4923_v52 = vpack.c.bf16 %v703_v48, %v697_v47 }
  0xaa   :  { %4896 = vmatpush1.bf16.msra.mxu0 %v4895_v54  ;;  %v709_v54 = vld [vmem:[#allocation6 + $0xd0] sm:$0xff] }
  0xab   :  { %4898 = vmatprep.subr.bf16.mxu0 %v4897_v57  ;;  %v728_v57 = vld [vmem:[#allocation6 + $0x168] sm:$0xff]  ;;  %v4927_v58 = vpack.c.bf16 %v715_v55, %v709_v54  ;;  %v718_v55 = vld [vmem:[#allocation6 + $0x118] sm:$0xff] }
  0xac   :  { %v4929_v59 = vpack.c.bf16 %v728_v57, %v722_v56  ;;  %v712_v54 = vld [vmem:[#allocation6 + $0xe8] sm:$0xff] }
  0xae   :  { %4900 = vmatpush1.bf16.msra.mxu0 %v4899_v62  ;;  %v734_v62 = vld [vmem:[#allocation6 + $0x198] sm:$0xff] }
  0xaf   :  { %4902 = vmatprep.subr.bf16.mxu0 %v4901_v63  ;;  %v740_v63 = vld [vmem:[#allocation6 + $0x1c8] sm:$0xff] }
  0xb0   :  { %v4933_v1 = vpack.c.bf16 %v740_v63, %v734_v62  ;;  %v360_v62 = vld [vmem:[#allocation5 + $0x18] sm:$0xff]  ;;  %v724_v63 = vld [vmem:[#allocation6 + $0x148] sm:$0xff] }
  0xb2   :  { %4904 = vmatpush1.bf16.msra.mxu0 %v4903_v5  ;;  %v746_v5 = vld [vmem:[#allocation6 + $0x1f8] sm:$0xff] }
  0xb3   :  { %4906 = vmatprep.subr.bf16.mxu0 %v4905_v6  ;;  %v752_v6 = vld [vmem:[#allocation6 + $0x228] sm:$0xff] }
  0xb4   :  { %v4937_v9 = vpack.c.bf16 %v752_v6, %v746_v5  ;;  %v723_v6 = vld [vmem:[#allocation6 + $0x140] sm:$0xff] }
  0xb6   :  { %4908 = vmatpush1.bf16.msra.mxu0 %v4907_v12  ;;  %v758_v12 = vld [vmem:[#allocation6 + $0x258] sm:$0xff] }
  0xb7   :  { %4910 = vmatprep.subr.bf16.mxu0 %v4909_v13  ;;  %v764_v13 = vld [vmem:[#allocation6 + $0x288] sm:$0xff] }
  0xb8   :  { %v4941_v15 = vpack.c.bf16 %v764_v13, %v758_v12 }
  0xba   :  { %4912 = vmatpush1.bf16.msra.mxu0 %v4911_v16  ;;  %v757_v16 = vld [vmem:[#allocation6 + $0x250] sm:$0xff] }
 0x173   :  { %v271_v17 = vpop.f32.mrb[0].mxu0 }
 0x174   :  { %v273_v18 = vpop.f32.mrb[1].mxu0 }
 0x177   :  { %v277_v19 = vpop.f32.mrb[2].mxu0 }
 0x178   :  { %v4873_v20 = vpack.c.bf16 %v277_v19, %v271_v17  ;;  %v279_v21 = vpop.f32.mrb[3].mxu0  ;;  %v4593_v23 = vpop.f32.mrb[0].mxu1  ;;  %v763_v17 = vld [vmem:[#allocation6 + $0x280] sm:$0xff]  ;;  %v768_v19 = vld [vmem:[#allocation6 + $0x2a8] sm:$0xff] }
 0x179   :  { %v4877_v22 = vpack.c.bf16 %v279_v21, %v273_v18  ;;  %v348_v25 = vpop.f32.mrb[1].mxu1  ;;  %v4943_v18 = vpack.c.bf16 %v763_v17, %v757_v16  ;;  %v748_v16 = vld [vmem:[#allocation6 + $0x208] sm:$0xff]  ;;  %v754_v17 = vld [vmem:[#allocation6 + $0x238] sm:$0xff] }
 0x17a   :  { %4874 = vmatprep.subr.bf16.mxu1 %v4873_v20  ;;  %v4881_v27 = vpack.c.bf16 %v4593_v23, %v348_v25  ;;  %v773_v23 = vld [vmem:[#allocation6 + $0x2d0] sm:$0xff] }
 0x17b   :  { %4876 = vmatpush3.bf16.msra.mxu1 %v4873_v20  ;;  %v774_v20 = vld [vmem:[#allocation6 + $0x2d8] sm:$0xff] }
 0x17c   :  { %4878 = vmatprep.subr.bf16.mxu1 %v4877_v22  ;;  %v4913_v21 = vpack.c.bf16 %v774_v20, %v768_v19  ;;  %v4969_v19 = vpack.c.bf16 %v754_v17, %v748_v16  ;;  %v747_v20 = vld [vmem:[#allocation6 + $0x200] sm:$0xff]  ;;  %v1567_v16 = vld [vmem:[#allocation9 + $0x158] sm:$0xff] }
 0x17d   :  { %v1570_v17 = vld [vmem:[#allocation9 + $0x170] sm:$0xff] }
 0x17e   :  { %4599 = vmatmul.mubr.msk.f32.vlgmr.msra.gmra.mrb[2].mxu1 %vm365_vm0, %v362_v24  ;;  %v770_v24 = vld [vmem:[#allocation6 + $0x2b8] sm:$0xff]  ;;  %4914 = vmatprep.subr.bf16.mxu0 %v4913_v21  ;;  %v753_v21 = vld [vmem:[#allocation6 + $0x230] sm:$0xff] }
 0x17f   :  { %4880 = vmatpush3.bf16.msra.mxu1 %v4877_v22  ;;  %4601 = vmatprep.mubr.msk.f32.mxu1 %vm365_vm0, %v363_v26  ;;  %v767_v22 = vld [vmem:[#allocation6 + $0x2a0] sm:$0xff]  ;;  %v776_v26 = vld [vmem:[#allocation6 + $0x2e8] sm:$0xff] }
 0x180   :  { %4882 = vmatprep.subr.bf16.mxu1 %v4881_v27  ;;  %v4915_v25 = vpack.c.bf16 %v773_v23, %v767_v22  ;;  %v760_v22 = vld [vmem:[#allocation6 + $0x268] sm:$0xff]  ;;  %v766_v23 = vld [vmem:[#allocation6 + $0x298] sm:$0xff] }
 0x182   :  { %4602 = vmatmul.mubr.msk.f32.gmra.mrb[4].mxu1 %vm365_vm0, %v364_v28  ;;  %v775_v28 = vld [vmem:[#allocation6 + $0x2e0] sm:$0xff]  ;;  %4916 = vmatpush1.bf16.msra.mxu0 %v4915_v25  ;;  %v4973_v25 = vpack.c.bf16 %v766_v23, %v760_v22  ;;  %v1573_v22 = vld [vmem:[#allocation9 + $0x188] sm:$0xff]  ;;  %v1576_v23 = vld [vmem:[#allocation9 + $0x1a0] sm:$0xff] }
 0x183   :  { %4608 = vmatprep.mubr.msk.f32.mxu1 %vm365_vm0, %v4179_v29  ;;  %v4945_v29 = vpack.c.bf16 %v776_v26, %v770_v24  ;;  %v4971_v24 = vpack.c.bf16 %v753_v21, %v747_v20  ;;  %v759_v26 = vld [vmem:[#allocation6 + $0x260] sm:$0xff]  ;;  %v1569_v21 = vld [vmem:[#allocation9 + $0x168] sm:$0xff] }
 0x184   :  { %v1566_v20 = vld [vmem:[#allocation9 + $0x150] sm:$0xff] }
 0x186   :  { %4609 = vmatmul.mubr.msk.f32.vlgmr.msra.gmra.mrb[2].mxu1 %vm365_vm0, %v4180_v32  ;;  %v694_v32 = vld [vmem:[#allocation6 + $0x58] sm:$0xff] }
 0x187   :  { %4611 = vmatprep.mubr.msk.f32.mxu1 %vm365_vm0, %v4181_v33  ;;  %4884 = vmatpush3.bf16.msra.mxu1 %v4881_v27  ;;  %v769_v27 = vld [vmem:[#allocation6 + $0x2b0] sm:$0xff]  ;;  %v4949_v33 = vpack.c.bf16 %v694_v32, %v688_v31  ;;  %v771_v32 = vld [vmem:[#allocation6 + $0x2c0] sm:$0xff] }
 0x188   :  { %4918 = vmatprep.subr.bf16.mxu1 %v4917_v34  ;;  %v4947_v30 = vpack.c.bf16 %v775_v28, %v769_v27  ;;  %v357_v34 = vld [vmem:[#allocation5] sm:$0xff]  ;;  %v765_v27 = vld [vmem:[#allocation6 + $0x290] sm:$0xff]  ;;  %v772_v28 = vld [vmem:[#allocation6 + $0x2c8] sm:$0xff] }
 0x189   :  { %4950 = vmatprep.subr.bf16.mxu0 %v4949_v33  ;;  %v777_v33 = vld [vmem:[#allocation6 + $0x2f0] sm:$0xff] }
 0x18a   :  { %4612 = vmatmul.mubr.msk.f32.gmra.mrb[4].mxu1 %vm365_vm0, %v4182_v35 }
 0x18b   :  { %4618 = vmatprep.mubr.msk.f32.mxu1 %vm365_vm0, %v4187_v37  ;;  %v687_v37 = vld [vmem:[#allocation6 + $0x20] sm:$0xff] }
 0x18e   :  { %4619 = vmatmul.mubr.msk.f32.vlgmr.msra.gmra.mrb[2].mxu1 %vm365_vm0, %v4188_v43  ;;  %v706_v43 = vld [vmem:[#allocation6 + $0xb8] sm:$0xff] }
 0x18f   :  { %4621 = vmatprep.mubr.msk.f32.mxu1 %vm365_vm0, %v4189_v45  ;;  %4920 = vmatpush1.bf16.msra.mxu1 %v4919_v44  ;;  %v4951_v45 = vpack.c.bf16 %v693_v38, %v687_v37  ;;  %v4953_v49 = vpack.c.bf16 %v706_v43, %v700_v41  ;;  %v1528_v37 = vld [vmem:[#allocation9 + $0x20] sm:$0xff]  ;;  %v1531_v41 = vld [vmem:[#allocation9 + $0x38] sm:$0xff]  ;;  %v1534_v43 = vld [vmem:[#allocation9 + $0x50] sm:$0xff] }
 0x190   :  { %4922 = vmatprep.subr.bf16.mxu1 %v4921_v46  ;;  %v1524_v38 = vld [vmem:[#allocation9] sm:$0xff] }
 0x192   :  { %4622 = vmatmul.mubr.msk.f32.gmra.mrb[4].mxu1 %vm365_vm0, %v4190_v51  ;;  %v705_v51 = vld [vmem:[#allocation6 + $0xb0] sm:$0xff] }
 0x193   :  { %4924 = vmatpush1.bf16.msra.mxu1 %v4923_v52  ;;  %932 = vmatprep.mubr.f32.mxu1 %v5785_v7  ;;  %v359_v52 = vld [vmem:[#allocation5 + $0x10] sm:$0xff]  ;;  %v4955_v56 = vpack.c.bf16 %v705_v51, %v699_v50 }
 0x194   :  { %4926 = vmatprep.subr.bf16.mxu1 %v4925_v53 }
 0x197   :  { %4928 = vmatpush1.bf16.msra.mxu1 %v4927_v58 }
 0x198   :  { %4930 = vmatprep.subr.bf16.mxu1 %v4929_v59  ;;  %v4957_v59 = vpack.c.bf16 %v718_v55, %v712_v54  ;;  %v1543_v54 = vld [vmem:[#allocation9 + $0x98] sm:$0xff]  ;;  %v1546_v55 = vld [vmem:[#allocation9 + $0xb0] sm:$0xff] }
 0x19b   :  { %4932 = vmatpush1.bf16.msra.mxu1 %v4931_v0  ;;  %v730_v0 = vld [vmem:[#allocation6 + $0x178] sm:$0xff] }
 0x19c   :  { %4934 = vmatprep.subr.bf16.mxu1 %v4933_v1  ;;  %v4959_v1 = vpack.c.bf16 %v717_v61, %v711_v60  ;;  %v4961_v5 = vpack.c.bf16 %v730_v0, %v724_v63  ;;  %v1549_v60 = vld [vmem:[#allocation9 + $0xc8] sm:$0xff]  ;;  %v1552_v61 = vld [vmem:[#allocation9 + $0xe0] sm:$0xff] }
 0x19d   :  { %v5021_v63 = vpack.c.bf16 %v1552_v61, %v1549_v60  ;;  %v1548_v0 = vld [vmem:[#allocation9 + $0xc0] sm:$0xff] }
 0x19f   :  { %4936 = vmatpush1.bf16.msra.mxu1 %v4935_v8  ;;  %v729_v8 = vld [vmem:[#allocation6 + $0x170] sm:$0xff] }
 0x1a0   :  { %4938 = vmatprep.subr.bf16.mxu1 %v4937_v9  ;;  %v736_v9 = vld [vmem:[#allocation6 + $0x1a8] sm:$0xff]  ;;  %v4963_v11 = vpack.c.bf16 %v729_v8, %v723_v6  ;;  %v1554_v8 = vld [vmem:[#allocation9 + $0xf0] sm:$0xff] }
 0x1a1   :  { %v4965_v13 = vpack.c.bf16 %v742_v10, %v736_v9  ;;  %v1557_v9 = vld [vmem:[#allocation9 + $0x108] sm:$0xff] }
 0x1a2   :  { %v1561_v10 = vld [vmem:[#allocation9 + $0x128] sm:$0xff] }
 0x1a3   :  { %4940 = vmatpush1.bf16.msra.mxu1 %v4939_v14  ;;  %v735_v14 = vld [vmem:[#allocation6 + $0x1a0] sm:$0xff] }
 0x1a4   :  { %4942 = vmatprep.subr.bf16.mxu1 %v4941_v15  ;;  %v741_v15 = vld [vmem:[#allocation6 + $0x1d0] sm:$0xff] }
 0x1a7   :  { %4944 = vmatpush1.bf16.msra.mxu1 %v4943_v18  ;;  %v4967_v18 = vpack.c.bf16 %v741_v15, %v735_v14  ;;  %v1560_v14 = vld [vmem:[#allocation9 + $0x120] sm:$0xff]  ;;  %v1563_v15 = vld [vmem:[#allocation9 + $0x138] sm:$0xff] }
 0x1a8   :  { %4946 = vmatprep.subr.bf16.mxu1 %v4945_v29  ;;  %v778_v29 = vld [vmem:[#allocation6 + $0x2f8] sm:$0xff] }
 0x1a9   :  { %v4977_v31 = vpack.c.bf16 %v778_v29, %v772_v28  ;;  %v5037_v29 = vpack.c.bf16 %v1576_v23, %v1573_v22  ;;  %v1605_v22 = vld [vmem:[#allocation9 + $0x288] sm:$0xff] }
 0x1ab   :  { %4948 = vmatpush1.bf16.msra.mxu1 %v4947_v30  ;;  %v4975_v30 = vpack.c.bf16 %v765_v27, %v759_v26  ;;  %v5035_v26 = vpack.c.bf16 %v1569_v21, %v1566_v20  ;;  %v1061_v20 = vld [vmem:[%s6703_s7 + $0x8] sm:$0xff]  ;;  %v1602_v21 = vld [vmem:[#allocation9 + $0x270] sm:$0xff] }
 0x261   :  { %v4620_v35 = vpop.f32.mrb[2].mxu1 }
 0x262   :  { %v656_v40 = vpop.f32.mrb[3].mxu1  ;;  %v5465_v46 = vadd.f32 %v4620_v35, %v358_v39  ;;  %v1525_v35 = vld [vmem:[#allocation9 + $0x8] sm:$0xff] }
 0x263   :  { %v5466_v44 = vadd.f32 %v656_v40, %v357_v34  ;;  %v4979_v34 = vpack.c.bf16 %v777_v33, %v771_v32  ;;  %v5005_v39 = vpack.c.bf16 %v1528_v37, %v1525_v35  ;;  %v1527_v40 = vld [vmem:[#allocation9 + $0x18] sm:$0xff]  ;;  %v1582_v33 = vld [vmem:[#allocation9 + $0x1d0] sm:$0xff] }
 0x264   :  { %v6176_v57 = vmax.f32 %v5465_v46, 0.0  ;;  %v1530_v46 = vld [vmem:[#allocation9 + $0x30] sm:$0xff]  ;;  %v1579_v32 = vld [vmem:[#allocation9 + $0x1b8] sm:$0xff] }
 0x265   :  { %v6171_v47 = vmax.f32 %v5466_v44, 0.0  ;;  %v4623_v48 = vpop.f32.mrb[4].mxu1  ;;  %v5007_v44 = vpack.c.bf16 %v1527_v40, %v1524_v38 }
 0x266   :  { %v666_v53 = vpop.f32.mrb[5].mxu1  ;;  %v5467_v3 = vadd.f32 %v4623_v48, %v360_v62  ;;  %v1537_v48 = vld [vmem:[#allocation9 + $0x68] sm:$0xff] }
 0x267   :  { %844 = vmatmul.mubr.f32.vlgmr.msra.gmra.mrb[4].mxu0 %v6171_v47  ;;  %933 = vmatmul.mubr.f32.vlgmr.msra.gmra.mrb[6].mxu1 %v6171_v47  ;;  %v5468_v58 = vadd.f32 %v666_v53, %v359_v52  ;;  %v1536_v52 = vld [vmem:[#allocation9 + $0x60] sm:$0xff]  ;;  %v1539_v53 = vld [vmem:[#allocation9 + $0x78] sm:$0xff] }
 0x268   :  { %4952 = vmatpush1.bf16.msra.mxu0 %v4951_v45  ;;  %849 = vmatprep.mubr.f32.mxu0 %v5785_v7  ;;  %v682_v12 = vmax.f32 %v5467_v3, 0.0  ;;  %v5009_v45 = vpack.c.bf16 %v1534_v43, %v1531_v41  ;;  %v1555_v3 = vld [vmem:[#allocation9 + $0xf8] sm:$0xff]  ;;  %v5041_v43 = vpack.c.bf16 %v1582_v33, %v1579_v32  ;;  %v1064_v32 = vld [vmem:[%s6703_s7 + $0x20] sm:$0xff] }
 0x269   :  { %938 = vmatprep.mubr.f32.mxu1 %v5785_v7  ;;  %4954 = vmatprep.subr.bf16.mxu0 %v4953_v49  ;;  %v681_v4 = vmax.f32 %v5468_v58, 0.0  ;;  %v1540_v49 = vld [vmem:[#allocation9 + $0x80] sm:$0xff]  ;;  %v1542_v58 = vld [vmem:[#allocation9 + $0x90] sm:$0xff] }
 0x26a   :  { %v5013_v51 = vpack.c.bf16 %v1540_v49, %v1537_v48  ;;  %v1585_v48 = vld [vmem:[#allocation9 + $0x1e8] sm:$0xff]  ;;  %v1588_v49 = vld [vmem:[#allocation9 + $0x200] sm:$0xff] }
 0x26b   :  { %850 = vmatmul.mubr.f32.gmra.mrb[6].mxu0 %v6176_v57  ;;  %939 = vmatmul.mubr.f32.gmra.mrb[8].mxu1 %v6176_v57 }
 0x26c   :  { %4956 = vmatpush1.bf16.msra.mxu0 %v4955_v56  ;;  %855 = vmatprep.mubr.f32.mxu0 %v5785_v7  ;;  %v5015_v56 = vpack.c.bf16 %v1539_v53, %v1536_v52 }
 0x26d   :  { %944 = vmatprep.mubr.f32.mxu1 %v5785_v7  ;;  %4958 = vmatprep.subr.bf16.mxu0 %v4957_v59  ;;  %v1545_v59 = vld [vmem:[#allocation9 + $0xa8] sm:$0xff] }
 0x26e   :  { %v5019_v62 = vpack.c.bf16 %v1545_v59, %v1542_v58  ;;  %v1591_v58 = vld [vmem:[#allocation9 + $0x218] sm:$0xff]  ;;  %v1594_v59 = vld [vmem:[#allocation9 + $0x230] sm:$0xff] }
 0x26f   :  { %856 = vmatmul.mubr.f32.gmra.mrb[8].mxu0 %v681_v4  ;;  %945 = vmatmul.mubr.f32.gmra.mrb[10].mxu1 %v681_v4 }
 0x270   :  { %4960 = vmatpush1.bf16.msra.mxu0 %v4959_v1  ;;  %861 = vmatprep.mubr.f32.mxu0 %v5785_v7  ;;  %v1551_v1 = vld [vmem:[#allocation9 + $0xd8] sm:$0xff] }
 0x271   :  { %950 = vmatprep.mubr.f32.mxu1 %v5785_v7  ;;  %4962 = vmatprep.subr.bf16.mxu0 %v4961_v5  ;;  %v5023_v5 = vpack.c.bf16 %v1551_v1, %v1548_v0 }
 0x273   :  { %862 = vmatmul.mubr.f32.gmra.mrb[10].mxu0 %v682_v12  ;;  %951 = vmatmul.mubr.f32.gmra.mrb[12].mxu1 %v682_v12 }
 0x274   :  { %4964 = vmatpush1.bf16.msra.mxu0 %v4963_v11  ;;  %1021 = vmatprep.mubr.f32.mxu0 %v5785_v7  ;;  %v1564_v11 = vld [vmem:[#allocation9 + $0x140] sm:$0xff] }
 0x275   :  { %4966 = vmatprep.subr.bf16.mxu0 %v4965_v13  ;;  %1153 = vmatprep.mubr.f32.mxu1 %v5785_v7  ;;  %v5029_v13 = vpack.c.bf16 %v1564_v11, %v1561_v10  ;;  %v1597_v10 = vld [vmem:[#allocation9 + $0x248] sm:$0xff]  ;;  %v1600_v11 = vld [vmem:[#allocation9 + $0x260] sm:$0xff] }
 0x278   :  { %4968 = vmatpush1.bf16.msra.mxu0 %v4967_v18  ;;  %v5031_v18 = vpack.c.bf16 %v1563_v15, %v1560_v14  ;;  %v1596_v14 = vld [vmem:[#allocation9 + $0x240] sm:$0xff]  ;;  %v1599_v15 = vld [vmem:[#allocation9 + $0x258] sm:$0xff] }
 0x279   :  { %4970 = vmatprep.subr.bf16.mxu0 %v4969_v19  ;;  %v5033_v19 = vpack.c.bf16 %v1570_v17, %v1567_v16  ;;  %v5053_v16 = vpack.c.bf16 %v1600_v11, %v1597_v10  ;;  %v1603_v17 = vld [vmem:[#allocation9 + $0x278] sm:$0xff]  ;;  %v1541_v10 = vld [vmem:[#allocation9 + $0x88] sm:$0xff]  ;;  %v1592_v11 = vld [vmem:[#allocation9 + $0x220] sm:$0xff] }
 0x27c   :  { %4972 = vmatpush1.bf16.msra.mxu0 %v4971_v24 }
 0x27d   :  { %4974 = vmatprep.subr.bf16.mxu0 %v4973_v25 }
 0x280   :  { %4976 = vmatpush1.bf16.msra.mxu0 %v4975_v30  ;;  %v1572_v30 = vld [vmem:[#allocation9 + $0x180] sm:$0xff] }
 0x281   :  { %4978 = vmatprep.subr.bf16.mxu0 %v4977_v31  ;;  %v1575_v31 = vld [vmem:[#allocation9 + $0x198] sm:$0xff] }
 0x282   :  { %v5039_v37 = vpack.c.bf16 %v1575_v31, %v1572_v30 }
 0x284   :  { %4980 = vmatpush1.bf16.msra.mxu0 %v4979_v34 }
 0x285   :  { %5006 = vmatprep.subr.bf16.mxu0 %v5005_v39 }
 0x287   :  { %1022 = vmatmul.mubr.f32.vlgmr.msra.gmra.mrb[12].mxu0 %v6171_v47  ;;  %v1533_v47 = vld [vmem:[#allocation9 + $0x48] sm:$0xff] }
 0x288   :  { %1027 = vmatprep.mubr.f32.mxu0 %v5785_v7  ;;  %5008 = vmatpush1.bf16.msra.mxu0 %v5007_v44  ;;  %v5011_v50 = vpack.c.bf16 %v1533_v47, %v1530_v46  ;;  %v1578_v44 = vld [vmem:[#allocation9 + $0x1b0] sm:$0xff] }
 0x289   :  { %5010 = vmatprep.subr.bf16.mxu0 %v5009_v45  ;;  %v1581_v45 = vld [vmem:[#allocation9 + $0x1c8] sm:$0xff] }
 0x28a   :  { %v5043_v52 = vpack.c.bf16 %v1581_v45, %v1578_v44 }
 0x28b   :  { %1028 = vmatmul.mubr.f32.gmra.mrb[14].mxu0 %v6176_v57  ;;  %v5017_v57 = vpack.c.bf16 %v1546_v55, %v1543_v54  ;;  %v5045_v55 = vpack.c.bf16 %v1588_v49, %v1585_v48  ;;  %v1574_v48 = vld [vmem:[#allocation9 + $0x190] sm:$0xff]  ;;  %v1577_v49 = vld [vmem:[#allocation9 + $0x1a8] sm:$0xff] }
 0x28c   :  { %1033 = vmatprep.mubr.f32.mxu0 %v5785_v7  ;;  %5012 = vmatpush1.bf16.msra.mxu0 %v5011_v50 }
 0x28d   :  { %5014 = vmatprep.subr.bf16.mxu0 %v5013_v51 }
 0x28f   :  { %1034 = vmatmul.mubr.f32.gmra.mrb[16].mxu0 %v681_v4  ;;  %v1558_v4 = vld [vmem:[#allocation9 + $0x110] sm:$0xff] }
 0x290   :  { %1039 = vmatprep.mubr.f32.mxu0 %v5785_v7  ;;  %5016 = vmatpush1.bf16.msra.mxu0 %v5015_v56  ;;  %v5025_v6 = vpack.c.bf16 %v1558_v4, %v1555_v3  ;;  %v1584_v56 = vld [vmem:[#allocation9 + $0x1e0] sm:$0xff]  ;;  %v5049_v4 = vpack.c.bf16 %v1594_v59, %v1591_v58  ;;  %v1529_v58 = vld [vmem:[#allocation9 + $0x28] sm:$0xff] }
 0x291   :  { %5018 = vmatprep.subr.bf16.mxu0 %v5017_v57  ;;  %v1587_v57 = vld [vmem:[#allocation9 + $0x1f8] sm:$0xff]  ;;  %v1580_v59 = vld [vmem:[#allocation9 + $0x1c0] sm:$0xff] }
 0x293   :  { %1040 = vmatmul.mubr.f32.gmra.mrb[18].mxu0 %v682_v12  ;;  %v5027_v12 = vpack.c.bf16 %v1557_v9, %v1554_v8 }
 0x294   :  { %5020 = vmatpush1.bf16.msra.mxu0 %v5019_v62  ;;  %v5047_v62 = vpack.c.bf16 %v1587_v57, %v1584_v56  ;;  %v4208_v56 = vld [vmem:[%s6703_s7 + $0x68] sm:$0xff]  ;;  %v1526_v57 = vld [vmem:[#allocation9 + $0x10] sm:$0xff] }
 0x295   :  { %5022 = vmatprep.subr.bf16.mxu0 %v5021_v63 }
 0x298   :  { %5024 = vmatpush1.bf16.msra.mxu0 %v5023_v5  ;;  %v1590_v5 = vld [vmem:[#allocation9 + $0x210] sm:$0xff] }
 0x299   :  { %5026 = vmatprep.subr.bf16.mxu0 %v5025_v6  ;;  %v1593_v6 = vld [vmem:[#allocation9 + $0x228] sm:$0xff] }
 0x29c   :  { %5028 = vmatpush1.bf16.msra.mxu0 %v5027_v12  ;;  %v5051_v12 = vpack.c.bf16 %v1593_v6, %v1590_v5  ;;  %v4217_v5 = vld [vmem:[%s6703_s7 + $0x78] sm:$0xff] }
 0x29d   :  { %5030 = vmatprep.subr.bf16.mxu0 %v5029_v13  ;;  %v1060_v13 = vld [vmem:[%s6703_s7] sm:$0xff] }
 0x2a0   :  { %5032 = vmatpush1.bf16.msra.mxu0 %v5031_v18  ;;  %v1606_v18 = vld [vmem:[#allocation9 + $0x290] sm:$0xff] }
 0x2a1   :  { %5034 = vmatprep.subr.bf16.mxu0 %v5033_v19  ;;  %v5055_v19 = vpack.c.bf16 %v1599_v15, %v1596_v14  ;;  %v5057_v23 = vpack.c.bf16 %v1606_v18, %v1603_v17  ;;  %v1547_v17 = vld [vmem:[#allocation9 + $0xb8] sm:$0xff]  ;;  %v1598_v18 = vld [vmem:[#allocation9 + $0x250] sm:$0xff] }
 0x2a4   :  { %5036 = vmatpush1.bf16.msra.mxu0 %v5035_v26  ;;  %v5059_v26 = vpack.c.bf16 %v1605_v22, %v1602_v21 }
 0x2a5   :  { %5038 = vmatprep.subr.bf16.mxu0 %v5037_v29  ;;  %v1063_v29 = vld [vmem:[%s6703_s7 + $0x18] sm:$0xff] }
 0x2a8   :  { %5040 = vmatpush1.bf16.msra.mxu0 %v5039_v37  ;;  %v1065_v37 = vld [vmem:[%s6703_s7 + $0x28] sm:$0xff] }
 0x2a9   :  { %5042 = vmatprep.subr.bf16.mxu0 %v5041_v43 }
 0x2ac   :  { %5044 = vmatpush1.bf16.msra.mxu0 %v5043_v52  ;;  %v4204_v52 = vld [vmem:[%s6703_s7 + $0x48] sm:$0xff] }
 0x2ad   :  { %5046 = vmatprep.subr.bf16.mxu0 %v5045_v55  ;;  %v4207_v55 = vld [vmem:[%s6703_s7 + $0x60] sm:$0xff] }
 0x2b0   :  { %5048 = vmatpush1.bf16.msra.mxu0 %v5047_v62  ;;  %v5071_v62 = vpack.c.bf16 %v1529_v58, %v1526_v57  ;;  %v1046_v58 = vld [vmem:[#allocation8] sm:$0xff] }
 0x2b1   :  { %5050 = vmatprep.subr.bf16.mxu0 %v5049_v4  ;;  %v1589_v4 = vld [vmem:[#allocation9 + $0x208] sm:$0xff] }
 0x2b4   :  { %5052 = vmatpush1.bf16.msra.mxu0 %v5051_v12  ;;  %v1595_v12 = vld [vmem:[#allocation9 + $0x238] sm:$0xff] }
 0x2b5   :  { %5054 = vmatprep.subr.bf16.mxu0 %v5053_v16  ;;  %v5081_v15 = vpack.c.bf16 %v1595_v12, %v1592_v11  ;;  %v1544_v16 = vld [vmem:[#allocation9 + $0xa0] sm:$0xff]  ;;  %v1051_v11 = vld [vmem:[#allocation8 + $0x28] sm:$0xff] }
 0x2b6   :  { %v5083_v21 = vpack.c.bf16 %v1547_v17, %v1544_v16 }
 0x2b8   :  { %5056 = vmatpush1.bf16.msra.mxu0 %v5055_v19  ;;  %v1601_v19 = vld [vmem:[#allocation9 + $0x268] sm:$0xff] }
 0x2b9   :  { %5058 = vmatprep.subr.bf16.mxu0 %v5057_v23  ;;  %v5085_v22 = vpack.c.bf16 %v1601_v19, %v1598_v18  ;;  %v1550_v23 = vld [vmem:[#allocation9 + $0xd0] sm:$0xff]  ;;  %v1052_v18 = vld [vmem:[#allocation8 + $0x30] sm:$0xff]  ;;  %v1053_v19 = vld [vmem:[#allocation8 + $0x38] sm:$0xff] }
 0x2bc   :  { %5060 = vmatpush1.bf16.msra.mxu0 %v5059_v26  ;;  %v1607_v26 = vld [vmem:[#allocation9 + $0x298] sm:$0xff] }
 0x33a   :  { %v845_v24 = vpop.f32.mrb[4].mxu0  ;;  %v6192_v25 = vpop.f32.mrb[6].mxu1 }
 0x33b   :  { %v847_v27 = vpop.f32.mrb[5].mxu0  ;;  %v936_v28 = vpop.f32.mrb[7].mxu1 }
 0x33e   :  { %v851_v34 = vpop.f32.mrb[6].mxu0  ;;  %v940_v35 = vpop.f32.mrb[8].mxu1 }
 0x33f   :  { %v4983_v38 = vpack.c.bf16 %v851_v34, %v845_v24  ;;  %v4991_v39 = vpack.c.bf16 %v940_v35, %v6192_v25  ;;  %v853_v40 = vpop.f32.mrb[7].mxu0  ;;  %v942_v41 = vpop.f32.mrb[9].mxu1  ;;  %v1609_v24 = vld [vmem:[#allocation9 + $0x2a8] sm:$0xff]  ;;  %v1612_v25 = vld [vmem:[#allocation9 + $0x2c0] sm:$0xff] }
 0x340   :  { %v4981_v46 = vpack.c.bf16 %v853_v40, %v847_v27  ;;  %v4989_v47 = vpack.c.bf16 %v942_v41, %v936_v28  ;;  %v1062_v27 = vld [vmem:[%s6703_s7 + $0x10] sm:$0xff]  ;;  %v5061_v28 = vpack.c.bf16 %v1612_v25, %v1609_v24  ;;  %v1553_v24 = vld [vmem:[#allocation9 + $0xe8] sm:$0xff] }
 0x341   :  { %v1066_v41 = vld [vmem:[%s6703_s7 + $0x30] sm:$0xff] }
 0x342   :  { %v857_v50 = vpop.f32.mrb[8].mxu0  ;;  %v946_v51 = vpop.f32.mrb[10].mxu1  ;;  %4982 = vmatprep.subr.bf16.mxu1 %v4981_v46  ;;  %5062 = vmatprep.subr.bf16.mxu0 %v5061_v28  ;;  %v4202_v46 = vld [vmem:[%s6703_s7 + $0x38] sm:$0xff]  ;;  %v1604_v25 = vld [vmem:[#allocation9 + $0x280] sm:$0xff]  ;;  %v5087_v28 = vpack.c.bf16 %v1553_v24, %v1550_v23 }
 0x343   :  { %v859_v53 = vpop.f32.mrb[9].mxu0  ;;  %v948_v54 = vpop.f32.mrb[11].mxu1  ;;  %4984 = vmatpush1.bf16.msra.mxu1 %v4983_v38 }
 0x346   :  { %v863_v60 = vpop.f32.mrb[10].mxu0  ;;  %v952_v61 = vpop.f32.mrb[12].mxu1 }
 0x347   :  { %v4987_v63 = vpack.c.bf16 %v863_v60, %v857_v50  ;;  %v4995_v0 = vpack.c.bf16 %v952_v61, %v946_v51  ;;  %v865_v1 = vpop.f32.mrb[11].mxu0  ;;  %v954_v3 = vpop.f32.mrb[13].mxu1  ;;  %v4203_v50 = vld [vmem:[%s6703_s7 + $0x40] sm:$0xff]  ;;  %v5069_v51 = vpack.c.bf16 %v1577_v49, %v1574_v48  ;;  %v1583_v60 = vld [vmem:[#allocation9 + $0x1d8] sm:$0xff]  ;;  %v4216_v61 = vld [vmem:[%s6703_s7 + $0x70] sm:$0xff] }
 0x348   :  { %v4985_v8 = vpack.c.bf16 %v865_v1, %v859_v53  ;;  %v4993_v9 = vpack.c.bf16 %v954_v3, %v948_v54  ;;  %v4205_v53 = vld [vmem:[%s6703_s7 + $0x50] sm:$0xff]  ;;  %v4206_v54 = vld [vmem:[%s6703_s7 + $0x58] sm:$0xff]  ;;  %v1535_v1 = vld [vmem:[#allocation9 + $0x58] sm:$0xff] }
 0x349   :  { %v1586_v3 = vld [vmem:[#allocation9 + $0x1f0] sm:$0xff]  ;;  %v1616_v48 = vld [vmem:[#allocation9 + $0x2e0] sm:$0xff] }
 0x34a   :  { %4986 = vmatprep.subr.bf16.mxu1 %v4985_v8  ;;  %v5077_v8 = vpack.c.bf16 %v1589_v4, %v1586_v3 }
 0x34b   :  { %4988 = vmatpush1.bf16.msra.mxu1 %v4987_v63  ;;  %v5073_v63 = vpack.c.bf16 %v1583_v60, %v1580_v59  ;;  %v1047_v59 = vld [vmem:[#allocation8 + $0x8] sm:$0xff] }
 0x34c   :  { %4990 = vmatprep.subr.bf16.mxu1 %v4989_v47 }
 0x34e   :  { %4195 = vmatmul.mubr.msk.f32.vlgmr.msra.gmra.mrb[14].mxu1 %vm1067_vm1, %v1060_v13  ;;  %v4218_v13 = vld [vmem:[%s6703_s7 + $0x80] sm:$0xff] }
 0x34f   :  { %4992 = vmatpush1.bf16.msra.mxu1 %v4991_v39  ;;  %1159 = vmatprep.mubr.f32.mxu1 %v5785_v7 }
 0x350   :  { %4994 = vmatprep.subr.bf16.mxu1 %v4993_v9  ;;  %v1538_v9 = vld [vmem:[#allocation9 + $0x70] sm:$0xff] }
 0x351   :  { %v5079_v14 = vpack.c.bf16 %v1541_v10, %v1538_v9  ;;  %v1050_v10 = vld [vmem:[#allocation8 + $0x20] sm:$0xff] }
 0x352   :  { %4196 = vmatmul.mubr.msk.f32.gmra.mrb[16].mxu1 %vm1067_vm1, %v1061_v20  ;;  %v4219_v20 = vld [vmem:[%s6703_s7 + $0x88] sm:$0xff] }
 0x353   :  { %4996 = vmatpush1.bf16.msra.mxu1 %v4995_v0  ;;  %1165 = vmatprep.mubr.f32.mxu1 %v5785_v7  ;;  %v1532_v0 = vld [vmem:[#allocation9 + $0x40] sm:$0xff] }
 0x354   :  { %v5075_v6 = vpack.c.bf16 %v1535_v1, %v1532_v0  ;;  %v1048_v0 = vld [vmem:[#allocation8 + $0x10] sm:$0xff]  ;;  %v1049_v1 = vld [vmem:[#allocation8 + $0x18] sm:$0xff] }
 0x356   :  { %4197 = vmatmul.mubr.msk.f32.gmra.mrb[18].mxu1 %vm1067_vm1, %v1062_v27  ;;  %v4220_v27 = vld [vmem:[%s6703_s7 + $0x90] sm:$0xff] }
 0x357   :  { %1171 = vmatprep.mubr.f32.mxu1 %v5785_v7 }
 0x35a   :  { %v1023_v30 = vpop.f32.mrb[12].mxu0  ;;  %4198 = vmatmul.mubr.msk.f32.gmra.mrb[20].mxu1 %vm1067_vm1, %v1063_v29  ;;  %v5089_v29 = vpack.c.bf16 %v1607_v26, %v1604_v25  ;;  %v1054_v26 = vld [vmem:[#allocation8 + $0x40] sm:$0xff] }
 0x35b   :  { %v1025_v31 = vpop.f32.mrb[13].mxu0  ;;  %1177 = vmatprep.mubr.f32.mxu1 %v5785_v7 }
 0x35e   :  { %v1029_v33 = vpop.f32.mrb[14].mxu0  ;;  %4199 = vmatmul.mubr.msk.f32.gmra.mrb[22].mxu1 %vm1067_vm1, %v1064_v32  ;;  %v1610_v32 = vld [vmem:[#allocation9 + $0x2b0] sm:$0xff] }
 0x35f   :  { %v4999_v34 = vpack.c.bf16 %v1029_v33, %v1023_v30  ;;  %v1031_v35 = vpop.f32.mrb[15].mxu0  ;;  %1183 = vmatprep.mubr.f32.mxu1 %v5785_v7  ;;  %v1556_v30 = vld [vmem:[#allocation9 + $0x100] sm:$0xff]  ;;  %v1613_v33 = vld [vmem:[#allocation9 + $0x2c8] sm:$0xff] }
 0x360   :  { %v4997_v38 = vpack.c.bf16 %v1031_v35, %v1025_v31  ;;  %v1559_v31 = vld [vmem:[#allocation9 + $0x118] sm:$0xff] }
 0x361   :  { %v5091_v35 = vpack.c.bf16 %v1559_v31, %v1556_v30 }
 0x362   :  { %v1035_v39 = vpop.f32.mrb[16].mxu0  ;;  %4998 = vmatprep.subr.bf16.mxu1 %v4997_v38  ;;  %4200 = vmatmul.mubr.msk.f32.gmra.mrb[24].mxu1 %vm1067_vm1, %v1065_v37  ;;  %v5093_v37 = vpack.c.bf16 %v1613_v33, %v1610_v32  ;;  %v4222_v38 = vld [vmem:[%s6703_s7 + $0xa0] sm:$0xff] }
 0x363   :  { %v1037_v40 = vpop.f32.mrb[17].mxu0  ;;  %1189 = vmatprep.mubr.f32.mxu1 %v5785_v7 }
 0x366   :  { %v1041_v43 = vpop.f32.mrb[18].mxu0  ;;  %4201 = vmatmul.mubr.msk.f32.gmra.mrb[26].mxu1 %vm1067_vm1, %v1066_v41  ;;  %v1562_v41 = vld [vmem:[#allocation9 + $0x130] sm:$0xff] }
 0x367   :  { %v5003_v44 = vpack.c.bf16 %v1041_v43, %v1035_v39  ;;  %v1043_v45 = vpop.f32.mrb[19].mxu0  ;;  %1303 = vmatprep.mubr.f32.mxu1 %v5785_v7  ;;  %v1608_v39 = vld [vmem:[#allocation9 + $0x2a0] sm:$0xff] }
 0x368   :  { %v5001_v47 = vpack.c.bf16 %v1043_v45, %v1037_v40  ;;  %v1611_v40 = vld [vmem:[#allocation9 + $0x2b8] sm:$0xff] }
 0x369   :  { %v5063_v43 = vpack.c.bf16 %v1611_v40, %v1608_v39 }
 0x36a   :  { %4209 = vmatmul.mubr.msk.f32.vlgmr.msra.gmra.mrb[14].mxu1 %vm1067_vm1, %v4202_v46  ;;  %v1615_v46 = vld [vmem:[#allocation9 + $0x2d8] sm:$0xff] }
 0x36b   :  { %5000 = vmatpush1.bf16.msra.mxu1 %v4999_v34  ;;  %1309 = vmatprep.mubr.f32.mxu1 %v5785_v7  ;;  %v4221_v34 = vld [vmem:[%s6703_s7 + $0x98] sm:$0xff] }
 0x36c   :  { %5002 = vmatprep.subr.bf16.mxu1 %v5001_v47  ;;  %5064 = vmatpush1.bf16.msra.mxu0 %v5063_v43  ;;  %v1618_v47 = vld [vmem:[#allocation9 + $0x2f0] sm:$0xff] }
 0x36d   :  { %v5065_v49 = vpack.c.bf16 %v1618_v47, %v1615_v46 }
 0x36e   :  { %4210 = vmatmul.mubr.msk.f32.gmra.mrb[16].mxu1 %vm1067_vm1, %v4203_v50  ;;  %v1619_v50 = vld [vmem:[#allocation9 + $0x2f8] sm:$0xff] }
 0x36f   :  { %5004 = vmatpush1.bf16.msra.mxu1 %v5003_v44  ;;  %1315 = vmatprep.mubr.f32.mxu1 %v5785_v7  ;;  %v1565_v44 = vld [vmem:[#allocation9 + $0x148] sm:$0xff] }
 0x370   :  { %5070 = vmatprep.subr.bf16.mxu1 %v5069_v51  ;;  %v5095_v45 = vpack.c.bf16 %v1565_v44, %v1562_v41  ;;  %v1614_v51 = vld [vmem:[#allocation9 + $0x2d0] sm:$0xff]  ;;  %5066 = vmatprep.subr.bf16.mxu0 %v5065_v49 }
 0x371   :  { %v1058_v44 = vld [vmem:[#allocation8 + $0x60] sm:$0xff] }
 0x372   :  { %4211 = vmatmul.mubr.msk.f32.gmra.mrb[18].mxu1 %vm1067_vm1, %v4204_v52  ;;  %v5097_v52 = vpack.c.bf16 %v1619_v50, %v1616_v48 }
 0x373   :  { %1321 = vmatprep.mubr.f32.mxu1 %v5785_v7 }
 0x376   :  { %4212 = vmatmul.mubr.msk.f32.gmra.mrb[20].mxu1 %vm1067_vm1, %v4205_v53  ;;  %v1617_v53 = vld [vmem:[#allocation9 + $0x2e8] sm:$0xff] }
 0x377   :  { %1327 = vmatprep.mubr.f32.mxu1 %v5785_v7 }
 0x37a   :  { %4213 = vmatmul.mubr.msk.f32.gmra.mrb[22].mxu1 %vm1067_vm1, %v4206_v54  ;;  %v1568_v54 = vld [vmem:[#allocation9 + $0x160] sm:$0xff] }
 0x37b   :  { %1333 = vmatprep.mubr.f32.mxu1 %v5785_v7 }
 0x37e   :  { %4214 = vmatmul.mubr.msk.f32.gmra.mrb[24].mxu1 %vm1067_vm1, %v4207_v55  ;;  %v1571_v55 = vld [vmem:[#allocation9 + $0x178] sm:$0xff] }
 0x37f   :  { %1339 = vmatprep.mubr.f32.mxu1 %v5785_v7  ;;  %v5099_v57 = vpack.c.bf16 %v1571_v55, %v1568_v54  ;;  %v2172_v54 = vld [vmem:[%s6699_s3 + $0x8] sm:$0xff]  ;;  %v2175_v55 = vld [vmem:[%s6699_s3 + $0x20] sm:$0xff] }
 0x382   :  { %4215 = vmatmul.mubr.msk.f32.gmra.mrb[26].mxu1 %vm1067_vm1, %v4208_v56  ;;  %v5067_v56 = vpack.c.bf16 %v1617_v53, %v1614_v51 }
 0x383   :  { %1453 = vmatprep.mubr.f32.mxu1 %v5785_v7 }
 0x384   :  { %5068 = vmatpush1.bf16.msra.mxu0 %v5067_v56  ;;  %v1831_v56 = vld [vmem:[#allocation11] sm:$0xff] }
 0x386   :  { %4223 = vmatmul.mubr.msk.f32.vlgmr.msra.gmra.mrb[14].mxu1 %vm1067_vm1, %v4216_v61 }
 0x387   :  { %1459 = vmatprep.mubr.f32.mxu1 %v5785_v7  ;;  %5072 = vmatpush3.bf16.msra.mxu1 %v5071_v62 }
 0x388   :  { %5074 = vmatprep.subr.bf16.mxu1 %v5073_v63 }
 0x38a   :  { %4224 = vmatmul.mubr.msk.f32.gmra.mrb[16].mxu1 %vm1067_vm1, %v4217_v5 }
 0x38b   :  { %1465 = vmatprep.mubr.f32.mxu1 %v5785_v7  ;;  %5076 = vmatpush3.bf16.msra.mxu1 %v5075_v6 }
 0x38c   :  { %5078 = vmatprep.subr.bf16.mxu1 %v5077_v8 }
 0x38e   :  { %4225 = vmatmul.mubr.msk.f32.gmra.mrb[18].mxu1 %vm1067_vm1, %v4218_v13 }
 0x38f   :  { %1471 = vmatprep.mubr.f32.mxu1 %v5785_v7  ;;  %5080 = vmatpush3.bf16.msra.mxu1 %v5079_v14 }
 0x390   :  { %5082 = vmatprep.subr.bf16.mxu1 %v5081_v15 }
 0x392   :  { %4226 = vmatmul.mubr.msk.f32.gmra.mrb[20].mxu1 %vm1067_vm1, %v4219_v20 }
 0x393   :  { %1477 = vmatprep.mubr.f32.mxu1 %v5785_v7  ;;  %5084 = vmatpush3.bf16.msra.mxu1 %v5083_v21 }
 0x394   :  { %5086 = vmatprep.subr.bf16.mxu1 %v5085_v22 }
 0x396   :  { %4227 = vmatmul.mubr.msk.f32.gmra.mrb[22].mxu1 %vm1067_vm1, %v4220_v27  ;;  %v1055_v27 = vld [vmem:[#allocation8 + $0x48] sm:$0xff] }
 0x397   :  { %1483 = vmatprep.mubr.f32.mxu1 %v5785_v7  ;;  %5088 = vmatpush3.bf16.msra.mxu1 %v5087_v28 }
 0x398   :  { %5090 = vmatprep.subr.bf16.mxu1 %v5089_v29 }
 0x39a   :  { %4228 = vmatmul.mubr.msk.f32.gmra.mrb[24].mxu1 %vm1067_vm1, %v4221_v34  ;;  %v1056_v34 = vld [vmem:[#allocation8 + $0x50] sm:$0xff] }
 0x39b   :  { %1489 = vmatprep.mubr.f32.mxu1 %v5785_v7  ;;  %5092 = vmatpush3.bf16.msra.mxu1 %v5091_v35  ;;  %v1057_v35 = vld [vmem:[#allocation8 + $0x58] sm:$0xff] }
 0x39c   :  { %5094 = vmatprep.subr.bf16.mxu1 %v5093_v37 }
 0x39e   :  { %4229 = vmatmul.mubr.msk.f32.gmra.mrb[26].mxu1 %vm1067_vm1, %v4222_v38 }
 0x39f   :  { %5096 = vmatpush3.bf16.msra.mxu1 %v5095_v45  ;;  %v1059_v45 = vld [vmem:[#allocation8 + $0x68] sm:$0xff] }
 0x3a0   :  { %5098 = vmatprep.subr.bf16.mxu1 %v5097_v52 }
 0x3a3   :  { %5100 = vmatpush3.bf16.msra.mxu1 %v5099_v57  ;;  %v5137_v57 = vpack.c.bf16 %v2175_v55, %v2172_v54 }
 0x3a5   :  { %5138 = vmatprep.subr.bf16.mxu1 %v5137_v57 }
 0x459   :  { %v1455_v60 = vpop.f32.mrb[14].mxu1 }
 0x45a   :  { %v5469_v61 = vadd.f32 %v1455_v60, %v1046_v58  ;;  %v1457_v62 = vpop.f32.mrb[15].mxu1  ;;  %v2171_v58 = vld [vmem:[%s6699_s3] sm:$0xff] }
 0x45b   :  { %v5470_v63 = vadd.f32 %v1457_v62, %v1047_v59  ;;  %v2174_v59 = vld [vmem:[%s6699_s3 + $0x18] sm:$0xff]  ;;  %v2181_v62 = vld [vmem:[%s6699_s3 + $0x50] sm:$0xff] }
 0x45c   :  { %v1510_v5 = vmax.f32 %v5469_v61, 0.0  ;;  %v5139_v60 = vpack.c.bf16 %v2174_v59, %v2171_v58  ;;  %v2178_v61 = vld [vmem:[%s6699_s3 + $0x38] sm:$0xff] }
 0x45d   :  { %v1511_v3 = vmax.f32 %v5470_v63, 0.0  ;;  %v1461_v4 = vpop.f32.mrb[16].mxu1  ;;  %v5141_v63 = vpack.c.bf16 %v2181_v62, %v2178_v61 }
 0x45e   :  { %v5471_v6 = vadd.f32 %v1461_v4, %v1048_v0  ;;  %v1463_v8 = vpop.f32.mrb[17].mxu1  ;;  %v2177_v0 = vld [vmem:[%s6699_s3 + $0x30] sm:$0xff]  ;;  %v2184_v4 = vld [vmem:[%s6699_s3 + $0x68] sm:$0xff] }
 0x45f   :  { %v5472_v9 = vadd.f32 %v1463_v8, %v1049_v1  ;;  %1684 = vmatprep.mubr.f32.mxu0 %v1511_v3  ;;  %1791 = vmatprep.mubr.f32.mxu1 %v1511_v3  ;;  %v2180_v1 = vld [vmem:[%s6699_s3 + $0x48] sm:$0xff]  ;;  %v2183_v8 = vld [vmem:[%s6699_s3 + $0x60] sm:$0xff] }
 0x460   :  { %1685 = vmatmul.mubr.f32.vlgmr.msra.gmra.mrb[20].mxu0 %v1510_v5  ;;  %1792 = vmatmul.mubr.f32.vlgmr.msra.gmra.mrb[28].mxu1 %v1510_v5  ;;  %v1512_v14 = vmax.f32 %v5471_v6, 0.0  ;;  %v5143_v3 = vpack.c.bf16 %v2180_v1, %v2177_v0  ;;  %v2187_v5 = vld [vmem:[%s6699_s3 + $0x80] sm:$0xff] }
 0x461   :  { %v1513_v12 = vmax.f32 %v5472_v9, 0.0  ;;  %v1467_v13 = vpop.f32.mrb[18].mxu1  ;;  %5140 = vmatpush1.bf16.msra.mxu1 %v5139_v60  ;;  %v5145_v6 = vpack.c.bf16 %v2187_v5, %v2184_v4  ;;  %v2186_v9 = vld [vmem:[%s6699_s3 + $0x78] sm:$0xff] }
 0x462   :  { %v5473_v15 = vadd.f32 %v1467_v13, %v1050_v10  ;;  %v1469_v16 = vpop.f32.mrb[19].mxu1  ;;  %5142 = vmatprep.subr.bf16.mxu1 %v5141_v63  ;;  %v5147_v10 = vpack.c.bf16 %v2186_v9, %v2183_v8 }
 0x463   :  { %v5474_v17 = vadd.f32 %v1469_v16, %v1051_v11  ;;  %1690 = vmatprep.mubr.f32.mxu0 %v1513_v12  ;;  %1796 = vmatprep.mubr.f32.mxu1 %v1513_v12  ;;  %v2190_v11 = vld [vmem:[%s6699_s3 + $0x98] sm:$0xff]  ;;  %v2193_v12 = vld [vmem:[%s6699_s3 + $0xb0] sm:$0xff] }
 0x464   :  { %1691 = vmatmul.mubr.f32.gmra.mrb[22].mxu0 %v1512_v14  ;;  %1797 = vmatmul.mubr.f32.gmra.mrb[30].mxu1 %v1512_v14  ;;  %v1514_v22 = vmax.f32 %v5473_v15, 0.0  ;;  %v5149_v13 = vpack.c.bf16 %v2193_v12, %v2190_v11  ;;  %v2189_v14 = vld [vmem:[%s6699_s3 + $0x90] sm:$0xff]  ;;  %v2192_v15 = vld [vmem:[%s6699_s3 + $0xa8] sm:$0xff] }
 0x465   :  { %v1515_v20 = vmax.f32 %v5474_v17, 0.0  ;;  %v1473_v21 = vpop.f32.mrb[20].mxu1  ;;  %5144 = vmatpush1.bf16.msra.mxu1 %v5143_v3  ;;  %v5151_v16 = vpack.c.bf16 %v2192_v15, %v2189_v14  ;;  %v2196_v17 = vld [vmem:[%s6699_s3 + $0xc8] sm:$0xff] }
 0x466   :  { %v5475_v23 = vadd.f32 %v1473_v21, %v1052_v18  ;;  %v1475_v24 = vpop.f32.mrb[21].mxu1  ;;  %5146 = vmatprep.subr.bf16.mxu1 %v5145_v6  ;;  %v2199_v18 = vld [vmem:[%s6699_s3 + $0xe0] sm:$0xff]  ;;  %v2198_v21 = vld [vmem:[%s6699_s3 + $0xd8] sm:$0xff] }
 0x467   :  { %v5476_v25 = vadd.f32 %v1475_v24, %v1053_v19  ;;  %1696 = vmatprep.mubr.f32.mxu0 %v1515_v20  ;;  %1801 = vmatprep.mubr.f32.mxu1 %v1515_v20  ;;  %v5153_v19 = vpack.c.bf16 %v2199_v18, %v2196_v17  ;;  %v2195_v20 = vld [vmem:[%s6699_s3 + $0xc0] sm:$0xff]  ;;  %v2205_v24 = vld [vmem:[%s6699_s3 + $0x110] sm:$0xff] }
 0x468   :  { %1697 = vmatmul.mubr.f32.gmra.mrb[24].mxu0 %v1514_v22  ;;  %1802 = vmatmul.mubr.f32.gmra.mrb[32].mxu1 %v1514_v22  ;;  %v1516_v30 = vmax.f32 %v5475_v23, 0.0  ;;  %v5155_v22 = vpack.c.bf16 %v2198_v21, %v2195_v20  ;;  %v2202_v23 = vld [vmem:[%s6699_s3 + $0xf8] sm:$0xff] }
 0x469   :  { %v1517_v28 = vmax.f32 %v5476_v25, 0.0  ;;  %v1479_v29 = vpop.f32.mrb[22].mxu1  ;;  %5148 = vmatpush1.bf16.msra.mxu1 %v5147_v10  ;;  %v5157_v25 = vpack.c.bf16 %v2205_v24, %v2202_v23 }
 0x46a   :  { %v5477_v31 = vadd.f32 %v1479_v29, %v1054_v26  ;;  %v1481_v32 = vpop.f32.mrb[23].mxu1  ;;  %5150 = vmatprep.subr.bf16.mxu1 %v5149_v13  ;;  %v2201_v26 = vld [vmem:[%s6699_s3 + $0xf0] sm:$0xff]  ;;  %v2208_v29 = vld [vmem:[%s6699_s3 + $0x128] sm:$0xff] }
 0x46b   :  { %v5478_v33 = vadd.f32 %v1481_v32, %v1055_v27  ;;  %1702 = vmatprep.mubr.f32.mxu0 %v1517_v28  ;;  %1806 = vmatprep.mubr.f32.mxu1 %v1517_v28  ;;  %v2204_v27 = vld [vmem:[%s6699_s3 + $0x108] sm:$0xff]  ;;  %v2207_v32 = vld [vmem:[%s6699_s3 + $0x120] sm:$0xff] }
 0x46c   :  { %1703 = vmatmul.mubr.f32.gmra.mrb[26].mxu0 %v1516_v30  ;;  %1807 = vmatmul.mubr.f32.gmra.mrb[34].mxu1 %v1516_v30  ;;  %v1518_v39 = vmax.f32 %v5477_v31, 0.0  ;;  %v5159_v28 = vpack.c.bf16 %v2204_v27, %v2201_v26  ;;  %v2211_v30 = vld [vmem:[%s6699_s3 + $0x140] sm:$0xff] }
 0x46d   :  { %v1519_v37 = vmax.f32 %v5478_v33, 0.0  ;;  %v1485_v38 = vpop.f32.mrb[24].mxu1  ;;  %5152 = vmatpush1.bf16.msra.mxu1 %v5151_v16  ;;  %v5161_v31 = vpack.c.bf16 %v2211_v30, %v2208_v29  ;;  %v2210_v33 = vld [vmem:[%s6699_s3 + $0x138] sm:$0xff] }
 0x46e   :  { %v5479_v40 = vadd.f32 %v1485_v38, %v1056_v34  ;;  %v1487_v41 = vpop.f32.mrb[25].mxu1  ;;  %5154 = vmatprep.subr.bf16.mxu1 %v5153_v19  ;;  %v5163_v34 = vpack.c.bf16 %v2210_v33, %v2207_v32  ;;  %v1832_v32 = vld [vmem:[#allocation11 + $0x8] sm:$0xff]  ;;  %v1833_v33 = vld [vmem:[#allocation11 + $0x10] sm:$0xff] }
 0x46f   :  { %v5480_v43 = vadd.f32 %v1487_v41, %v1057_v35  ;;  %1708 = vmatprep.mubr.f32.mxu0 %v1519_v37  ;;  %1811 = vmatprep.mubr.f32.mxu1 %v1519_v37  ;;  %v2214_v35 = vld [vmem:[%s6699_s3 + $0x158] sm:$0xff]  ;;  %v2217_v37 = vld [vmem:[%s6699_s3 + $0x170] sm:$0xff] }
 0x470   :  { %1709 = vmatmul.mubr.f32.gmra.mrb[28].mxu0 %v1518_v39  ;;  %1812 = vmatmul.mubr.f32.gmra.mrb[36].mxu1 %v1518_v39  ;;  %v1520_v48 = vmax.f32 %v5479_v40, 0.0  ;;  %v5165_v38 = vpack.c.bf16 %v2217_v37, %v2214_v35  ;;  %v2213_v39 = vld [vmem:[%s6699_s3 + $0x150] sm:$0xff]  ;;  %v2216_v40 = vld [vmem:[%s6699_s3 + $0x168] sm:$0xff]  ;;  %v1939_v37 = vld [vmem:[#allocation11 + $0x28] sm:$0xff] }
 0x471   :  { %v1521_v46 = vmax.f32 %v5480_v43, 0.0  ;;  %v1491_v47 = vpop.f32.mrb[26].mxu1  ;;  %5156 = vmatpush1.bf16.msra.mxu1 %v5155_v22  ;;  %v5167_v41 = vpack.c.bf16 %v2216_v40, %v2213_v39  ;;  %v5613_v43 = vld [vmem:[%s6697_s1 + $0x8] sm:$0xff]  ;;  %v1938_v35 = vld [vmem:[#allocation11 + $0x20] sm:$0xff] }
 0x472   :  { %v5481_v49 = vadd.f32 %v1491_v47, %v1058_v44  ;;  %v1493_v50 = vpop.f32.mrb[27].mxu1  ;;  %5158 = vmatprep.subr.bf16.mxu1 %v5157_v25  ;;  %v2160_v44 = vmul.f32 %v5613_v43, %v2158_v36  ;;  %v1941_v39 = vld [vmem:[#allocation11 + $0x38] sm:$0xff]  ;;  %v2044_v40 = vld [vmem:[#allocation11 + $0x40] sm:$0xff] }
 0x473   :  { %v5482_v51 = vadd.f32 %v1493_v50, %v1059_v45  ;;  %1714 = vmatprep.mubr.f32.mxu0 %v1521_v46  ;;  %1816 = vmatprep.mubr.f32.mxu1 %v1521_v46  ;;  %v2169_v45 = vmax.f32 %v6071_v2, 0.0  ;;  %v5614_v46 = vld [vmem:[%s6698_s2 + $0x8] sm:$0xff]  ;;  %v2206_v2 = vld [vmem:[%s6699_s3 + $0x118] sm:$0xff] }
 0x474   :  { %1715 = vmatmul.mubr.f32.gmra.mrb[30].mxu0 %v1520_v48  ;;  %1817 = vmatmul.mubr.f32.gmra.mrb[38].mxu1 %v1520_v48  ;;  %v1522_v53 = vmax.f32 %v5481_v49, 0.0  ;;  %v2162_v47 = vadd.f32 %v5614_v46, %v2160_v44  ;;  %v5615_v48 = vld [vmem:[%s6697_s1 + $0x18] sm:$0xff]  ;;  %v2176_v43 = vld [vmem:[%s6699_s3 + $0x28] sm:$0xff]  ;;  %v2179_v44 = vld [vmem:[%s6699_s3 + $0x40] sm:$0xff] }
 0x475   :  { %v1523_v52 = vmax.f32 %v5482_v51, 0.0  ;;  %5160 = vmatpush1.bf16.msra.mxu1 %v5159_v28  ;;  %v2166_v49 = vmul.f32 %v5615_v48, %v2164_v42  ;;  %v2182_v46 = vld [vmem:[%s6699_s3 + $0x58] sm:$0xff] }
 0x476   :  { %5162 = vmatprep.subr.bf16.mxu1 %v5161_v31  ;;  %v2045_v48 = vld [vmem:[#allocation11 + $0x48] sm:$0xff] }
 0x477   :  { %1720 = vmatprep.mubr.f32.mxu0 %v1523_v52  ;;  %1821 = vmatprep.mubr.f32.mxu1 %v1523_v52  ;;  %v6411_v50 = vadd.f32 %v2166_v49, %v2162_v47  ;;  %v2046_v49 = vld [vmem:[#allocation11 + $0x50] sm:$0xff] }
 0x478   :  { %1721 = vmatmul.mubr.f32.gmra.mrb[32].mxu0 %v1522_v53  ;;  %1822 = vmatmul.mubr.f32.gmra.mrb[40].mxu1 %v1522_v53 }
 0x479   :  { %2283 = vmatprep.mubr.f32.mxu1 %v5785_v7  ;;  %4638 = vmatprep.mubr.msk.f32.mxu0 %vm1835_vm2, %v1831_v56  ;;  %v2170_v36 = vmax.f32 %v6411_v50, 0.0  ;;  %v2376_v50 = vld [vmem:[%s6700_s4 + $0x8] sm:$0xff] }
 0x47a   :  { %5164 = vmatpush1.bf16.msra.mxu1 %v5163_v34  ;;  %v1834_v34 = vld [vmem:[#allocation11 + $0x18] sm:$0xff] }
 0x47b   :  { %5166 = vmatprep.subr.bf16.mxu1 %v5165_v38  ;;  %v1940_v38 = vld [vmem:[#allocation11 + $0x30] sm:$0xff] }
 0x47e   :  { %5168 = vmatpush1.bf16.msra.mxu1 %v5167_v41  ;;  %v2173_v41 = vld [vmem:[%s6699_s3 + $0x10] sm:$0xff] }
 0x47f   :  { %v5169_v47 = vpack.c.bf16 %v2176_v43, %v2173_v41  ;;  %v2732_v41 = vld [vmem:[#allocation6 + $0x130] sm:$0xff]  ;;  %v2738_v43 = vld [vmem:[#allocation6 + $0x160] sm:$0xff] }
 0x481   :  { %2284 = vmatmul.mubr.f32.vlgmr.msra.gmra.mrb[42].mxu1 %v2169_v45 }
 0x482   :  { %2289 = vmatprep.mubr.f32.mxu1 %v5785_v7 }
 0x485   :  { %2290 = vmatmul.mubr.f32.gmra.mrb[44].mxu1 %v2170_v36 }
 0x533   :  { %v1686_v51 = vpop.f32.mrb[20].mxu0  ;;  %v4383_v52 = vpop.f32.mrb[28].mxu1 }
 0x534   :  { %v1688_v53 = vpop.f32.mrb[21].mxu0  ;;  %v4384_v54 = vpop.f32.mrb[29].mxu1 }
 0x535   :  { %v4385_v55 = vadd.f32 %v4384_v54, %v4383_v52  ;;  %v2185_v52 = vld [vmem:[%s6699_s3 + $0x70] sm:$0xff]  ;;  %v2047_v54 = vld [vmem:[#allocation11 + $0x58] sm:$0xff] }
 0x537   :  { %v1692_v56 = vpop.f32.mrb[22].mxu0  ;;  %v4386_v57 = vpop.f32.mrb[30].mxu1 }
 0x538   :  { %v5101_v42 = vpack.c.bf16 %v1692_v56, %v1686_v51  ;;  %v1694_v58 = vpop.f32.mrb[23].mxu0  ;;  %v4387_v59 = vpop.f32.mrb[31].mxu1  ;;  %v5173_v51 = vpack.c.bf16 %v2182_v46, %v2179_v44  ;;  %v2191_v56 = vld [vmem:[%s6699_s3 + $0xa0] sm:$0xff]  ;;  %v5259_v44 = vpack.c.bf16 %v2738_v43, %v2732_v41  ;;  %v2745_v46 = vld [vmem:[#allocation6 + $0x198] sm:$0xff] }
 0x539   :  { %v5113_v60 = vpack.c.bf16 %v1694_v58, %v1688_v53  ;;  %v4388_v61 = vadd.f32 %v4387_v59, %v4386_v57  ;;  %v2188_v53 = vld [vmem:[%s6699_s3 + $0x88] sm:$0xff]  ;;  %v2194_v57 = vld [vmem:[%s6699_s3 + $0xb8] sm:$0xff]  ;;  %v2197_v58 = vld [vmem:[%s6699_s3 + $0xd0] sm:$0xff] }
 0x53a   :  { %5102 = vmatprep.subr.bf16.mxu0 %v5101_v42  ;;  %v2200_v59 = vld [vmem:[%s6699_s3 + $0xe8] sm:$0xff]  ;;  %v2730_v43 = vld [vmem:[#allocation6 + $0x120] sm:$0xff] }
 0x53b   :  { %v5125_v62 = vpack.c.bf16 %v4388_v61, %v4385_v55  ;;  %v1698_v63 = vpop.f32.mrb[24].mxu0  ;;  %v4389_v0 = vpop.f32.mrb[32].mxu1  ;;  %5104 = vmatpush3.bf16.msra.mxu0 %v5101_v42  ;;  %v5177_v55 = vpack.c.bf16 %v2188_v53, %v2185_v52  ;;  %v5181_v42 = vpack.c.bf16 %v2194_v57, %v2191_v56  ;;  %v2203_v61 = vld [vmem:[%s6699_s3 + $0x100] sm:$0xff]  ;;  %v2757_v53 = vld [vmem:[#allocation6 + $0x1f8] sm:$0xff]  ;;  %v2756_v56 = vld [vmem:[#allocation6 + $0x1f0] sm:$0xff] }
 0x53c   :  { %v1700_v1 = vpop.f32.mrb[25].mxu0  ;;  %v4390_v3 = vpop.f32.mrb[33].mxu1  ;;  %v2762_v57 = vld [vmem:[#allocation6 + $0x220] sm:$0xff] }
 0x53d   :  { %v4391_v4 = vadd.f32 %v4390_v3, %v4389_v0  ;;  %v2218_v3 = vld [vmem:[%s6699_s3 + $0x178] sm:$0xff] }
 0x53f   :  { %v1704_v5 = vpop.f32.mrb[26].mxu0  ;;  %v4392_v6 = vpop.f32.mrb[34].mxu1 }
 0x540   :  { %v5105_v8 = vpack.c.bf16 %v1704_v5, %v1698_v63  ;;  %v1706_v9 = vpop.f32.mrb[27].mxu0  ;;  %v4393_v10 = vpop.f32.mrb[35].mxu1  ;;  %v2212_v63 = vld [vmem:[%s6699_s3 + $0x148] sm:$0xff] }
 0x541   :  { %v5117_v11 = vpack.c.bf16 %v1706_v9, %v1700_v1  ;;  %v4394_v12 = vadd.f32 %v4393_v10, %v4392_v6  ;;  %v2215_v1 = vld [vmem:[%s6699_s3 + $0x160] sm:$0xff] }
 0x542   :  { %5106 = vmatprep.subr.bf16.mxu0 %v5105_v8  ;;  %v2375_v9 = vld [vmem:[%s6700_s4] sm:$0xff] }
 0x543   :  { %v5129_v13 = vpack.c.bf16 %v4394_v12, %v4391_v4  ;;  %v1710_v14 = vpop.f32.mrb[28].mxu0  ;;  %v4395_v15 = vpop.f32.mrb[36].mxu1  ;;  %5108 = vmatpush3.bf16.msra.mxu0 %v5105_v8  ;;  %v5197_v4 = vpack.c.bf16 %v2218_v3, %v2215_v1  ;;  %4723 = vmatprep.mubr.msk.f32.mxu1 %vm365_vm0, %v2375_v9 }
 0x544   :  { %v1712_v16 = vpop.f32.mrb[29].mxu0  ;;  %v4396_v17 = vpop.f32.mrb[37].mxu1 }
 0x545   :  { %v4397_v18 = vadd.f32 %v4396_v17, %v4395_v15  ;;  %v4249_v15 = vld [vmem:[%s6700_s4 + $0x28] sm:$0xff]  ;;  %v4251_v17 = vld [vmem:[%s6700_s4 + $0x38] sm:$0xff] }
 0x547   :  { %v1716_v19 = vpop.f32.mrb[30].mxu0  ;;  %v4398_v20 = vpop.f32.mrb[38].mxu1 }
 0x548   :  { %v5109_v21 = vpack.c.bf16 %v1716_v19, %v1710_v14  ;;  %v1718_v22 = vpop.f32.mrb[31].mxu0  ;;  %v4399_v23 = vpop.f32.mrb[39].mxu1  ;;  %v4248_v14 = vld [vmem:[%s6700_s4 + $0x20] sm:$0xff]  ;;  %v2697_v19 = vld [vmem:[#allocation6 + $0x18] sm:$0xff] }
 0x549   :  { %v5121_v24 = vpack.c.bf16 %v1718_v22, %v1712_v16  ;;  %v4400_v25 = vadd.f32 %v4399_v23, %v4398_v20  ;;  %v4250_v16 = vld [vmem:[%s6700_s4 + $0x30] sm:$0xff]  ;;  %v2703_v20 = vld [vmem:[#allocation6 + $0x48] sm:$0xff]  ;;  %v2702_v23 = vld [vmem:[#allocation6 + $0x40] sm:$0xff] }
 0x54a   :  { %5110 = vmatprep.subr.bf16.mxu0 %v5109_v21  ;;  %v2696_v22 = vld [vmem:[#allocation6 + $0x10] sm:$0xff] }
 0x54b   :  { %v5133_v26 = vpack.c.bf16 %v4400_v25, %v4397_v18  ;;  %v1722_v27 = vpop.f32.mrb[32].mxu0  ;;  %v4401_v28 = vpop.f32.mrb[40].mxu1  ;;  %5112 = vmatpush3.bf16.msra.mxu0 %v5109_v21  ;;  %v4256_v18 = vld [vmem:[%s6700_s4 + $0x40] sm:$0xff]  ;;  %v5245_v21 = vpack.c.bf16 %v2703_v20, %v2697_v19  ;;  %v2709_v25 = vld [vmem:[#allocation6 + $0x78] sm:$0xff] }
 0x54c   :  { %v1724_v29 = vpop.f32.mrb[33].mxu0  ;;  %v4402_v30 = vpop.f32.mrb[41].mxu1  ;;  %4636 = vmatprep.subr.mxu0 %v1722_v27  ;;  %v2694_v20 = vld [vmem:[#allocation6] sm:$0xff] }
 0x54d   :  { %v4403_v31 = vadd.f32 %v4402_v30, %v4401_v28 }
 0x54f   :  { %4637 = vmatpush3.msra.mxu0 %v1722_v27  ;;  %v2708_v27 = vld [vmem:[#allocation6 + $0x70] sm:$0xff] }
 0x550   :  { %5114 = vmatprep.subr.bf16.mxu0 %v5113_v60  ;;  %4639 = vmatmul.mubr.msk.f32.vlgmr.msra.gmra.mrb[34].mxu0 %vm1835_vm2, %v1832_v32  ;;  %v2727_v32 = vld [vmem:[#allocation6 + $0x108] sm:$0xff] }
 0x551   :  { %5116 = vmatpush3.bf16.msra.mxu0 %v5113_v60  ;;  %4641 = vmatprep.mubr.msk.f32.mxu0 %vm1835_vm2, %v1833_v33  ;;  %v5185_v60 = vpack.c.bf16 %v2200_v59, %v2197_v58  ;;  %v2720_v33 = vld [vmem:[#allocation6 + $0xd0] sm:$0xff]  ;;  %v2769_v58 = vld [vmem:[#allocation6 + $0x258] sm:$0xff]  ;;  %v2775_v59 = vld [vmem:[#allocation6 + $0x288] sm:$0xff] }
 0x552   :  { %5118 = vmatprep.subr.bf16.mxu0 %v5117_v11 }
 0x554   :  { %4642 = vmatmul.mubr.msk.f32.gmra.mrb[36].mxu0 %vm1835_vm2, %v1834_v34  ;;  %v2285_v5 = vpop.f32.mrb[42].mxu1  ;;  %v2726_v34 = vld [vmem:[#allocation6 + $0x100] sm:$0xff] }
 0x555   :  { %5120 = vmatpush3.bf16.msra.mxu0 %v5117_v11  ;;  %4658 = vmatprep.mubr.msk.f32.mxu0 %vm1835_vm2, %v1938_v35  ;;  %v2287_v6 = vpop.f32.mrb[43].mxu1 }
 0x556   :  { %5122 = vmatprep.subr.bf16.mxu0 %v5121_v24 }
 0x558   :  { %v2291_v8 = vpop.f32.mrb[44].mxu1 }
 0x559   :  { %5124 = vmatpush3.bf16.msra.mxu0 %v5121_v24  ;;  %v5201_v10 = vpack.c.bf16 %v2291_v8, %v2285_v5  ;;  %v2293_v11 = vpop.f32.mrb[45].mxu1  ;;  %v5247_v24 = vpack.c.bf16 %v2702_v23, %v2696_v22  ;;  %v1830_v5 = vld [vmem:[#allocation12 + $0x18] sm:$0xff]  ;;  %v1829_v8 = vld [vmem:[#allocation12 + $0x10] sm:$0xff]  ;;  %v2713_v23 = vld [vmem:[#allocation6 + $0x98] sm:$0xff] }
 0x55a   :  { %4656 = vmatprep.subr.mxu0 %v1724_v29  ;;  %v5205_v12 = vpack.c.bf16 %v2293_v11, %v2287_v6  ;;  %v2707_v22 = vld [vmem:[#allocation6 + $0x68] sm:$0xff] }
 0x55b   :  { %5202 = vmatprep.subr.bf16.mxu1 %v5201_v10 }
 0x55c   :  { %5204 = vmatpush3.bf16.msra.mxu1 %v5201_v10 }
 0x55d   :  { %4657 = vmatpush3.msra.mxu0 %v1724_v29  ;;  %5206 = vmatprep.subr.bf16.mxu1 %v5205_v12  ;;  %v2714_v29 = vld [vmem:[#allocation6 + $0xa0] sm:$0xff] }
 0x55e   :  { %5126 = vmatprep.subr.bf16.mxu0 %v5125_v62  ;;  %4659 = vmatmul.mubr.msk.f32.vlgmr.msra.gmra.mrb[34].mxu0 %vm1835_vm2, %v1939_v37  ;;  %v5251_v30 = vpack.c.bf16 %v2714_v29, %v2708_v27  ;;  %v5255_v37 = vpack.c.bf16 %v2726_v34, %v2720_v33  ;;  %v5217_v27 = vpack.c.bf16 %v2713_v23, %v2707_v22  ;;  %v2712_v29 = vld [vmem:[#allocation6 + $0x90] sm:$0xff] }
 0x55f   :  { %5128 = vmatpush3.bf16.msra.mxu0 %v5125_v62  ;;  %4661 = vmatprep.mubr.msk.f32.mxu0 %vm1835_vm2, %v1940_v38  ;;  %v2209_v62 = vld [vmem:[%s6699_s3 + $0x130] sm:$0xff]  ;;  %v2733_v38 = vld [vmem:[#allocation6 + $0x138] sm:$0xff] }
 0x560   :  { %5130 = vmatprep.subr.bf16.mxu0 %v5129_v13  ;;  %v5193_v0 = vpack.c.bf16 %v2212_v63, %v2209_v62  ;;  %4724 = vmatmul.mubr.msk.f32.vlgmr.msra.gmra.mrb[46].mxu1 %vm365_vm0, %v2376_v50  ;;  %v1828_v62 = vld [vmem:[#allocation12 + $0x8] sm:$0xff]  ;;  %v1827_v63 = vld [vmem:[#allocation12] sm:$0xff] }
 0x561   :  { %5208 = vmatpush3.bf16.msra.mxu1 %v5205_v12 }
 0x562   :  { %4662 = vmatmul.mubr.msk.f32.gmra.mrb[36].mxu0 %vm1835_vm2, %v1941_v39  ;;  %v2739_v39 = vld [vmem:[#allocation6 + $0x168] sm:$0xff] }
 0x563   :  { %5132 = vmatpush3.bf16.msra.mxu0 %v5129_v13  ;;  %4678 = vmatprep.mubr.msk.f32.mxu0 %vm1835_vm2, %v2044_v40  ;;  %v2378_v13 = vld [vmem:[%s6700_s4 + $0x18] sm:$0xff]  ;;  %v5257_v40 = vpack.c.bf16 %v2739_v39, %v2733_v38  ;;  %v2731_v38 = vld [vmem:[#allocation6 + $0x128] sm:$0xff] }
 0x564   :  { %5134 = vmatprep.subr.bf16.mxu0 %v5133_v26  ;;  %v2737_v39 = vld [vmem:[#allocation6 + $0x158] sm:$0xff] }
 0x565   :  { %v5225_v41 = vpack.c.bf16 %v2737_v39, %v2731_v38  ;;  %v2722_v39 = vld [vmem:[#allocation6 + $0xe0] sm:$0xff] }
 0x567   :  { %5136 = vmatpush3.bf16.msra.mxu0 %v5133_v26  ;;  %v2715_v26 = vld [vmem:[#allocation6 + $0xa8] sm:$0xff] }
 0x568   :  { %4676 = vmatprep.subr.mxu0 %v4403_v31  ;;  %v5249_v28 = vpack.c.bf16 %v2715_v26, %v2709_v25  ;;  %v4258_v26 = vld [vmem:[%s6700_s4 + $0x50] sm:$0xff] }
 0x56b   :  { %4677 = vmatpush3.msra.mxu0 %v4403_v31  ;;  %v2721_v31 = vld [vmem:[#allocation6 + $0xd8] sm:$0xff] }
 0x56c   :  { %4679 = vmatmul.mubr.msk.f32.vlgmr.msra.gmra.mrb[34].mxu0 %vm1835_vm2, %v2045_v48  ;;  %5170 = vmatprep.subr.bf16.mxu0 %v5169_v47  ;;  %v5253_v35 = vpack.c.bf16 %v2727_v32, %v2721_v31  ;;  %v2725_v31 = vld [vmem:[#allocation6 + $0xf8] sm:$0xff] }
 0x56d   :  { %5172 = vmatpush3.bf16.msra.mxu0 %v5169_v47  ;;  %4681 = vmatprep.mubr.msk.f32.mxu0 %vm1835_vm2, %v2046_v49  ;;  %v2751_v47 = vld [vmem:[#allocation6 + $0x1c8] sm:$0xff]  ;;  %v2744_v49 = vld [vmem:[#allocation6 + $0x190] sm:$0xff]  ;;  %v4259_v32 = vld [vmem:[%s6700_s4 + $0x58] sm:$0xff] }
 0x56e   :  { %5174 = vmatprep.subr.bf16.mxu0 %v5173_v51  ;;  %v5261_v48 = vpack.c.bf16 %v2751_v47, %v2745_v46  ;;  %v2743_v46 = vld [vmem:[#allocation6 + $0x188] sm:$0xff]  ;;  %v2749_v47 = vld [vmem:[#allocation6 + $0x1b8] sm:$0xff] }
 0x570   :  { %4682 = vmatmul.mubr.msk.f32.gmra.mrb[36].mxu0 %vm1835_vm2, %v2047_v54  ;;  %v2763_v54 = vld [vmem:[#allocation6 + $0x228] sm:$0xff] }
 0x571   :  { %5176 = vmatpush3.bf16.msra.mxu0 %v5173_v51  ;;  %4716 = vmatprep.mubr.f32.mxu0 %v2169_v45  ;;  %v5189_v45 = vpack.c.bf16 %v2206_v2, %v2203_v61  ;;  %v2750_v51 = vld [vmem:[#allocation6 + $0x1c0] sm:$0xff]  ;;  %v2768_v61 = vld [vmem:[#allocation6 + $0x250] sm:$0xff] }
 0x572   :  { %5178 = vmatprep.subr.bf16.mxu0 %v5177_v55  ;;  %v5263_v52 = vpack.c.bf16 %v2750_v51, %v2744_v49  ;;  %v2774_v2 = vld [vmem:[#allocation6 + $0x280] sm:$0xff]  ;;  %v5229_v49 = vpack.c.bf16 %v2749_v47, %v2743_v46 }
 0x573   :  { %v2742_v51 = vld [vmem:[#allocation6 + $0x180] sm:$0xff] }
 0x575   :  { %5180 = vmatpush3.bf16.msra.mxu0 %v5177_v55  ;;  %v5265_v55 = vpack.c.bf16 %v2763_v54, %v2757_v53  ;;  %v2755_v53 = vld [vmem:[#allocation6 + $0x1e8] sm:$0xff]  ;;  %v2761_v54 = vld [vmem:[#allocation6 + $0x218] sm:$0xff] }
 0x576   :  { %5182 = vmatprep.subr.bf16.mxu0 %v5181_v42 }
 0x579   :  { %5184 = vmatpush3.bf16.msra.mxu0 %v5181_v42  ;;  %v5267_v42 = vpack.c.bf16 %v2762_v57, %v2756_v56  ;;  %v5233_v56 = vpack.c.bf16 %v2761_v54, %v2755_v53  ;;  %v2754_v57 = vld [vmem:[#allocation6 + $0x1e0] sm:$0xff]  ;;  %v2747_v53 = vld [vmem:[#allocation6 + $0x1a8] sm:$0xff]  ;;  %v2753_v54 = vld [vmem:[#allocation6 + $0x1d8] sm:$0xff] }
 0x57a   :  { %5186 = vmatprep.subr.bf16.mxu0 %v5185_v60 }
 0x57d   :  { %5188 = vmatpush3.bf16.msra.mxu0 %v5185_v60  ;;  %v5269_v60 = vpack.c.bf16 %v2775_v59, %v2769_v58  ;;  %v2767_v58 = vld [vmem:[#allocation6 + $0x248] sm:$0xff]  ;;  %v2773_v59 = vld [vmem:[#allocation6 + $0x278] sm:$0xff] }
 0x57e   :  { %5190 = vmatprep.subr.bf16.mxu0 %v5189_v45 }
 0x581   :  { %5192 = vmatpush3.bf16.msra.mxu0 %v5189_v45  ;;  %v5271_v45 = vpack.c.bf16 %v2774_v2, %v2768_v61  ;;  %v5237_v61 = vpack.c.bf16 %v2773_v59, %v2767_v58  ;;  %v2766_v2 = vld [vmem:[#allocation6 + $0x240] sm:$0xff]  ;;  %v2752_v58 = vld [vmem:[#allocation6 + $0x1d0] sm:$0xff]  ;;  %v2759_v59 = vld [vmem:[#allocation6 + $0x208] sm:$0xff] }
 0x582   :  { %5194 = vmatprep.subr.bf16.mxu0 %v5193_v0 }
 0x585   :  { %5196 = vmatpush3.bf16.msra.mxu0 %v5193_v0 }
 0x586   :  { %5198 = vmatprep.subr.bf16.mxu0 %v5197_v4 }
 0x589   :  { %5200 = vmatpush3.bf16.msra.mxu0 %v5197_v4 }
 0x58a   :  { %5246 = vmatprep.subr.bf16.mxu0 %v5245_v21  ;;  %v2700_v21 = vld [vmem:[#allocation6 + $0x30] sm:$0xff] }
 0x58b   :  { %v5215_v25 = vpack.c.bf16 %v2700_v21, %v2694_v20  ;;  %v2711_v20 = vld [vmem:[#allocation6 + $0x88] sm:$0xff]  ;;  %v2717_v21 = vld [vmem:[#allocation6 + $0xb8] sm:$0xff] }
 0x58c   :  { %4717 = vmatmul.mubr.f32.vlgmr.msra.gmra.mrb[38].mxu0 %v2170_v36  ;;  %v2377_v36 = vld [vmem:[%s6700_s4 + $0x10] sm:$0xff] }
 0x58d   :  { %2943 = vmatprep.mubr.f32.mxu0 %v5785_v7  ;;  %4726 = vmatprep.mubr.msk.f32.mxu1 %vm365_vm0, %v2377_v36 }
 0x58e   :  { %4727 = vmatmul.mubr.msk.f32.gmra.mrb[48].mxu1 %vm365_vm0, %v2378_v13  ;;  %5248 = vmatpush1.bf16.msra.mxu0 %v5247_v24  ;;  %v4257_v24 = vld [vmem:[%s6700_s4 + $0x48] sm:$0xff] }
 0x58f   :  { %4733 = vmatprep.mubr.msk.f32.mxu1 %vm365_vm0, %v4248_v14  ;;  %5250 = vmatprep.subr.bf16.mxu0 %v5249_v28  ;;  %v2695_v14 = vld [vmem:[#allocation6 + $0x8] sm:$0xff]  ;;  %v2706_v28 = vld [vmem:[#allocation6 + $0x60] sm:$0xff] }
 0x590   :  { %v5219_v33 = vpack.c.bf16 %v2712_v29, %v2706_v28  ;;  %v2710_v28 = vld [vmem:[#allocation6 + $0x80] sm:$0xff]  ;;  %v2716_v29 = vld [vmem:[#allocation6 + $0xb0] sm:$0xff] }
 0x592   :  { %4734 = vmatmul.mubr.msk.f32.vlgmr.msra.gmra.mrb[46].mxu1 %vm365_vm0, %v4249_v15  ;;  %5252 = vmatpush1.bf16.msra.mxu0 %v5251_v30  ;;  %v2701_v15 = vld [vmem:[#allocation6 + $0x38] sm:$0xff]  ;;  %v2719_v30 = vld [vmem:[#allocation6 + $0xc8] sm:$0xff] }
 0x593   :  { %4736 = vmatprep.mubr.msk.f32.mxu1 %vm365_vm0, %v4250_v16  ;;  %5254 = vmatprep.subr.bf16.mxu0 %v5253_v35  ;;  %v5213_v19 = vpack.c.bf16 %v2701_v15, %v2695_v14  ;;  %v5221_v34 = vpack.c.bf16 %v2725_v31, %v2719_v30  ;;  %v2718_v35 = vld [vmem:[#allocation6 + $0xc0] sm:$0xff]  ;;  %v2373_v30 = vld [vmem:[#allocation5 + $0x10] sm:$0xff] }
 0x594   :  { %v2371_v14 = vld [vmem:[#allocation5] sm:$0xff] }
 0x596   :  { %4737 = vmatmul.mubr.msk.f32.gmra.mrb[48].mxu1 %vm365_vm0, %v4251_v17  ;;  %5256 = vmatpush1.bf16.msra.mxu0 %v5255_v37  ;;  %v2724_v37 = vld [vmem:[#allocation6 + $0xf0] sm:$0xff] }
 0x597   :  { %4743 = vmatprep.mubr.msk.f32.mxu1 %vm365_vm0, %v4256_v18  ;;  %5258 = vmatprep.subr.bf16.mxu0 %v5257_v40  ;;  %v5223_v40 = vpack.c.bf16 %v2724_v37, %v2718_v35 }
 0x59a   :  { %5260 = vmatpush1.bf16.msra.mxu0 %v5259_v44  ;;  %v2736_v44 = vld [vmem:[#allocation6 + $0x150] sm:$0xff] }
 0x59b   :  { %5262 = vmatprep.subr.bf16.mxu0 %v5261_v48  ;;  %v5227_v48 = vpack.c.bf16 %v2736_v44, %v2730_v43  ;;  %v2735_v43 = vld [vmem:[#allocation6 + $0x148] sm:$0xff]  ;;  %v2741_v44 = vld [vmem:[#allocation6 + $0x178] sm:$0xff] }
 0x59e   :  { %5264 = vmatpush1.bf16.msra.mxu0 %v5263_v52  ;;  %v2748_v52 = vld [vmem:[#allocation6 + $0x1b0] sm:$0xff] }
 0x59f   :  { %5266 = vmatprep.subr.bf16.mxu0 %v5265_v55  ;;  %v5231_v55 = vpack.c.bf16 %v2748_v52, %v2742_v51  ;;  %v2734_v51 = vld [vmem:[#allocation6 + $0x140] sm:$0xff]  ;;  %v2740_v52 = vld [vmem:[#allocation6 + $0x170] sm:$0xff] }
 0x5a2   :  { %5268 = vmatpush1.bf16.msra.mxu0 %v5267_v42  ;;  %v2760_v42 = vld [vmem:[#allocation6 + $0x210] sm:$0xff] }
 0x5a3   :  { %5270 = vmatprep.subr.bf16.mxu0 %v5269_v60  ;;  %v5235_v60 = vpack.c.bf16 %v2760_v42, %v2754_v57  ;;  %v5293_v57 = vpack.c.bf16 %v2753_v54, %v2747_v53  ;;  %v2746_v42 = vld [vmem:[#allocation6 + $0x1a0] sm:$0xff] }
 0x5a6   :  { %5272 = vmatpush1.bf16.msra.mxu0 %v5271_v45  ;;  %v2772_v45 = vld [vmem:[#allocation6 + $0x270] sm:$0xff] }
 0x63f   :  { %v4680_v0 = vpop.f32.mrb[34].mxu0 }
 0x640   :  { %v5483_v1 = vadd.f32 %v4680_v0, %v1828_v62  ;;  %v2126_v3 = vpop.f32.mrb[35].mxu0  ;;  %v5239_v62 = vpack.c.bf16 %v2772_v45, %v2766_v2  ;;  %v2785_v0 = vld [vmem:[#allocation6 + $0x2d8] sm:$0xff]  ;;  %v2758_v45 = vld [vmem:[#allocation6 + $0x200] sm:$0xff] }
 0x641   :  { %v5484_v4 = vadd.f32 %v2126_v3, %v1827_v63  ;;  %v2779_v63 = vld [vmem:[#allocation6 + $0x2a8] sm:$0xff]  ;;  %v2778_v3 = vld [vmem:[#allocation6 + $0x2a0] sm:$0xff] }
 0x642   :  { %v2150_v6 = vmax.f32 %v5483_v1, 0.0  ;;  %v5241_v1 = vpack.c.bf16 %v2785_v0, %v2779_v63  ;;  %v2771_v63 = vld [vmem:[#allocation6 + $0x268] sm:$0xff]  ;;  %v2777_v0 = vld [vmem:[#allocation6 + $0x298] sm:$0xff] }
 0x643   :  { %v2149_v9 = vmax.f32 %v5484_v4, 0.0  ;;  %v4683_v10 = vpop.f32.mrb[36].mxu0  ;;  %v2784_v4 = vld [vmem:[#allocation6 + $0x2d0] sm:$0xff] }
 0x644   :  { %2154 = vst [vmem:[%s6708_s12 + $0x8] sm:$0xff] %v2150_v6  ;;  %v5485_v11 = vadd.f32 %v4683_v10, %v1830_v5  ;;  %v2136_v12 = vpop.f32.mrb[37].mxu0  ;;  %v2781_v5 = vld [vmem:[#allocation6 + $0x2b8] sm:$0xff]  ;;  %v5243_v6 = vpack.c.bf16 %v2784_v4, %v2778_v3  ;;  %v2786_v10 = vld [vmem:[#allocation6 + $0x2e0] sm:$0xff]  ;;  %v5301_v3 = vpack.c.bf16 %v2777_v0, %v2771_v63 }
 0x645   :  { %2153 = vst [vmem:[%s6708_s12] sm:$0xff] %v2149_v9  ;;  %v5486_v50 = vadd.f32 %v2136_v12, %v1829_v8  ;;  %v2787_v8 = vld [vmem:[#allocation6 + $0x2e8] sm:$0xff]  ;;  %v2780_v9 = vld [vmem:[#allocation6 + $0x2b0] sm:$0xff]  ;;  %v2770_v4 = vld [vmem:[#allocation6 + $0x260] sm:$0xff] }
 0x646   :  { %v2152_v36 = vmax.f32 %v5485_v11, 0.0  ;;  %v5273_v11 = vpack.c.bf16 %v2787_v8, %v2781_v5  ;;  %v5275_v12 = vpack.c.bf16 %v2786_v10, %v2780_v9  ;;  %v2776_v5 = vld [vmem:[#allocation6 + $0x290] sm:$0xff]  ;;  %v2789_v8 = vld [vmem:[#allocation6 + $0x2f8] sm:$0xff] }
 0x647   :  { %v2151_v13 = vmax.f32 %v5486_v50, 0.0  ;;  %v2699_v50 = vld [vmem:[#allocation6 + $0x28] sm:$0xff]  ;;  %v5303_v9 = vpack.c.bf16 %v2776_v5, %v2770_v4  ;;  %v3580_v5 = vld [vmem:[#allocation9 + $0x180] sm:$0xff] }
 0x648   :  { %2156 = vst [vmem:[%s6708_s12 + $0x18] sm:$0xff] %v2152_v36  ;;  %v2705_v36 = vld [vmem:[#allocation6 + $0x58] sm:$0xff]  ;;  %5274 = vmatprep.subr.bf16.mxu0 %v5273_v11  ;;  %v2782_v11 = vld [vmem:[#allocation6 + $0x2c0] sm:$0xff] }
 0x649   :  { %2155 = vst [vmem:[%s6708_s12 + $0x10] sm:$0xff] %v2151_v13  ;;  %v5277_v13 = vpack.c.bf16 %v2705_v36, %v2699_v50  ;;  %5276 = vmatpush1.bf16.msra.mxu0 %v5275_v12  ;;  %v2788_v12 = vld [vmem:[#allocation6 + $0x2f0] sm:$0xff]  ;;  %v3533_v36 = vld [vmem:[#allocation9 + $0x8] sm:$0xff] }
 0x64a   :  { %v5307_v50 = vpack.c.bf16 %v2788_v12, %v2782_v11 }
 0x65f   :  { %v4718_v16 = vpop.f32.mrb[38].mxu0 }
 0x660   :  { %v2362_v17 = vpop.f32.mrb[39].mxu0 }
 0x661   :  { %v5209_v18 = vpack.c.bf16 %v4718_v16, %v2362_v17  ;;  %v2698_v16 = vld [vmem:[#allocation6 + $0x20] sm:$0xff]  ;;  %v2704_v17 = vld [vmem:[#allocation6 + $0x50] sm:$0xff] }
 0x662   :  { %v5279_v23 = vpack.c.bf16 %v2704_v17, %v2698_v16  ;;  %v3535_v16 = vld [vmem:[#allocation9 + $0x18] sm:$0xff] }
 0x663   :  { %5210 = vmatprep.subr.bf16.mxu1 %v5209_v18  ;;  %v3539_v17 = vld [vmem:[#allocation9 + $0x38] sm:$0xff] }
 0x664   :  { %5212 = vmatpush3.bf16.msra.mxu1 %v5209_v18  ;;  %v2372_v18 = vld [vmem:[#allocation5 + $0x8] sm:$0xff] }
 0x665   :  { %5214 = vmatprep.subr.bf16.mxu1 %v5213_v19 }
 0x667   :  { %4744 = vmatmul.mubr.msk.f32.vlgmr.msra.gmra.mrb[46].mxu1 %vm365_vm0, %v4257_v24 }
 0x668   :  { %4746 = vmatprep.mubr.msk.f32.mxu1 %vm365_vm0, %v4258_v26  ;;  %5216 = vmatpush1.bf16.msra.mxu1 %v5215_v25 }
 0x669   :  { %5218 = vmatprep.subr.bf16.mxu1 %v5217_v27  ;;  %v5281_v27 = vpack.c.bf16 %v2717_v21, %v2711_v20  ;;  %v3538_v21 = vld [vmem:[#allocation9 + $0x30] sm:$0xff] }
 0x66b   :  { %4747 = vmatmul.mubr.msk.f32.gmra.mrb[48].mxu1 %vm365_vm0, %v4259_v32  ;;  %v2723_v32 = vld [vmem:[#allocation6 + $0xe8] sm:$0xff] }
 0x66c   :  { %5220 = vmatpush1.bf16.msra.mxu1 %v5219_v33  ;;  %2854 = vmatprep.mubr.f32.mxu1 %v5785_v7  ;;  %v2729_v33 = vld [vmem:[#allocation6 + $0x118] sm:$0xff] }
 0x66d   :  { %5222 = vmatprep.subr.bf16.mxu1 %v5221_v34  ;;  %v5283_v34 = vpack.c.bf16 %v2716_v29, %v2710_v28  ;;  %v5285_v38 = vpack.c.bf16 %v2729_v33, %v2723_v32  ;;  %v3547_v28 = vld [vmem:[#allocation9 + $0x78] sm:$0xff]  ;;  %v3550_v33 = vld [vmem:[#allocation9 + $0x90] sm:$0xff] }
 0x66e   :  { %v3551_v29 = vld [vmem:[#allocation9 + $0x98] sm:$0xff] }
 0x670   :  { %5224 = vmatpush1.bf16.msra.mxu1 %v5223_v40  ;;  %v2728_v40 = vld [vmem:[#allocation6 + $0x110] sm:$0xff] }
 0x671   :  { %5226 = vmatprep.subr.bf16.mxu1 %v5225_v41  ;;  %v2374_v41 = vld [vmem:[#allocation5 + $0x18] sm:$0xff]  ;;  %v5287_v46 = vpack.c.bf16 %v2728_v40, %v2722_v39  ;;  %v3556_v40 = vld [vmem:[#allocation9 + $0xc0] sm:$0xff] }
 0x674   :  { %5228 = vmatpush1.bf16.msra.mxu1 %v5227_v48 }
 0x675   :  { %5230 = vmatprep.subr.bf16.mxu1 %v5229_v49  ;;  %v5289_v49 = vpack.c.bf16 %v2741_v44, %v2735_v43  ;;  %v3563_v43 = vld [vmem:[#allocation9 + $0xf8] sm:$0xff]  ;;  %v3566_v44 = vld [vmem:[#allocation9 + $0x110] sm:$0xff] }
 0x678   :  { %5232 = vmatpush1.bf16.msra.mxu1 %v5231_v55  ;;  %v5291_v55 = vpack.c.bf16 %v2740_v52, %v2734_v51  ;;  %v3569_v51 = vld [vmem:[#allocation9 + $0x128] sm:$0xff]  ;;  %v3572_v52 = vld [vmem:[#allocation9 + $0x140] sm:$0xff] }
 0x679   :  { %5234 = vmatprep.subr.bf16.mxu1 %v5233_v56  ;;  %v5357_v54 = vpack.c.bf16 %v3572_v52, %v3569_v51  ;;  %v3071_v51 = vld [vmem:[%s6703_s7] sm:$0xff]  ;;  %v3604_v52 = vld [vmem:[#allocation9 + $0x240] sm:$0xff] }
 0x67c   :  { %5236 = vmatpush1.bf16.msra.mxu1 %v5235_v60  ;;  %v2765_v60 = vld [vmem:[#allocation6 + $0x238] sm:$0xff] }
 0x67d   :  { %5238 = vmatprep.subr.bf16.mxu1 %v5237_v61  ;;  %v5295_v61 = vpack.c.bf16 %v2752_v58, %v2746_v42  ;;  %v5297_v2 = vpack.c.bf16 %v2765_v60, %v2759_v59  ;;  %v3578_v42 = vld [vmem:[#allocation9 + $0x170] sm:$0xff] }
 0x67e   :  { %v3574_v60 = vld [vmem:[#allocation9 + $0x150] sm:$0xff] }
 0x680   :  { %5240 = vmatpush1.bf16.msra.mxu1 %v5239_v62  ;;  %v2764_v62 = vld [vmem:[#allocation6 + $0x230] sm:$0xff] }
 0x681   :  { %5242 = vmatprep.subr.bf16.mxu1 %v5241_v1  ;;  %v5299_v1 = vpack.c.bf16 %v2764_v62, %v2758_v45  ;;  %v3584_v45 = vld [vmem:[#allocation9 + $0x1a0] sm:$0xff] }
 0x684   :  { %5244 = vmatpush1.bf16.msra.mxu1 %v5243_v6  ;;  %v2783_v6 = vld [vmem:[#allocation6 + $0x2c8] sm:$0xff] }
 0x685   :  { %5278 = vmatprep.subr.bf16.mxu1 %v5277_v13  ;;  %v5305_v10 = vpack.c.bf16 %v2789_v8, %v2783_v6  ;;  %v3536_v13 = vld [vmem:[#allocation9 + $0x20] sm:$0xff]  ;;  %v3583_v6 = vld [vmem:[#allocation9 + $0x198] sm:$0xff] }
 0x686   :  { %v3587_v8 = vld [vmem:[#allocation9 + $0x1b8] sm:$0xff]  ;;  %v5367_v12 = vpack.c.bf16 %v3583_v6, %v3580_v5 }
 0x73a   :  { %v4745_v15 = vpop.f32.mrb[46].mxu1 }
 0x73b   :  { %v2667_v19 = vpop.f32.mrb[47].mxu1  ;;  %v5487_v24 = vadd.f32 %v4745_v15, %v2372_v18  ;;  %v5333_v15 = vpack.c.bf16 %v3536_v13, %v3533_v36  ;;  %v3542_v18 = vld [vmem:[#allocation9 + $0x50] sm:$0xff] }
 0x73c   :  { %v5488_v22 = vadd.f32 %v2667_v19, %v2371_v14  ;;  %v3532_v14 = vld [vmem:[#allocation9] sm:$0xff]  ;;  %v5337_v20 = vpack.c.bf16 %v3542_v18, %v3539_v17  ;;  %v3589_v17 = vld [vmem:[#allocation9 + $0x1c8] sm:$0xff] }
 0x73d   :  { %v6549_v35 = vmax.f32 %v5487_v24, 0.0  ;;  %v5335_v19 = vpack.c.bf16 %v3535_v16, %v3532_v14  ;;  %v3548_v24 = vld [vmem:[#allocation9 + $0x80] sm:$0xff]  ;;  %v3586_v16 = vld [vmem:[#allocation9 + $0x1b0] sm:$0xff] }
 0x73e   :  { %v6544_v25 = vmax.f32 %v5488_v22, 0.0  ;;  %v4748_v26 = vpop.f32.mrb[48].mxu1  ;;  %v3541_v22 = vld [vmem:[#allocation9 + $0x48] sm:$0xff] }
 0x73f   :  { %v2677_v31 = vpop.f32.mrb[49].mxu1  ;;  %v5489_v47 = vadd.f32 %v4748_v26, %v2374_v41  ;;  %v3559_v41 = vld [vmem:[#allocation9 + $0xd8] sm:$0xff] }
 0x740   :  { %2855 = vmatmul.mubr.f32.vlgmr.msra.gmra.mrb[50].mxu1 %v6544_v25  ;;  %2944 = vmatmul.mubr.f32.vlgmr.msra.gmra.mrb[40].mxu0 %v6544_v25  ;;  %v5490_v37 = vadd.f32 %v2677_v31, %v2373_v30  ;;  %v3554_v30 = vld [vmem:[#allocation9 + $0xb0] sm:$0xff] }
 0x741   :  { %5280 = vmatpush1.bf16.msra.mxu1 %v5279_v23  ;;  %2860 = vmatprep.mubr.f32.mxu1 %v5785_v7  ;;  %v2693_v56 = vmax.f32 %v5489_v47, 0.0  ;;  %v3545_v23 = vld [vmem:[#allocation9 + $0x68] sm:$0xff]  ;;  %v5345_v32 = vpack.c.bf16 %v3554_v30, %v3551_v29  ;;  %v5353_v47 = vpack.c.bf16 %v3566_v44, %v3563_v43  ;;  %v3595_v29 = vld [vmem:[#allocation9 + $0x1f8] sm:$0xff] }
 0x742   :  { %2949 = vmatprep.mubr.f32.mxu0 %v5785_v7  ;;  %5282 = vmatprep.subr.bf16.mxu1 %v5281_v27  ;;  %v2692_v48 = vmax.f32 %v5490_v37, 0.0  ;;  %v5341_v26 = vpack.c.bf16 %v3548_v24, %v3545_v23  ;;  %v3544_v27 = vld [vmem:[#allocation9 + $0x60] sm:$0xff]  ;;  %v5371_v24 = vpack.c.bf16 %v3589_v17, %v3586_v16  ;;  %v3599_v30 = vld [vmem:[#allocation9 + $0x218] sm:$0xff]  ;;  %v3601_v43 = vld [vmem:[#allocation9 + $0x228] sm:$0xff] }
 0x743   :  { %v5343_v31 = vpack.c.bf16 %v3547_v28, %v3544_v27  ;;  %v3560_v37 = vld [vmem:[#allocation9 + $0xe0] sm:$0xff]  ;;  %v3582_v17 = vld [vmem:[#allocation9 + $0x190] sm:$0xff] }
 0x744   :  { %2861 = vmatmul.mubr.f32.gmra.mrb[52].mxu1 %v6549_v35  ;;  %2950 = vmatmul.mubr.f32.gmra.mrb[42].mxu0 %v6549_v35  ;;  %v3592_v28 = vld [vmem:[#allocation9 + $0x1e0] sm:$0xff] }
 0x745   :  { %5284 = vmatpush1.bf16.msra.mxu1 %v5283_v34  ;;  %2866 = vmatprep.mubr.f32.mxu1 %v5785_v7  ;;  %v3553_v34 = vld [vmem:[#allocation9 + $0xa8] sm:$0xff] }
 0x746   :  { %2955 = vmatprep.mubr.f32.mxu0 %v5785_v7  ;;  %5286 = vmatprep.subr.bf16.mxu1 %v5285_v38  ;;  %v5347_v38 = vpack.c.bf16 %v3553_v34, %v3550_v33  ;;  %v5375_v34 = vpack.c.bf16 %v3595_v29, %v3592_v28  ;;  %v3588_v28 = vld [vmem:[#allocation9 + $0x1c0] sm:$0xff]  ;;  %v3591_v29 = vld [vmem:[#allocation9 + $0x1d8] sm:$0xff] }
 0x748   :  { %2867 = vmatmul.mubr.f32.gmra.mrb[54].mxu1 %v2692_v48  ;;  %2956 = vmatmul.mubr.f32.gmra.mrb[44].mxu0 %v2692_v48 }
 0x749   :  { %5288 = vmatpush1.bf16.msra.mxu1 %v5287_v46  ;;  %2872 = vmatprep.mubr.f32.mxu1 %v5785_v7  ;;  %v5351_v46 = vpack.c.bf16 %v3559_v41, %v3556_v40  ;;  %v3598_v41 = vld [vmem:[#allocation9 + $0x210] sm:$0xff] }
 0x74a   :  { %2961 = vmatprep.mubr.f32.mxu0 %v5785_v7  ;;  %5290 = vmatprep.subr.bf16.mxu1 %v5289_v49  ;;  %v3565_v49 = vld [vmem:[#allocation9 + $0x108] sm:$0xff] }
 0x74c   :  { %2873 = vmatmul.mubr.f32.gmra.mrb[56].mxu1 %v2693_v56  ;;  %2962 = vmatmul.mubr.f32.gmra.mrb[46].mxu0 %v2693_v56 }
 0x74d   :  { %5292 = vmatpush1.bf16.msra.mxu1 %v5291_v55  ;;  %3032 = vmatprep.mubr.f32.mxu1 %v5785_v7  ;;  %v3568_v55 = vld [vmem:[#allocation9 + $0x120] sm:$0xff] }
 0x74e   :  { %5294 = vmatprep.subr.bf16.mxu1 %v5293_v57  ;;  %3163 = vmatprep.mubr.f32.mxu0 %v5785_v7  ;;  %v3575_v57 = vld [vmem:[#allocation9 + $0x158] sm:$0xff] }
 0x74f   :  { %v5361_v59 = vpack.c.bf16 %v3578_v42, %v3575_v57  ;;  %v3072_v42 = vld [vmem:[%s6703_s7 + $0x8] sm:$0xff] }
 0x751   :  { %5296 = vmatpush1.bf16.msra.mxu1 %v5295_v61  ;;  %v3577_v61 = vld [vmem:[#allocation9 + $0x168] sm:$0xff] }
 0x752   :  { %5298 = vmatprep.subr.bf16.mxu1 %v5297_v2  ;;  %v3581_v2 = vld [vmem:[#allocation9 + $0x188] sm:$0xff]  ;;  %v5363_v0 = vpack.c.bf16 %v3577_v61, %v3574_v60 }
 0x753   :  { %v5365_v4 = vpack.c.bf16 %v3584_v45, %v3581_v2  ;;  %v3617_v61 = vld [vmem:[#allocation9 + $0x2a8] sm:$0xff]  ;;  %v3620_v2 = vld [vmem:[#allocation9 + $0x2c0] sm:$0xff] }
 0x755   :  { %5300 = vmatpush1.bf16.msra.mxu1 %v5299_v1 }
 0x756   :  { %5302 = vmatprep.subr.bf16.mxu1 %v5301_v3 }
 0x759   :  { %5304 = vmatpush1.bf16.msra.mxu1 %v5303_v9  ;;  %v3590_v9 = vld [vmem:[#allocation9 + $0x1d0] sm:$0xff] }
 0x75a   :  { %5306 = vmatprep.subr.bf16.mxu1 %v5305_v10 }
 0x75d   :  { %5308 = vmatpush1.bf16.msra.mxu1 %v5307_v50 }
 0x75e   :  { %5334 = vmatprep.subr.bf16.mxu1 %v5333_v15  ;;  %v5369_v15 = vpack.c.bf16 %v3590_v9, %v3587_v8  ;;  %v3076_v9 = vld [vmem:[%s6703_s7 + $0x28] sm:$0xff] }
 0x760   :  { %3033 = vmatmul.mubr.f32.vlgmr.msra.gmra.mrb[58].mxu1 %v6544_v25  ;;  %v5339_v25 = vpack.c.bf16 %v3541_v22, %v3538_v21  ;;  %v3596_v21 = vld [vmem:[#allocation9 + $0x200] sm:$0xff] }
 0x761   :  { %3038 = vmatprep.mubr.f32.mxu1 %v5785_v7  ;;  %5336 = vmatpush1.bf16.msra.mxu1 %v5335_v19 }
 0x762   :  { %5338 = vmatprep.subr.bf16.mxu1 %v5337_v20  ;;  %v3593_v20 = vld [vmem:[#allocation9 + $0x1e8] sm:$0xff] }
 0x763   :  { %v5373_v27 = vpack.c.bf16 %v3596_v21, %v3593_v20  ;;  %v4273_v21 = vld [vmem:[%s6703_s7 + $0x48] sm:$0xff] }
 0x764   :  { %3039 = vmatmul.mubr.f32.gmra.mrb[60].mxu1 %v6549_v35  ;;  %v3557_v35 = vld [vmem:[#allocation9 + $0xc8] sm:$0xff] }
 0x765   :  { %3044 = vmatprep.mubr.f32.mxu1 %v5785_v7  ;;  %5340 = vmatpush1.bf16.msra.mxu1 %v5339_v25  ;;  %v5349_v39 = vpack.c.bf16 %v3560_v37, %v3557_v35 }
 0x766   :  { %5342 = vmatprep.subr.bf16.mxu1 %v5341_v26 }
 0x768   :  { %3045 = vmatmul.mubr.f32.gmra.mrb[62].mxu1 %v2692_v48  ;;  %v3562_v48 = vld [vmem:[#allocation9 + $0xf0] sm:$0xff] }
 0x769   :  { %3050 = vmatprep.mubr.f32.mxu1 %v5785_v7  ;;  %5344 = vmatpush1.bf16.msra.mxu1 %v5343_v31  ;;  %v5355_v53 = vpack.c.bf16 %v3565_v49, %v3562_v48  ;;  %v3602_v31 = vld [vmem:[#allocation9 + $0x230] sm:$0xff]  ;;  %v3608_v48 = vld [vmem:[#allocation9 + $0x260] sm:$0xff]  ;;  %v5379_v49 = vpack.c.bf16 %v3601_v43, %v3598_v41  ;;  %v3549_v43 = vld [vmem:[#allocation9 + $0x88] sm:$0xff] }
 0x76a   :  { %5346 = vmatprep.subr.bf16.mxu1 %v5345_v32  ;;  %v5377_v40 = vpack.c.bf16 %v3602_v31, %v3599_v30  ;;  %v4285_v30 = vld [vmem:[%s6703_s7 + $0x70] sm:$0xff]  ;;  %v3546_v41 = vld [vmem:[#allocation9 + $0x70] sm:$0xff] }
 0x76c   :  { %3051 = vmatmul.mubr.f32.gmra.mrb[64].mxu1 %v2693_v56  ;;  %v3571_v56 = vld [vmem:[#allocation9 + $0x138] sm:$0xff] }
 0x76d   :  { %5348 = vmatpush1.bf16.msra.mxu1 %v5347_v38  ;;  %v5359_v58 = vpack.c.bf16 %v3571_v56, %v3568_v55  ;;  %v3611_v55 = vld [vmem:[#allocation9 + $0x278] sm:$0xff]  ;;  %v3614_v56 = vld [vmem:[#allocation9 + $0x290] sm:$0xff] }
 0x76e   :  { %5350 = vmatprep.subr.bf16.mxu1 %v5349_v39  ;;  %v5385_v60 = vpack.c.bf16 %v3614_v56, %v3611_v55  ;;  %v4288_v55 = vld [vmem:[%s6703_s7 + $0x88] sm:$0xff] }
 0x771   :  { %5352 = vmatpush1.bf16.msra.mxu1 %v5351_v46 }
 0x772   :  { %5354 = vmatprep.subr.bf16.mxu1 %v5353_v47  ;;  %v3605_v47 = vld [vmem:[#allocation9 + $0x248] sm:$0xff] }
 0x775   :  { %5356 = vmatpush1.bf16.msra.mxu1 %v5355_v53  ;;  %v3607_v53 = vld [vmem:[#allocation9 + $0x258] sm:$0xff] }
 0x776   :  { %5358 = vmatprep.subr.bf16.mxu1 %v5357_v54  ;;  %v5381_v54 = vpack.c.bf16 %v3608_v48, %v3605_v47  ;;  %v5383_v57 = vpack.c.bf16 %v3607_v53, %v3604_v52  ;;  %v4287_v47 = vld [vmem:[%s6703_s7 + $0x80] sm:$0xff]  ;;  %v5407_v48 = vpack.c.bf16 %v3549_v43, %v3546_v41  ;;  %v3555_v52 = vld [vmem:[#allocation9 + $0xb8] sm:$0xff] }
 0x777   :  { %v3606_v53 = vld [vmem:[#allocation9 + $0x250] sm:$0xff] }
 0x779   :  { %5360 = vmatpush1.bf16.msra.mxu1 %v5359_v58  ;;  %v3610_v58 = vld [vmem:[#allocation9 + $0x270] sm:$0xff] }
 0x77a   :  { %5362 = vmatprep.subr.bf16.mxu1 %v5361_v59  ;;  %v3613_v59 = vld [vmem:[#allocation9 + $0x288] sm:$0xff] }
 0x77b   :  { %v5387_v45 = vpack.c.bf16 %v3613_v59, %v3610_v58  ;;  %v3561_v58 = vld [vmem:[#allocation9 + $0xe8] sm:$0xff]  ;;  %v3612_v59 = vld [vmem:[#allocation9 + $0x280] sm:$0xff] }
 0x77d   :  { %5364 = vmatpush1.bf16.msra.mxu1 %v5363_v0  ;;  %v3074_v0 = vld [vmem:[%s6703_s7 + $0x18] sm:$0xff] }
 0x77e   :  { %5366 = vmatprep.subr.bf16.mxu1 %v5365_v4  ;;  %v3075_v4 = vld [vmem:[%s6703_s7 + $0x20] sm:$0xff] }
 0x781   :  { %5368 = vmatpush1.bf16.msra.mxu1 %v5367_v12 }
 0x782   :  { %5370 = vmatprep.subr.bf16.mxu1 %v5369_v15  ;;  %v4271_v15 = vld [vmem:[%s6703_s7 + $0x38] sm:$0xff] }
 0x785   :  { %5372 = vmatpush1.bf16.msra.mxu1 %v5371_v24  ;;  %v4276_v24 = vld [vmem:[%s6703_s7 + $0x60] sm:$0xff] }
 0x786   :  { %5374 = vmatprep.subr.bf16.mxu1 %v5373_v27  ;;  %v3537_v27 = vld [vmem:[#allocation9 + $0x28] sm:$0xff] }
 0x789   :  { %5376 = vmatpush1.bf16.msra.mxu1 %v5375_v34  ;;  %v3543_v34 = vld [vmem:[#allocation9 + $0x58] sm:$0xff] }
 0x78a   :  { %5378 = vmatprep.subr.bf16.mxu1 %v5377_v40 }
 0x78d   :  { %5380 = vmatpush1.bf16.msra.mxu1 %v5379_v49 }
 0x78e   :  { %5382 = vmatprep.subr.bf16.mxu1 %v5381_v54  ;;  %v3609_v54 = vld [vmem:[#allocation9 + $0x268] sm:$0xff] }
 0x791   :  { %5384 = vmatpush1.bf16.msra.mxu1 %v5383_v57  ;;  %v5413_v57 = vpack.c.bf16 %v3609_v54, %v3606_v53 }
 0x792   :  { %5386 = vmatprep.subr.bf16.mxu1 %v5385_v60  ;;  %v3615_v60 = vld [vmem:[#allocation9 + $0x298] sm:$0xff] }
 0x795   :  { %5388 = vmatpush1.bf16.msra.mxu1 %v5387_v45  ;;  %v5417_v45 = vpack.c.bf16 %v3615_v60, %v3612_v59 }
 0x813   :  { %v2856_v62 = vpop.f32.mrb[50].mxu1  ;;  %v6565_v63 = vpop.f32.mrb[40].mxu0 }
 0x814   :  { %v2858_v1 = vpop.f32.mrb[51].mxu1  ;;  %v2947_v3 = vpop.f32.mrb[41].mxu0 }
 0x817   :  { %v2862_v10 = vpop.f32.mrb[52].mxu1  ;;  %v2951_v11 = vpop.f32.mrb[42].mxu0 }
 0x818   :  { %v5311_v50 = vpack.c.bf16 %v2862_v10, %v2856_v62  ;;  %v5319_v36 = vpack.c.bf16 %v2951_v11, %v6565_v63  ;;  %v2864_v13 = vpop.f32.mrb[53].mxu1  ;;  %v2953_v14 = vpop.f32.mrb[43].mxu0  ;;  %v3073_v62 = vld [vmem:[%s6703_s7 + $0x10] sm:$0xff]  ;;  %v5389_v63 = vpack.c.bf16 %v3620_v2, %v3617_v61 }
 0x819   :  { %v5309_v18 = vpack.c.bf16 %v2864_v13, %v2858_v1  ;;  %v5317_v19 = vpack.c.bf16 %v2953_v14, %v2947_v3  ;;  %v4289_v61 = vld [vmem:[%s6703_s7 + $0x90] sm:$0xff] }
 0x81a   :  { %5390 = vmatprep.subr.bf16.mxu1 %v5389_v63  ;;  %v3567_v63 = vld [vmem:[#allocation9 + $0x118] sm:$0xff] }
 0x81b   :  { %v2868_v22 = vpop.f32.mrb[54].mxu1  ;;  %v2957_v23 = vpop.f32.mrb[44].mxu0  ;;  %5310 = vmatprep.subr.bf16.mxu0 %v5309_v18  ;;  %v3585_v18 = vld [vmem:[#allocation9 + $0x1a8] sm:$0xff] }
 0x81c   :  { %v2870_v25 = vpop.f32.mrb[55].mxu1  ;;  %v2959_v26 = vpop.f32.mrb[45].mxu0  ;;  %5312 = vmatpush1.bf16.msra.mxu0 %v5311_v50  ;;  %v3077_v50 = vld [vmem:[%s6703_s7 + $0x30] sm:$0xff]  ;;  %v5397_v20 = vpack.c.bf16 %v3585_v18, %v3582_v17  ;;  %v3625_v18 = vld [vmem:[#allocation9 + $0x2e8] sm:$0xff] }
 0x81f   :  { %v2874_v32 = vpop.f32.mrb[56].mxu1  ;;  %v2963_v33 = vpop.f32.mrb[46].mxu0 }
 0x820   :  { %v5315_v35 = vpack.c.bf16 %v2874_v32, %v2868_v22  ;;  %v5323_v37 = vpack.c.bf16 %v2963_v33, %v2957_v23  ;;  %v2876_v38 = vpop.f32.mrb[57].mxu1  ;;  %v2965_v39 = vpop.f32.mrb[47].mxu0  ;;  %v4274_v22 = vld [vmem:[%s6703_s7 + $0x50] sm:$0xff]  ;;  %v4275_v23 = vld [vmem:[%s6703_s7 + $0x58] sm:$0xff]  ;;  %v5401_v32 = vpack.c.bf16 %v3591_v29, %v3588_v28 }
 0x821   :  { %v5313_v44 = vpack.c.bf16 %v2876_v38, %v2870_v25  ;;  %v5321_v46 = vpack.c.bf16 %v2965_v39, %v2959_v26  ;;  %v4277_v25 = vld [vmem:[%s6703_s7 + $0x68] sm:$0xff]  ;;  %v3534_v26 = vld [vmem:[#allocation9 + $0x10] sm:$0xff]  ;;  %v3540_v33 = vld [vmem:[#allocation9 + $0x40] sm:$0xff] }
 0x822   :  { %v5399_v31 = vpack.c.bf16 %v3537_v27, %v3534_v26  ;;  %v4286_v38 = vld [vmem:[%s6703_s7 + $0x78] sm:$0xff]  ;;  %v5403_v39 = vpack.c.bf16 %v3543_v34, %v3540_v33  ;;  %v3059_v29 = vld [vmem:[#allocation8 + $0x10] sm:$0xff] }
 0x823   :  { %5314 = vmatprep.subr.bf16.mxu0 %v5313_v44  ;;  %v3600_v44 = vld [vmem:[#allocation9 + $0x220] sm:$0xff] }
 0x824   :  { %5316 = vmatpush1.bf16.msra.mxu0 %v5315_v35  ;;  %v3594_v35 = vld [vmem:[#allocation9 + $0x1f0] sm:$0xff] }
 0x825   :  { %5318 = vmatprep.subr.bf16.mxu0 %v5317_v19  ;;  %v4272_v19 = vld [vmem:[%s6703_s7 + $0x40] sm:$0xff] }
 0x827   :  { %4264 = vmatmul.mubr.msk.f32.vlgmr.msra.gmra.mrb[48].mxu0 %vm1067_vm1, %v3071_v51  ;;  %v3552_v51 = vld [vmem:[#allocation9 + $0xa0] sm:$0xff] }
 0x828   :  { %5320 = vmatpush1.bf16.msra.mxu0 %v5319_v36  ;;  %3169 = vmatprep.mubr.f32.mxu0 %v5785_v7  ;;  %v5411_v56 = vpack.c.bf16 %v3555_v52, %v3552_v51 }
 0x829   :  { %5322 = vmatprep.subr.bf16.mxu0 %v5321_v46  ;;  %v3603_v46 = vld [vmem:[#allocation9 + $0x238] sm:$0xff] }
 0x82a   :  { %v5409_v49 = vpack.c.bf16 %v3603_v46, %v3600_v44 }
 0x82b   :  { %4265 = vmatmul.mubr.msk.f32.gmra.mrb[50].mxu0 %vm1067_vm1, %v3072_v42  ;;  %v3558_v42 = vld [vmem:[#allocation9 + $0xd0] sm:$0xff] }
 0x82c   :  { %5324 = vmatpush1.bf16.msra.mxu0 %v5323_v37  ;;  %3175 = vmatprep.mubr.f32.mxu0 %v5785_v7  ;;  %v3597_v37 = vld [vmem:[#allocation9 + $0x208] sm:$0xff]  ;;  %v5415_v2 = vpack.c.bf16 %v3561_v58, %v3558_v42  ;;  %v3066_v42 = vld [vmem:[#allocation8 + $0x48] sm:$0xff] }
 0x82d   :  { %v5405_v40 = vpack.c.bf16 %v3597_v37, %v3594_v35 }
 0x82f   :  { %4266 = vmatmul.mubr.msk.f32.gmra.mrb[52].mxu0 %vm1067_vm1, %v3073_v62  ;;  %v3564_v62 = vld [vmem:[#allocation9 + $0x100] sm:$0xff] }
 0x830   :  { %3181 = vmatprep.mubr.f32.mxu0 %v5785_v7 }
 0x833   :  { %v3034_v1 = vpop.f32.mrb[58].mxu1  ;;  %4267 = vmatmul.mubr.msk.f32.gmra.mrb[54].mxu0 %vm1067_vm1, %v3074_v0  ;;  %v3618_v0 = vld [vmem:[#allocation9 + $0x2b0] sm:$0xff] }
 0x834   :  { %v3036_v3 = vpop.f32.mrb[59].mxu1  ;;  %3187 = vmatprep.mubr.f32.mxu0 %v5785_v7 }
 0x837   :  { %v3040_v5 = vpop.f32.mrb[60].mxu1  ;;  %4268 = vmatmul.mubr.msk.f32.gmra.mrb[56].mxu0 %vm1067_vm1, %v3075_v4  ;;  %v5419_v4 = vpack.c.bf16 %v3567_v63, %v3564_v62  ;;  %v3067_v62 = vld [vmem:[#allocation8 + $0x50] sm:$0xff]  ;;  %v3068_v63 = vld [vmem:[#allocation8 + $0x58] sm:$0xff] }
 0x838   :  { %v5327_v6 = vpack.c.bf16 %v3040_v5, %v3034_v1  ;;  %v3042_v8 = vpop.f32.mrb[61].mxu1  ;;  %3193 = vmatprep.mubr.f32.mxu0 %v5785_v7  ;;  %v3621_v1 = vld [vmem:[#allocation9 + $0x2c8] sm:$0xff] }
 0x839   :  { %v5325_v10 = vpack.c.bf16 %v3042_v8, %v3036_v3  ;;  %v4290_v3 = vld [vmem:[%s6703_s7 + $0x98] sm:$0xff]  ;;  %v5421_v5 = vpack.c.bf16 %v3621_v1, %v3618_v0  ;;  %v3616_v8 = vld [vmem:[#allocation9 + $0x2a0] sm:$0xff] }
 0x83b   :  { %v3046_v11 = vpop.f32.mrb[62].mxu1  ;;  %5326 = vmatprep.subr.bf16.mxu0 %v5325_v10  ;;  %4269 = vmatmul.mubr.msk.f32.gmra.mrb[58].mxu0 %vm1067_vm1, %v3076_v9  ;;  %v3619_v9 = vld [vmem:[#allocation9 + $0x2b8] sm:$0xff]  ;;  %v3570_v10 = vld [vmem:[#allocation9 + $0x130] sm:$0xff] }
 0x83c   :  { %v3048_v12 = vpop.f32.mrb[63].mxu1  ;;  %3199 = vmatprep.mubr.f32.mxu0 %v5785_v7 }
 0x83f   :  { %v3052_v36 = vpop.f32.mrb[64].mxu1  ;;  %4270 = vmatmul.mubr.msk.f32.gmra.mrb[60].mxu0 %vm1067_vm1, %v3077_v50 }
 0x840   :  { %v5331_v13 = vpack.c.bf16 %v3052_v36, %v3046_v11  ;;  %v3054_v14 = vpop.f32.mrb[65].mxu1  ;;  %3312 = vmatprep.mubr.f32.mxu0 %v5785_v7  ;;  %v5391_v11 = vpack.c.bf16 %v3619_v9, %v3616_v8  ;;  %v3623_v36 = vld [vmem:[#allocation9 + $0x2d8] sm:$0xff]  ;;  %v3069_v8 = vld [vmem:[#allocation8 + $0x60] sm:$0xff] }
 0x841   :  { %v5329_v16 = vpack.c.bf16 %v3054_v14, %v3048_v12  ;;  %v3573_v12 = vld [vmem:[#allocation9 + $0x148] sm:$0xff]  ;;  %v3624_v14 = vld [vmem:[#allocation9 + $0x2e0] sm:$0xff]  ;;  %v3070_v9 = vld [vmem:[#allocation8 + $0x68] sm:$0xff] }
 0x842   :  { %v5423_v50 = vpack.c.bf16 %v3573_v12, %v3570_v10  ;;  %5392 = vmatpush1.bf16.msra.mxu1 %v5391_v11 }
 0x843   :  { %4278 = vmatmul.mubr.msk.f32.vlgmr.msra.gmra.mrb[48].mxu0 %vm1067_vm1, %v4271_v15  ;;  %v3627_v15 = vld [vmem:[#allocation9 + $0x2f8] sm:$0xff] }
 0x844   :  { %5328 = vmatpush1.bf16.msra.mxu0 %v5327_v6  ;;  %3318 = vmatprep.mubr.f32.mxu0 %v5785_v7  ;;  %v4291_v6 = vld [vmem:[%s6703_s7 + $0xa0] sm:$0xff]  ;;  %v5425_v17 = vpack.c.bf16 %v3627_v15, %v3624_v14  ;;  %v3944_v15 = vld [vmem:[#allocation11 + $0x20] sm:$0xff] }
 0x845   :  { %5330 = vmatprep.subr.bf16.mxu0 %v5329_v16  ;;  %v3622_v16 = vld [vmem:[#allocation9 + $0x2d0] sm:$0xff] }
 0x847   :  { %4279 = vmatmul.mubr.msk.f32.gmra.mrb[50].mxu0 %vm1067_vm1, %v4272_v19  ;;  %v3576_v19 = vld [vmem:[#allocation9 + $0x160] sm:$0xff] }
 0x848   :  { %5332 = vmatpush1.bf16.msra.mxu0 %v5331_v13  ;;  %3324 = vmatprep.mubr.f32.mxu0 %v5785_v7  ;;  %v3626_v13 = vld [vmem:[#allocation9 + $0x2f0] sm:$0xff] }
 0x849   :  { %5398 = vmatprep.subr.bf16.mxu0 %v5397_v20  ;;  %v3579_v20 = vld [vmem:[#allocation9 + $0x178] sm:$0xff] }
 0x84b   :  { %4280 = vmatmul.mubr.msk.f32.gmra.mrb[52].mxu0 %vm1067_vm1, %v4273_v21  ;;  %v5395_v21 = vpack.c.bf16 %v3625_v18, %v3622_v16  ;;  %v3839_v16 = vld [vmem:[#allocation11] sm:$0xff] }
 0x84c   :  { %3330 = vmatprep.mubr.f32.mxu0 %v5785_v7 }
 0x84f   :  { %4281 = vmatmul.mubr.msk.f32.gmra.mrb[54].mxu0 %vm1067_vm1, %v4274_v22  ;;  %v5427_v22 = vpack.c.bf16 %v3579_v20, %v3576_v19 }
 0x850   :  { %3336 = vmatprep.mubr.f32.mxu0 %v5785_v7 }
 0x853   :  { %4282 = vmatmul.mubr.msk.f32.gmra.mrb[56].mxu0 %vm1067_vm1, %v4275_v23  ;;  %v3057_v23 = vld [vmem:[#allocation8] sm:$0xff] }
 0x854   :  { %3342 = vmatprep.mubr.f32.mxu0 %v5785_v7 }
 0x857   :  { %4283 = vmatmul.mubr.msk.f32.gmra.mrb[58].mxu0 %vm1067_vm1, %v4276_v24  ;;  %v3058_v24 = vld [vmem:[#allocation8 + $0x8] sm:$0xff] }
 0x858   :  { %3348 = vmatprep.mubr.f32.mxu0 %v5785_v7 }
 0x85b   :  { %4284 = vmatmul.mubr.msk.f32.gmra.mrb[60].mxu0 %vm1067_vm1, %v4277_v25 }
 0x85c   :  { %3461 = vmatprep.mubr.f32.mxu0 %v5785_v7 }
 0x85f   :  { %4292 = vmatmul.mubr.msk.f32.vlgmr.msra.gmra.mrb[48].mxu0 %vm1067_vm1, %v4285_v30  ;;  %v3060_v30 = vld [vmem:[#allocation8 + $0x18] sm:$0xff] }
 0x860   :  { %3467 = vmatprep.mubr.f32.mxu0 %v5785_v7  ;;  %5400 = vmatpush3.bf16.msra.mxu0 %v5399_v31 }
 0x861   :  { %5402 = vmatprep.subr.bf16.mxu0 %v5401_v32 }
 0x863   :  { %4293 = vmatmul.mubr.msk.f32.gmra.mrb[50].mxu0 %vm1067_vm1, %v4286_v38  ;;  %v3061_v38 = vld [vmem:[#allocation8 + $0x20] sm:$0xff] }
 0x864   :  { %3473 = vmatprep.mubr.f32.mxu0 %v5785_v7  ;;  %5404 = vmatpush3.bf16.msra.mxu0 %v5403_v39  ;;  %v3062_v39 = vld [vmem:[#allocation8 + $0x28] sm:$0xff] }
 0x865   :  { %5406 = vmatprep.subr.bf16.mxu0 %v5405_v40 }
 0x867   :  { %4294 = vmatmul.mubr.msk.f32.gmra.mrb[52].mxu0 %vm1067_vm1, %v4287_v47 }
 0x868   :  { %3479 = vmatprep.mubr.f32.mxu0 %v5785_v7  ;;  %5408 = vmatpush3.bf16.msra.mxu0 %v5407_v48  ;;  %v3063_v48 = vld [vmem:[#allocation8 + $0x30] sm:$0xff] }
 0x869   :  { %5410 = vmatprep.subr.bf16.mxu0 %v5409_v49  ;;  %v3064_v49 = vld [vmem:[#allocation8 + $0x38] sm:$0xff] }
 0x86b   :  { %4295 = vmatmul.mubr.msk.f32.gmra.mrb[54].mxu0 %vm1067_vm1, %v4288_v55 }
 0x86c   :  { %3485 = vmatprep.mubr.f32.mxu0 %v5785_v7  ;;  %5412 = vmatpush3.bf16.msra.mxu0 %v5411_v56 }
 0x86d   :  { %5414 = vmatprep.subr.bf16.mxu0 %v5413_v57  ;;  %v3065_v57 = vld [vmem:[#allocation8 + $0x40] sm:$0xff] }
 0x86f   :  { %4296 = vmatmul.mubr.msk.f32.gmra.mrb[56].mxu0 %vm1067_vm1, %v4289_v61 }
 0x870   :  { %3491 = vmatprep.mubr.f32.mxu0 %v5785_v7  ;;  %5416 = vmatpush3.bf16.msra.mxu0 %v5415_v2 }
 0x871   :  { %5418 = vmatprep.subr.bf16.mxu0 %v5417_v45 }
 0x873   :  { %4297 = vmatmul.mubr.msk.f32.gmra.mrb[58].mxu0 %vm1067_vm1, %v4290_v3 }
 0x874   :  { %3497 = vmatprep.mubr.f32.mxu0 %v5785_v7  ;;  %5420 = vmatpush3.bf16.msra.mxu0 %v5419_v4  ;;  %v5393_v7 = vpack.c.bf16 %v3626_v13, %v3623_v36 }
 0x875   :  { %5422 = vmatprep.subr.bf16.mxu0 %v5421_v5 }
 0x876   :  { %5394 = vmatprep.subr.bf16.mxu1 %v5393_v7 }
 0x877   :  { %4298 = vmatmul.mubr.msk.f32.gmra.mrb[60].mxu0 %vm1067_vm1, %v4291_v6  ;;  %5396 = vmatpush1.bf16.msra.mxu1 %v5395_v21 }
 0x878   :  { %5424 = vmatpush3.bf16.msra.mxu0 %v5423_v50 }
 0x879   :  { %5426 = vmatprep.subr.bf16.mxu0 %v5425_v17 }
 0x87c   :  { %5428 = vmatpush3.bf16.msra.mxu0 %v5427_v22 }
 0x932   :  { %v3463_v25 = vpop.f32.mrb[48].mxu0 }
 0x933   :  { %v5491_v26 = vadd.f32 %v3463_v25, %v3057_v23  ;;  %v3465_v27 = vpop.f32.mrb[49].mxu0 }
 0x934   :  { %v5492_v28 = vadd.f32 %v3465_v27, %v3058_v24 }
 0x935   :  { %v3518_v33 = vmax.f32 %v5491_v26, 0.0 }
 0x936   :  { %v3519_v31 = vmax.f32 %v5492_v28, 0.0  ;;  %v3469_v32 = vpop.f32.mrb[50].mxu0 }
 0x937   :  { %v5493_v34 = vadd.f32 %v3469_v32, %v3059_v29  ;;  %v3471_v35 = vpop.f32.mrb[51].mxu0 }
 0x938   :  { %v5494_v37 = vadd.f32 %v3471_v35, %v3060_v30  ;;  %3692 = vmatprep.mubr.f32.mxu1 %v3519_v31  ;;  %3799 = vmatprep.mubr.f32.mxu0 %v3519_v31 }
 0x939   :  { %3693 = vmatmul.mubr.f32.vlgmr.msra.gmra.mrb[66].mxu1 %v3518_v33  ;;  %3800 = vmatmul.mubr.f32.vlgmr.msra.gmra.mrb[62].mxu0 %v3518_v33  ;;  %v3520_v43 = vmax.f32 %v5493_v34, 0.0 }
 0x93a   :  { %v3521_v40 = vmax.f32 %v5494_v37, 0.0  ;;  %v3475_v41 = vpop.f32.mrb[52].mxu0 }
 0x93b   :  { %v5495_v44 = vadd.f32 %v3475_v41, %v3061_v38  ;;  %v3477_v46 = vpop.f32.mrb[53].mxu0 }
 0x93c   :  { %v5496_v47 = vadd.f32 %v3477_v46, %v3062_v39  ;;  %3698 = vmatprep.mubr.f32.mxu1 %v3521_v40  ;;  %3804 = vmatprep.mubr.f32.mxu0 %v3521_v40 }
 0x93d   :  { %3699 = vmatmul.mubr.f32.gmra.mrb[68].mxu1 %v3520_v43  ;;  %3805 = vmatmul.mubr.f32.gmra.mrb[64].mxu0 %v3520_v43  ;;  %v3522_v53 = vmax.f32 %v5495_v44, 0.0 }
 0x93e   :  { %v3523_v51 = vmax.f32 %v5496_v47, 0.0  ;;  %v3481_v52 = vpop.f32.mrb[54].mxu0 }
 0x93f   :  { %v5497_v54 = vadd.f32 %v3481_v52, %v3063_v48  ;;  %v3483_v55 = vpop.f32.mrb[55].mxu0 }
 0x940   :  { %v5498_v56 = vadd.f32 %v3483_v55, %v3064_v49  ;;  %3704 = vmatprep.mubr.f32.mxu1 %v3523_v51  ;;  %3809 = vmatprep.mubr.f32.mxu0 %v3523_v51 }
 0x941   :  { %3705 = vmatmul.mubr.f32.gmra.mrb[70].mxu1 %v3522_v53  ;;  %3810 = vmatmul.mubr.f32.gmra.mrb[66].mxu0 %v3522_v53  ;;  %v3524_v60 = vmax.f32 %v5497_v54, 0.0 }
 0x942   :  { %v3525_v58 = vmax.f32 %v5498_v56, 0.0  ;;  %v3487_v59 = vpop.f32.mrb[56].mxu0 }
 0x943   :  { %v5499_v61 = vadd.f32 %v3487_v59, %v3065_v57  ;;  %v3489_v2 = vpop.f32.mrb[57].mxu0 }
 0x944   :  { %v5500_v45 = vadd.f32 %v3489_v2, %v3066_v42  ;;  %3710 = vmatprep.mubr.f32.mxu1 %v3525_v58  ;;  %3814 = vmatprep.mubr.f32.mxu0 %v3525_v58 }
 0x945   :  { %3711 = vmatmul.mubr.f32.gmra.mrb[72].mxu1 %v3524_v60  ;;  %3815 = vmatmul.mubr.f32.gmra.mrb[68].mxu0 %v3524_v60  ;;  %v3526_v3 = vmax.f32 %v5499_v61, 0.0 }
 0x946   :  { %v3527_v0 = vmax.f32 %v5500_v45, 0.0  ;;  %v3493_v1 = vpop.f32.mrb[58].mxu0 }
 0x947   :  { %v5501_v4 = vadd.f32 %v3493_v1, %v3067_v62  ;;  %v3495_v5 = vpop.f32.mrb[59].mxu0  ;;  %v3840_v62 = vld [vmem:[#allocation11 + $0x8] sm:$0xff]  ;;  %v3841_v1 = vld [vmem:[#allocation11 + $0x10] sm:$0xff] }
 0x948   :  { %v5502_v6 = vadd.f32 %v3495_v5, %v3068_v63  ;;  %3716 = vmatprep.mubr.f32.mxu1 %v3527_v0  ;;  %3819 = vmatprep.mubr.f32.mxu0 %v3527_v0  ;;  %v3945_v63 = vld [vmem:[#allocation11 + $0x28] sm:$0xff]  ;;  %v3946_v0 = vld [vmem:[#allocation11 + $0x30] sm:$0xff]  ;;  %v4049_v5 = vld [vmem:[#allocation11 + $0x40] sm:$0xff] }
 0x949   :  { %3717 = vmatmul.mubr.f32.gmra.mrb[74].mxu1 %v3526_v3  ;;  %3820 = vmatmul.mubr.f32.gmra.mrb[70].mxu0 %v3526_v3  ;;  %v3528_v12 = vmax.f32 %v5501_v4, 0.0  ;;  %v3842_v3 = vld [vmem:[#allocation11 + $0x18] sm:$0xff] }
 0x94a   :  { %v3529_v10 = vmax.f32 %v5502_v6, 0.0  ;;  %v3499_v11 = vpop.f32.mrb[60].mxu0  ;;  %v3947_v4 = vld [vmem:[#allocation11 + $0x38] sm:$0xff]  ;;  %v4050_v6 = vld [vmem:[#allocation11 + $0x48] sm:$0xff] }
 0x94b   :  { %v5503_v50 = vadd.f32 %v3499_v11, %v3069_v8  ;;  %v3501_v36 = vpop.f32.mrb[61].mxu0  ;;  %v4051_v8 = vld [vmem:[#allocation11 + $0x50] sm:$0xff] }
 0x94c   :  { %v5504_v13 = vadd.f32 %v3501_v36, %v3070_v9  ;;  %3722 = vmatprep.mubr.f32.mxu1 %v3529_v10  ;;  %3824 = vmatprep.mubr.f32.mxu0 %v3529_v10  ;;  %v4052_v9 = vld [vmem:[#allocation11 + $0x58] sm:$0xff]  ;;  %v3836_v36 = vld [vmem:[#allocation12 + $0x8] sm:$0xff] }
 0x94d   :  { %3723 = vmatmul.mubr.f32.gmra.mrb[76].mxu1 %v3528_v12  ;;  %3825 = vmatmul.mubr.f32.gmra.mrb[72].mxu0 %v3528_v12  ;;  %v3530_v7 = vmax.f32 %v5503_v50, 0.0 }
 0x94e   :  { %v3531_v14 = vmax.f32 %v5504_v13, 0.0  ;;  %v3835_v13 = vld [vmem:[#allocation12] sm:$0xff] }
 0x950   :  { %3728 = vmatprep.mubr.f32.mxu1 %v3531_v14  ;;  %3829 = vmatprep.mubr.f32.mxu0 %v3531_v14 }
 0x951   :  { %3729 = vmatmul.mubr.f32.gmra.mrb[78].mxu1 %v3530_v7  ;;  %3830 = vmatmul.mubr.f32.gmra.mrb[74].mxu0 %v3530_v7 }
 0x952   :  { %4783 = vmatprep.mubr.msk.f32.mxu1 %vm1835_vm2, %v3944_v15  ;;  %4763 = vmatprep.mubr.msk.f32.mxu0 %vm1835_vm2, %v3839_v16  ;;  %v3838_v15 = vld [vmem:[#allocation12 + $0x18] sm:$0xff]  ;;  %v3837_v16 = vld [vmem:[#allocation12 + $0x10] sm:$0xff] }
 0xa0c   :  { %v3694_v17 = vpop.f32.mrb[66].mxu1  ;;  %v4505_v18 = vpop.f32.mrb[62].mxu0 }
 0xa0d   :  { %v3696_v19 = vpop.f32.mrb[67].mxu1  ;;  %v4506_v20 = vpop.f32.mrb[63].mxu0 }
 0xa0e   :  { %v4507_v21 = vadd.f32 %v4506_v20, %v4505_v18 }
 0xa10   :  { %v3700_v22 = vpop.f32.mrb[68].mxu1  ;;  %v4508_v23 = vpop.f32.mrb[64].mxu0 }
 0xa11   :  { %v5429_v24 = vpack.c.bf16 %v3700_v22, %v3694_v17  ;;  %v3702_v25 = vpop.f32.mrb[69].mxu1  ;;  %v4509_v26 = vpop.f32.mrb[65].mxu0 }
 0xa12   :  { %v5441_v27 = vpack.c.bf16 %v3702_v25, %v3696_v19  ;;  %v4510_v28 = vadd.f32 %v4509_v26, %v4508_v23 }
 0xa13   :  { %5430 = vmatprep.subr.bf16.mxu0 %v5429_v24 }
 0xa14   :  { %v5453_v29 = vpack.c.bf16 %v4510_v28, %v4507_v21  ;;  %v3706_v30 = vpop.f32.mrb[70].mxu1  ;;  %v4511_v31 = vpop.f32.mrb[66].mxu0  ;;  %5432 = vmatpush3.bf16.msra.mxu0 %v5429_v24  ;;  %5442 = vmatprep.subr.bf16.mxu1 %v5441_v27 }
 0xa15   :  { %v3708_v32 = vpop.f32.mrb[71].mxu1  ;;  %v4512_v33 = vpop.f32.mrb[67].mxu0  ;;  %5444 = vmatpush3.bf16.msra.mxu1 %v5441_v27 }
 0xa16   :  { %v4513_v34 = vadd.f32 %v4512_v33, %v4511_v31 }
 0xa18   :  { %v3712_v35 = vpop.f32.mrb[72].mxu1  ;;  %v4514_v37 = vpop.f32.mrb[68].mxu0 }
 0xa19   :  { %v5433_v38 = vpack.c.bf16 %v3712_v35, %v3706_v30  ;;  %v3714_v39 = vpop.f32.mrb[73].mxu1  ;;  %v4515_v40 = vpop.f32.mrb[69].mxu0 }
 0xa1a   :  { %v5445_v41 = vpack.c.bf16 %v3714_v39, %v3708_v32  ;;  %v4516_v43 = vadd.f32 %v4515_v40, %v4514_v37 }
 0xa1b   :  { %5434 = vmatprep.subr.bf16.mxu0 %v5433_v38 }
 0xa1c   :  { %v5457_v44 = vpack.c.bf16 %v4516_v43, %v4513_v34  ;;  %v3718_v46 = vpop.f32.mrb[74].mxu1  ;;  %v4517_v47 = vpop.f32.mrb[70].mxu0  ;;  %5436 = vmatpush3.bf16.msra.mxu0 %v5433_v38  ;;  %5446 = vmatprep.subr.bf16.mxu1 %v5445_v41 }
 0xa1d   :  { %v3720_v48 = vpop.f32.mrb[75].mxu1  ;;  %v4518_v49 = vpop.f32.mrb[71].mxu0  ;;  %5448 = vmatpush3.bf16.msra.mxu1 %v5445_v41 }
 0xa1e   :  { %v4519_v51 = vadd.f32 %v4518_v49, %v4517_v47 }
 0xa20   :  { %v3724_v52 = vpop.f32.mrb[76].mxu1  ;;  %v4520_v53 = vpop.f32.mrb[72].mxu0 }
 0xa21   :  { %v5437_v54 = vpack.c.bf16 %v3724_v52, %v3718_v46  ;;  %v3726_v55 = vpop.f32.mrb[77].mxu1  ;;  %v4521_v56 = vpop.f32.mrb[73].mxu0 }
 0xa22   :  { %v5449_v57 = vpack.c.bf16 %v3726_v55, %v3720_v48  ;;  %v4522_v42 = vadd.f32 %v4521_v56, %v4520_v53 }
 0xa23   :  { %5438 = vmatprep.subr.bf16.mxu0 %v5437_v54 }
 0xa24   :  { %v5461_v58 = vpack.c.bf16 %v4522_v42, %v4519_v51  ;;  %v3730_v59 = vpop.f32.mrb[78].mxu1  ;;  %v4523_v60 = vpop.f32.mrb[74].mxu0  ;;  %5440 = vmatpush3.bf16.msra.mxu0 %v5437_v54  ;;  %5450 = vmatprep.subr.bf16.mxu1 %v5449_v57 }
 0xa25   :  { %v3732_v61 = vpop.f32.mrb[79].mxu1  ;;  %v4524_v2 = vpop.f32.mrb[75].mxu0  ;;  %4761 = vmatprep.subr.mxu0 %v3730_v59  ;;  %5452 = vmatpush3.bf16.msra.mxu1 %v5449_v57 }
 0xa26   :  { %v4525_v45 = vadd.f32 %v4524_v2, %v4523_v60  ;;  %4781 = vmatprep.subr.mxu1 %v3732_v61 }
 0xa28   :  { %4762 = vmatpush3.msra.mxu0 %v3730_v59 }
 0xa29   :  { %4782 = vmatpush3.msra.mxu1 %v3732_v61  ;;  %4764 = vmatmul.mubr.msk.f32.vlgmr.msra.gmra.mrb[76].mxu0 %vm1835_vm2, %v3840_v62 }
 0xa2a   :  { %5454 = vmatprep.subr.bf16.mxu1 %v5453_v29  ;;  %4784 = vmatmul.mubr.msk.f32.vlgmr.msra.gmra.mrb[80].mxu1 %vm1835_vm2, %v3945_v63 }
 0xa2b   :  { %5456 = vmatpush3.bf16.msra.mxu1 %v5453_v29  ;;  %4786 = vmatprep.mubr.msk.f32.mxu1 %vm1835_vm2, %v3946_v0 }
 0xa2c   :  { %5458 = vmatprep.subr.bf16.mxu1 %v5457_v44  ;;  %4766 = vmatprep.mubr.msk.f32.mxu0 %vm1835_vm2, %v3841_v1 }
 0xa2d   :  { %4767 = vmatmul.mubr.msk.f32.gmra.mrb[78].mxu0 %vm1835_vm2, %v3842_v3 }
 0xa2e   :  { %4787 = vmatmul.mubr.msk.f32.gmra.mrb[82].mxu1 %vm1835_vm2, %v3947_v4 }
 0xa2f   :  { %5460 = vmatpush3.bf16.msra.mxu1 %v5457_v44  ;;  %4803 = vmatprep.mubr.msk.f32.mxu1 %vm1835_vm2, %v4049_v5 }
 0xa30   :  { %5462 = vmatprep.subr.bf16.mxu1 %v5461_v58 }
 0xa33   :  { %5464 = vmatpush3.bf16.msra.mxu1 %v5461_v58 }
 0xa34   :  { %4801 = vmatprep.subr.mxu1 %v4525_v45 }
 0xa37   :  { %4802 = vmatpush3.msra.mxu1 %v4525_v45 }
 0xa38   :  { %4804 = vmatmul.mubr.msk.f32.vlgmr.msra.gmra.mrb[80].mxu1 %vm1835_vm2, %v4050_v6 }
 0xa39   :  { %4806 = vmatprep.mubr.msk.f32.mxu1 %vm1835_vm2, %v4051_v8 }
 0xa3c   :  { %4807 = vmatmul.mubr.msk.f32.gmra.mrb[82].mxu1 %vm1835_vm2, %v4052_v9 }
 0xafc   :  { %v4765_v10 = vpop.f32.mrb[76].mxu0 }
 0xafd   :  { %v3921_v11 = vpop.f32.mrb[77].mxu0  ;;  %v3941_v14 = vadd.f32 %v4765_v10, %v3836_v36 }
 0xafe   :  { %v3940_v7 = vadd.f32 %v3921_v11, %v3835_v13 }
 0xb00   :  { %v4768_v12 = vpop.f32.mrb[78].mxu0 }
 0xb01   :  { %v3931_v50 = vpop.f32.mrb[79].mxu0  ;;  %v3943_v20 = vadd.f32 %v4768_v12, %v3838_v15 }
 0xb02   :  { %v3942_v22 = vadd.f32 %v3931_v50, %v3837_v16 }
 0xb0b   :  { %v4805_v17 = vpop.f32.mrb[80].mxu1 }
 0xb0c   :  { %v5506_v18 = vadd.f32 %v4805_v17, %v3941_v14  ;;  %v4131_v19 = vpop.f32.mrb[81].mxu1 }
 0xb0d   :  { %v5508_v21 = vadd.f32 %v4131_v19, %v3940_v7 }
 0xb0e   :  { %v4155_v23 = vmax.f32 %v5506_v18, 0.0 }
 0xb0f   :  { %v4154_v24 = vmax.f32 %v5508_v21, 0.0  ;;  %v4808_v25 = vpop.f32.mrb[82].mxu1 }
 0xb10   :  { %4312 = vst [vmem:[%s6708_s12 + $0x28] sm:$0xff] %v4155_v23  ;;  %v5510_v26 = vadd.f32 %v4808_v25, %v3943_v20  ;;  %v4141_v27 = vpop.f32.mrb[83].mxu1 }
 0xb11   :  { %4311 = vst [vmem:[%s6708_s12 + $0x20] sm:$0xff] %v4154_v24  ;;  %v5512_v28 = vadd.f32 %v4141_v27, %v3942_v22 }
 0xb12   :  { %v4157_v29 = vmax.f32 %v5510_v26, 0.0 }
 0xb13   :  { %v4156_v30 = vmax.f32 %v5512_v28, 0.0 }
 0xb14   :  { %4314 = vst [vmem:[%s6708_s12 + $0x38] sm:$0xff] %v4157_v29 }
 0xb15   :  { %4313 = vst [vmem:[%s6708_s12 + $0x30] sm:$0xff] %v4156_v30 }
 0xb16   :  { %4167 = vsyncpa [#allocation3], 1 }
 0xb17   :  { %4168 = vsyncpa [#allocation7], 1 }
 0xb18   :  { %4169 = vsyncpa [#allocation10], 1 }
 0xb19   :  { %4170 = vsyncpa [#allocation13], 1 }
 0xb1a   :  { %4171 = vsyncpa [#allocation4], 1 }

</bundles_post_ra>
